<compile_context>
chip_gen: v7x
topology: tpu7x:2x2x1
jax: 0.10.0
libtpu: 0.0.40
codegen_flags: <defaults>
</compile_context>

<pallas_src>
import functools
import math

import jax
import jax.numpy as jnp
from jax.experimental import pallas as pl
from jax.experimental.pallas import tpu as pltpu


# ----------------------------------------------------------------------------
# Pallas kernel: one full bidirectional LSTM layer in a single invocation.
# ----------------------------------------------------------------------------
def _bilstm_layer_kernel(x_ref, wih_ref, whh_ref, b_ref, h0_ref, c0_ref,
                         out_ref, hT_ref, cT_ref, xg_scr):
    T, B, _ = x_ref.shape
    H = whh_ref.shape[0]

    # ---- Pre-pass: input projection for every timestep, both directions. ----
    # (T, B, Din) x (Din, 8H) -> (T, B, 8H); bias folded in here.
    xg = jax.lax.dot_general(
        x_ref[...], wih_ref[...],
        dimension_numbers=(((2,), (0,)), ((), ())),
        preferred_element_type=jnp.float32)
    xg_scr[...] = xg + b_ref[...]

    whh = whh_ref[...]                                     # (H, 8H)
    h0_both = jnp.concatenate(
        [h0_ref[0].astype(jnp.float32), h0_ref[1].astype(jnp.float32)], axis=0)
    c0_both = jnp.concatenate(
        [c0_ref[0].astype(jnp.float32), c0_ref[1].astype(jnp.float32)], axis=0)

    def step(t, carry):
        h_both, c_both = carry                             # (2B, H) each
        tb = T - 1 - t                                     # reversed time index

        # Fused recurrent matmul covering both directions: (2B, H) @ (H, 8H).
        rg = jnp.dot(h_both, whh, preferred_element_type=jnp.float32)

        x_f = xg_scr[t]                                    # (B, 8H)
        x_b = xg_scr[tb]                                   # (B, 8H)
        g_f = rg[:B, 0:4 * H] + x_f[:, 0:4 * H]            # (B, 4H) forward
        g_b = rg[B:2 * B, 4 * H:8 * H] + x_b[:, 4 * H:8 * H]  # (B, 4H) backward
        g = jnp.concatenate([g_f, g_b], axis=0)            # (2B, 4H)

        i_g = jax.nn.sigmoid(g[:, 0 * H:1 * H])
        f_g = jax.nn.sigmoid(g[:, 1 * H:2 * H])
        g_g = jnp.tanh(g[:, 2 * H:3 * H])
        o_g = jax.nn.sigmoid(g[:, 3 * H:4 * H])

        c_new = f_g * c_both + i_g * g_g
        h_new = o_g * jnp.tanh(c_new)

        # Forward hidden -> out[t, :, :H]; backward hidden -> out[T-1-t, :, H:].
        out_ref[pl.ds(t, 1), :, pl.ds(0, H)] = (
            h_new[:B][None].astype(out_ref.dtype))
        out_ref[pl.ds(tb, 1), :, pl.ds(H, H)] = (
            h_new[B:][None].astype(out_ref.dtype))
        return h_new, c_new

    h_fin, c_fin = jax.lax.fori_loop(
        0, T, step, (h0_both, c0_both), unroll=(T <= 16))

    hT_ref[0] = h_fin[:B].astype(hT_ref.dtype)
    hT_ref[1] = h_fin[B:].astype(hT_ref.dtype)
    cT_ref[0] = c_fin[:B].astype(cT_ref.dtype)
    cT_ref[1] = c_fin[B:].astype(cT_ref.dtype)


def bidirectional_lstm_layer(x_tm,
                             w_ih_f, w_hh_f, b_ih_f, b_hh_f,
                             w_ih_b, w_hh_b, b_ih_b, b_hh_b,
                             h0, c0):
    """x_tm: (T, B, Din) time-major. h0/c0: (2, B, H) [fwd, bwd].

    Returns (out (T, B, 2H), hT (2, B, H), cT (2, B, H)).
    """
    T, B, Din = x_tm.shape
    H = w_hh_f.shape[1]

    # Fused weights: columns [0:4H] = forward, [4H:8H] = backward.
    wih = jnp.concatenate([jnp.transpose(w_ih_f), jnp.transpose(w_ih_b)], axis=1)
    whh = jnp.concatenate([jnp.transpose(w_hh_f), jnp.transpose(w_hh_b)], axis=1)
    b = jnp.concatenate([b_ih_f + b_hh_f, b_ih_b + b_hh_b]).reshape(1, 8 * H)

    # TODO(synk): for very long sequences (large T*B*8H scratch) chunk the time
    # axis across grid steps; at these shapes the whole layer fits in VMEM.
    out, hT, cT = pl.pallas_call(
        _bilstm_layer_kernel,
        out_shape=(jax.ShapeDtypeStruct((T, B, 2 * H), jnp.float32),
                   jax.ShapeDtypeStruct((2, B, H), jnp.float32),
                   jax.ShapeDtypeStruct((2, B, H), jnp.float32)),
        grid_spec=pltpu.PrefetchScalarGridSpec(
            num_scalar_prefetch=0,
            grid=(1,),
            in_specs=[
                pl.BlockSpec((T, B, Din), lambda i: (0, 0, 0)),   # x
                pl.BlockSpec((Din, 8 * H), lambda i: (0, 0)),     # W_ih fused
                pl.BlockSpec((H, 8 * H), lambda i: (0, 0)),       # W_hh fused
                pl.BlockSpec((1, 8 * H), lambda i: (0, 0)),       # bias fused
                pl.BlockSpec((2, B, H), lambda i: (0, 0, 0)),     # h0
                pl.BlockSpec((2, B, H), lambda i: (0, 0, 0)),     # c0
            ],
            out_specs=(
                pl.BlockSpec((T, B, 2 * H), lambda i: (0, 0, 0)),
                pl.BlockSpec((2, B, H), lambda i: (0, 0, 0)),
                pl.BlockSpec((2, B, H), lambda i: (0, 0, 0)),
            ),
            scratch_shapes=[pltpu.VMEM((T, B, 8 * H), jnp.float32)],
        ),
        compiler_params=pltpu.CompilerParams(
            dimension_semantics=("arbitrary",)),
    )(x_tm, wih, whh, b, h0, c0)
    return out, hT, cT


# ----------------------------------------------------------------------------
# Pallas kernel: fc(1) -> sigmoid -> mean over (seq, 1), tiled over T with a
# VMEM accumulator.  Uses elementwise multiply + reduce instead of an N=1
# matvec (avoids wasting the MXU and lane-width-1 matmul outputs).
# ----------------------------------------------------------------------------
def _fc_sigmoid_mean_kernel(x_ref, w_ref, b_ref, out_ref, acc_scr, *, inv_t):
    i = pl.program_id(0)

    @pl.when(i == 0)
    def _():
        acc_scr[...] = jnp.zeros_like(acc_scr)

    x = x_ref[...]                                          # (TC, B, D)
    w = w_ref[...]                                          # (1, D)
    logits = jnp.sum(x * w[None], axis=-1, keepdims=True) + b_ref[0, 0]
    acc_scr[...] += jnp.sum(jax.nn.sigmoid(logits), axis=0)  # (B, 1)

    @pl.when(i == pl.num_programs(0) - 1)
    def _():
        out_ref[...] = acc_scr[...] * inv_t


def _largest_divisor_at_most(n, cap):
    c = min(n, cap)
    while n % c != 0:
        c -= 1
    return c


def fc_sigmoid_mean(lstm_out_tm, fc_w, fc_b):
    T, B, D = lstm_out_tm.shape
    w = fc_w.reshape(1, D)
    b = fc_b.reshape(1, 1)
    tc = _largest_divisor_at_most(T, 256)                   # time chunk
    kernel = functools.partial(_fc_sigmoid_mean_kernel, inv_t=1.0 / T)
    out = pl.pallas_call(
        kernel,
        out_shape=jax.ShapeDtypeStruct((B, 1), jnp.float32),
        grid_spec=pltpu.PrefetchScalarGridSpec(
            num_scalar_prefetch=0,
            grid=(T // tc,),
            in_specs=[
                pl.BlockSpec((tc, B, D), lambda i: (i, 0, 0)),
                pl.BlockSpec((1, D), lambda i: (0, 0)),
                pl.BlockSpec(memory_space=pltpu.MemorySpace.SMEM),
            ],
            out_specs=pl.BlockSpec((B, 1), lambda i: (0, 0)),
            scratch_shapes=[pltpu.VMEM((B, 1), jnp.float32)],
        ),
        compiler_params=pltpu.CompilerParams(
            dimension_semantics=("arbitrary",)),
    )(lstm_out_tm, w, b)
    return out[:, 0]


# ----------------------------------------------------------------------------
# Parameter init (deterministic, PyTorch-style uniform ranges).
# ----------------------------------------------------------------------------
def init_discriminator_params(key, num_feats, hidden_units):
    params = {}
    keys = iter(jax.random.split(key, 2 * 2 * 4 + 2))
    k = 1.0 / math.sqrt(hidden_units)
    for layer in range(2):
        in_dim = num_feats if layer == 0 else 2 * hidden_units
        for d in range(2):
            sfx = f"l{layer}_d{d}"
            params[f"w_ih_{sfx}"] = jax.random.uniform(
                next(keys), (4 * hidden_units, in_dim), jnp.float32, -k, k)
            params[f"w_hh_{sfx}"] = jax.random.uniform(
                next(keys), (4 * hidden_units, hidden_units), jnp.float32, -k, k)
            params[f"b_ih_{sfx}"] = jax.random.uniform(
                next(keys), (4 * hidden_units,), jnp.float32, -k, k)
            params[f"b_hh_{sfx}"] = jax.random.uniform(
                next(keys), (4 * hidden_units,), jnp.float32, -k, k)
    k_fc = 1.0 / math.sqrt(2 * hidden_units)
    params["fc_w"] = jax.random.uniform(
        next(keys), (1, 2 * hidden_units), jnp.float32, -k_fc, k_fc)
    params["fc_b"] = jax.random.uniform(
        next(keys), (1,), jnp.float32, -k_fc, k_fc)
    return params


# ----------------------------------------------------------------------------
# Discriminator forward (matches PyTorch module semantics, eval-mode dropout).
# ----------------------------------------------------------------------------
def discriminator_forward(params, note_seq, state):
    """note_seq: (B, T, num_feats) batch-first. state: (h0, c0), each (4, B, H)."""
    # TODO(synk): nn.Dropout / inter-layer LSTM dropout are identity here
    # (inference semantics); training-mode stochastic dropout is not implemented.
    h0, c0 = state
    x_tm = jnp.transpose(note_seq, (1, 0, 2))               # (T, B, F) time-major
    layer_in = x_tm
    h_n, c_n = [], []
    for layer in range(2):
        s0, s1 = f"l{layer}_d0", f"l{layer}_d1"
        out, hT, cT = bidirectional_lstm_layer(
            layer_in,
            params[f"w_ih_{s0}"], params[f"w_hh_{s0}"],
            params[f"b_ih_{s0}"], params[f"b_hh_{s0}"],
            params[f"w_ih_{s1}"], params[f"w_hh_{s1}"],
            params[f"b_ih_{s1}"], params[f"b_hh_{s1}"],
            h0[2 * layer:2 * layer + 2], c0[2 * layer:2 * layer + 2])
        layer_in = out                                      # (T, B, 2H)
        h_n.append(hT)
        c_n.append(cT)
    lstm_out_tm = layer_in
    out = fc_sigmoid_mean(lstm_out_tm, params["fc_w"], params["fc_b"])   # (B,)
    lstm_out = jnp.transpose(lstm_out_tm, (1, 0, 2))                     # (B, T, 2H)
    return out, lstm_out, (jnp.concatenate(h_n, axis=0),
                           jnp.concatenate(c_n, axis=0))


# ----------------------------------------------------------------------------
# Pure-JAX reference (for correctness check only).
# ----------------------------------------------------------------------------
def _ref_lstm_direction(x_tm, w_ih, w_hh, b_ih, b_hh, h0, c0):
    H = w_hh.shape[1]

    def step(carry, x_t):
        h, c = carry
        gates = x_t @ w_ih.T + h @ w_hh.T + b_ih + b_hh
        i = jax.nn.sigmoid(gates[:, :H])
        f = jax.nn.sigmoid(gates[:, H:2 * H])
        g = jnp.tanh(gates[:, 2 * H:3 * H])
        o = jax.nn.sigmoid(gates[:, 3 * H:])
        c = f * c + i * g
        h = o * jnp.tanh(c)
        return (h, c), h

    (hT, cT), outs = jax.lax.scan(step, (h0, c0), x_tm)
    return outs, hT, cT


def _ref_forward(params, note_seq, state):
    h0, c0 = state
    layer_in = jnp.transpose(note_seq, (1, 0, 2))
    h_n, c_n = [], []
    for layer in range(2):
        outs = []
        for direction in range(2):
            sfx = f"l{layer}_d{direction}"
            idx = layer * 2 + direction
            xin = layer_in if direction == 0 else jnp.flip(layer_in, axis=0)
            out, hT, cT = _ref_lstm_direction(
                xin, params[f"w_ih_{sfx}"], params[f"w_hh_{sfx}"],
                params[f"b_ih_{sfx}"], params[f"b_hh_{sfx}"],
                h0[idx], c0[idx])
            if direction == 1:
                out = jnp.flip(out, axis=0)
            outs.append(out)
            h_n.append(hT)
            c_n.append(cT)
        layer_in = jnp.concatenate(outs, axis=-1)
    lstm_out = jnp.transpose(layer_in, (1, 0, 2))
    logits = lstm_out @ params["fc_w"].T + params["fc_b"]
    out = jnp.mean(jax.nn.sigmoid(logits), axis=(1, 2))
    return out, lstm_out, jnp.stack(h_n, 0), jnp.stack(c_n, 0)


if __name__ == "__main__":
    B, T, NUM_FEATS, HIDDEN = 2, 8, 4, 32

    key = jax.random.PRNGKey(0)
    kp, kx, kh, kc = jax.random.split(key, 4)
    params = init_discriminator_params(kp, NUM_FEATS, HIDDEN)
    note_seq = jax.random.normal(kx, (B, T, NUM_FEATS), jnp.float32)
    h0 = jax.random.uniform(kh, (2 * 2, B, HIDDEN), jnp.float32)
    c0 = jax.random.uniform(kc, (2 * 2, B, HIDDEN), jnp.float32)

    fwd = jax.jit(discriminator_forward)
    out, lstm_out, (h_n, c_n) = fwd(params, note_seq, (h0, c0))
    jax.block_until_ready((out, lstm_out, h_n, c_n))

    assert out.shape == (B,)
    assert lstm_out.shape == (B, T, 2 * HIDDEN)
    assert h_n.shape == (4, B, HIDDEN) and c_n.shape == (4, B, HIDDEN)

    ref_out, ref_lstm_out, ref_h_n, ref_c_n = _ref_forward(
        params, note_seq, (h0, c0))
    assert jnp.allclose(out, ref_out, atol=1e-4, rtol=1e-3)
    assert jnp.allclose(lstm_out, ref_lstm_out, atol=1e-4, rtol=1e-3)
    assert jnp.allclose(h_n, ref_h_n, atol=1e-4, rtol=1e-3)
    assert jnp.allclose(c_n, ref_c_n, atol=1e-4, rtol=1e-3)

    print("KERNEL_OK")
</pallas_src>

<mosaic_0001>
module attributes {stable_mosaic.version = 11 : i64} {
  func.func @_bilstm_layer_kernel(%arg0: i32, %arg1: memref<8x2x4xf32, #tpu.memory_space<vmem>>, %arg2: memref<4x256xf32, #tpu.memory_space<vmem>>, %arg3: memref<32x256xf32, #tpu.memory_space<vmem>>, %arg4: memref<1x256xf32, #tpu.memory_space<vmem>>, %arg5: memref<2x2x32xf32, #tpu.memory_space<vmem>>, %arg6: memref<2x2x32xf32, #tpu.memory_space<vmem>>, %arg7: memref<8x2x64xf32, #tpu.memory_space<vmem>>, %arg8: memref<2x2x32xf32, #tpu.memory_space<vmem>>, %arg9: memref<2x2x32xf32, #tpu.memory_space<vmem>>, %arg10: memref<8x2x256xf32, #tpu.memory_space<vmem>>) attributes {dimension_semantics = [#tpu.dimension_semantics<arbitrary>], iteration_bounds = array<i64: 1>, scalar_prefetch = 0 : i64, scratch_operands = 1 : i64, tpu.core_type = #tpu.core_type<tc>, window_params = [{pipeline_mode = #tpu.pipeline_mode<synchronous>, transform_indices = @transform_0, window_bounds = array<i64: 8, 2, 4>}, {pipeline_mode = #tpu.pipeline_mode<synchronous>, transform_indices = @transform_1, window_bounds = array<i64: 4, 256>}, {pipeline_mode = #tpu.pipeline_mode<synchronous>, transform_indices = @transform_2, window_bounds = array<i64: 32, 256>}, {pipeline_mode = #tpu.pipeline_mode<synchronous>, transform_indices = @transform_3, window_bounds = array<i64: 1, 256>}, {pipeline_mode = #tpu.pipeline_mode<synchronous>, transform_indices = @transform_4, window_bounds = array<i64: 2, 2, 32>}, {pipeline_mode = #tpu.pipeline_mode<synchronous>, transform_indices = @transform_5, window_bounds = array<i64: 2, 2, 32>}, {pipeline_mode = #tpu.pipeline_mode<synchronous>, transform_indices = @transform_6, window_bounds = array<i64: 8, 2, 64>}, {pipeline_mode = #tpu.pipeline_mode<synchronous>, transform_indices = @transform_7, window_bounds = array<i64: 2, 2, 32>}, {pipeline_mode = #tpu.pipeline_mode<synchronous>, transform_indices = @transform_8, window_bounds = array<i64: 2, 2, 32>}]} {
    %c0 = arith.constant 0 : index
    %c0_0 = arith.constant 0 : index
    %c0_1 = arith.constant 0 : index
    %0 = vector.load %arg1[%c0, %c0_0, %c0_1] : memref<8x2x4xf32, #tpu.memory_space<vmem>>, vector<8x2x4xf32>
    %c0_2 = arith.constant 0 : index
    %c0_3 = arith.constant 0 : index
    %1 = vector.load %arg2[%c0_2, %c0_3] : memref<4x256xf32, #tpu.memory_space<vmem>>, vector<4x256xf32>
    %cst = arith.constant dense<0.000000e+00> : vector<8x2x256xf32>
    %2 = tpu.matmul %0, %1, %cst {dimension_numbers = #tpu.dot_dimension_numbers<[2], [0], [0, 1], [1], [0, 0, 0, 1, 1, 1], [], []>} : vector<8x2x4xf32>, vector<4x256xf32>, vector<8x2x256xf32> -> vector<8x2x256xf32>
    %c0_4 = arith.constant 0 : index
    %c0_5 = arith.constant 0 : index
    %3 = vector.load %arg4[%c0_4, %c0_5] : memref<1x256xf32, #tpu.memory_space<vmem>>, vector<1x256xf32>
    %4 = vector.shape_cast %3 : vector<1x256xf32> to vector<1x1x256xf32>
    %5 = vector.broadcast %4 : vector<1x1x256xf32> to vector<8x2x256xf32>
    %6 = arith.addf %2, %5 : vector<8x2x256xf32>
    %c0_6 = arith.constant 0 : index
    %c0_7 = arith.constant 0 : index
    %c0_8 = arith.constant 0 : index
    %7 = vector.load %arg10[%c0_6, %c0_7, %c0_8] : memref<8x2x256xf32, #tpu.memory_space<vmem>>, vector<8x2x256xf32>
    tpu.vector_store %arg10[%c0_6, %c0_7, %c0_8], %6 {strides = array<i32>} : memref<8x2x256xf32, #tpu.memory_space<vmem>>, vector<8x2x256xf32>,
    %c0_9 = arith.constant 0 : index
    %c0_10 = arith.constant 0 : index
    %8 = vector.load %arg3[%c0_9, %c0_10] : memref<32x256xf32, #tpu.memory_space<vmem>>, vector<32x256xf32>
    %c0_11 = arith.constant 0 : index
    %c0_12 = arith.constant 0 : index
    %c0_13 = arith.constant 0 : index
    %9 = vector.load %arg5[%c0_11, %c0_12, %c0_13] : memref<2x2x32xf32, #tpu.memory_space<vmem>>, vector<1x2x32xf32>
    %10 = vector.shape_cast %9 : vector<1x2x32xf32> to vector<2x32xf32>
    %c1 = arith.constant 1 : index
    %c0_14 = arith.constant 0 : index
    %c0_15 = arith.constant 0 : index
    %11 = vector.load %arg5[%c1, %c0_14, %c0_15] : memref<2x2x32xf32, #tpu.memory_space<vmem>>, vector<1x2x32xf32>
    %12 = vector.shape_cast %11 : vector<1x2x32xf32> to vector<2x32xf32>
    %13 = tpu.concatenate %10, %12 in 0 : vector<2x32xf32>, vector<2x32xf32> -> vector<4x32xf32>
    %c0_16 = arith.constant 0 : index
    %c0_17 = arith.constant 0 : index
    %c0_18 = arith.constant 0 : index
    %14 = vector.load %arg6[%c0_16, %c0_17, %c0_18] : memref<2x2x32xf32, #tpu.memory_space<vmem>>, vector<1x2x32xf32>
    %15 = vector.shape_cast %14 : vector<1x2x32xf32> to vector<2x32xf32>
    %c1_19 = arith.constant 1 : index
    %c0_20 = arith.constant 0 : index
    %c0_21 = arith.constant 0 : index
    %16 = vector.load %arg6[%c1_19, %c0_20, %c0_21] : memref<2x2x32xf32, #tpu.memory_space<vmem>>, vector<1x2x32xf32>
    %17 = vector.shape_cast %16 : vector<1x2x32xf32> to vector<2x32xf32>
    %18 = tpu.concatenate %15, %17 in 0 : vector<2x32xf32>, vector<2x32xf32> -> vector<4x32xf32>
    %c0_i32 = arith.constant 0 : i32
    %c7_i32 = arith.constant 7 : i32
    %19 = arith.subi %c7_i32, %c0_i32 : i32
    %cst_22 = arith.constant dense<0.000000e+00> : vector<4x256xf32>
    %20 = tpu.matmul %13, %8, %cst_22 {dimension_numbers = #tpu.dot_dimension_numbers<[1], [0], [0], [1], [0, 0, 1, 1], [], []>} : vector<4x32xf32>, vector<32x256xf32>, vector<4x256xf32> -> vector<4x256xf32>
    %21 = arith.index_cast %c0_i32 : i32 to index
    %c0_23 = arith.constant 0 : index
    %c0_24 = arith.constant 0 : index
    %22 = vector.load %arg10[%21, %c0_23, %c0_24] : memref<8x2x256xf32, #tpu.memory_space<vmem>>, vector<1x2x256xf32>
    %23 = vector.shape_cast %22 : vector<1x2x256xf32> to vector<2x256xf32>
    %24 = arith.index_cast %19 : i32 to index
    %c0_25 = arith.constant 0 : index
    %c0_26 = arith.constant 0 : index
    %25 = vector.load %arg10[%24, %c0_25, %c0_26] : memref<8x2x256xf32, #tpu.memory_space<vmem>>, vector<1x2x256xf32>
    %26 = vector.shape_cast %25 : vector<1x2x256xf32> to vector<2x256xf32>
    %27 = vector.extract_strided_slice %20 {offsets = [0, 0], sizes = [2, 128], strides = [1, 1]} : vector<4x256xf32> to vector<2x128xf32>
    %28 = vector.extract_strided_slice %23 {offsets = [0, 0], sizes = [2, 128], strides = [1, 1]} : vector<2x256xf32> to vector<2x128xf32>
    %29 = arith.addf %27, %28 : vector<2x128xf32>
    %30 = vector.extract_strided_slice %20 {offsets = [2, 128], sizes = [2, 128], strides = [1, 1]} : vector<4x256xf32> to vector<2x128xf32>
    %31 = vector.extract_strided_slice %26 {offsets = [0, 128], sizes = [2, 128], strides = [1, 1]} : vector<2x256xf32> to vector<2x128xf32>
    %32 = arith.addf %30, %31 : vector<2x128xf32>
    %33 = tpu.concatenate %29, %32 in 0 : vector<2x128xf32>, vector<2x128xf32> -> vector<4x128xf32>
    %34 = vector.extract_strided_slice %33 {offsets = [0, 0], sizes = [4, 32], strides = [1, 1]} : vector<4x128xf32> to vector<4x32xf32>
    %35 = arith.negf %34 : vector<4x32xf32>
    %36 = math.exp %35 : vector<4x32xf32>
    %cst_27 = arith.constant 1.000000e+00 : f32
    %37 = vector.broadcast %cst_27 : f32 to vector<4x32xf32>
    %38 = arith.addf %37, %36 : vector<4x32xf32>
    %39 = arith.divf %37, %38 : vector<4x32xf32>
    %40 = vector.extract_strided_slice %33 {offsets = [0, 32], sizes = [4, 32], strides = [1, 1]} : vector<4x128xf32> to vector<4x32xf32>
    %41 = arith.negf %40 : vector<4x32xf32>
    %42 = math.exp %41 : vector<4x32xf32>
    %cst_28 = arith.constant 1.000000e+00 : f32
    %43 = vector.broadcast %cst_28 : f32 to vector<4x32xf32>
    %44 = arith.addf %43, %42 : vector<4x32xf32>
    %45 = arith.divf %43, %44 : vector<4x32xf32>
    %46 = vector.extract_strided_slice %33 {offsets = [0, 64], sizes = [4, 32], strides = [1, 1]} : vector<4x128xf32> to vector<4x32xf32>
    %47 = math.tanh %46 : vector<4x32xf32>
    %48 = vector.extract_strided_slice %33 {offsets = [0, 96], sizes = [4, 32], strides = [1, 1]} : vector<4x128xf32> to vector<4x32xf32>
    %49 = arith.negf %48 : vector<4x32xf32>
    %50 = math.exp %49 : vector<4x32xf32>
    %cst_29 = arith.constant 1.000000e+00 : f32
    %51 = vector.broadcast %cst_29 : f32 to vector<4x32xf32>
    %52 = arith.addf %51, %50 : vector<4x32xf32>
    %53 = arith.divf %51, %52 : vector<4x32xf32>
    %54 = arith.mulf %45, %18 : vector<4x32xf32>
    %55 = arith.mulf %39, %47 : vector<4x32xf32>
    %56 = arith.addf %54, %55 : vector<4x32xf32>
    %57 = math.tanh %56 : vector<4x32xf32>
    %58 = arith.mulf %53, %57 : vector<4x32xf32>
    %59 = vector.extract_strided_slice %58 {offsets = [0, 0], sizes = [2, 32], strides = [1, 1]} : vector<4x32xf32> to vector<2x32xf32>
    %60 = vector.shape_cast %59 : vector<2x32xf32> to vector<1x2x32xf32>
    %61 = arith.index_cast %c0_i32 : i32 to index
    %c0_30 = arith.constant 0 : index
    %c0_31 = arith.constant 0 : index
    %62 = vector.load %arg7[%61, %c0_30, %c0_31] : memref<8x2x64xf32, #tpu.memory_space<vmem>>, vector<1x2x32xf32>
    tpu.vector_store %arg7[%61, %c0_30, %c0_31], %60 {strides = array<i32>} : memref<8x2x64xf32, #tpu.memory_space<vmem>>, vector<1x2x32xf32>,
    %63 = vector.extract_strided_slice %58 {offsets = [2, 0], sizes = [2, 32], strides = [1, 1]} : vector<4x32xf32> to vector<2x32xf32>
    %64 = vector.shape_cast %63 : vector<2x32xf32> to vector<1x2x32xf32>
    %65 = arith.index_cast %19 : i32 to index
    %c0_32 = arith.constant 0 : index
    %c32 = arith.constant 32 : index
    %66 = vector.load %arg7[%65, %c0_32, %c32] : memref<8x2x64xf32, #tpu.memory_space<vmem>>, vector<1x2x32xf32>
    tpu.vector_store %arg7[%65, %c0_32, %c32], %64 {strides = array<i32>} : memref<8x2x64xf32, #tpu.memory_space<vmem>>, vector<1x2x32xf32>,
    %c1_i32 = arith.constant 1 : i32
    %c7_i32_33 = arith.constant 7 : i32
    %67 = arith.subi %c7_i32_33, %c1_i32 : i32
    %cst_34 = arith.constant dense<0.000000e+00> : vector<4x256xf32>
    %68 = tpu.matmul %58, %8, %cst_34 {dimension_numbers = #tpu.dot_dimension_numbers<[1], [0], [0], [1], [0, 0, 1, 1], [], []>} : vector<4x32xf32>, vector<32x256xf32>, vector<4x256xf32> -> vector<4x256xf32>
    %69 = arith.index_cast %c1_i32 : i32 to index
    %c0_35 = arith.constant 0 : index
    %c0_36 = arith.constant 0 : index
    %70 = vector.load %arg10[%69, %c0_35, %c0_36] : memref<8x2x256xf32, #tpu.memory_space<vmem>>, vector<1x2x256xf32>
    %71 = vector.shape_cast %70 : vector<1x2x256xf32> to vector<2x256xf32>
    %72 = arith.index_cast %67 : i32 to index
    %c0_37 = arith.constant 0 : index
    %c0_38 = arith.constant 0 : index
    %73 = vector.load %arg10[%72, %c0_37, %c0_38] : memref<8x2x256xf32, #tpu.memory_space<vmem>>, vector<1x2x256xf32>
    %74 = vector.shape_cast %73 : vector<1x2x256xf32> to vector<2x256xf32>
    %75 = vector.extract_strided_slice %68 {offsets = [0, 0], sizes = [2, 128], strides = [1, 1]} : vector<4x256xf32> to vector<2x128xf32>
    %76 = vector.extract_strided_slice %71 {offsets = [0, 0], sizes = [2, 128], strides = [1, 1]} : vector<2x256xf32> to vector<2x128xf32>
    %77 = arith.addf %75, %76 : vector<2x128xf32>
    %78 = vector.extract_strided_slice %68 {offsets = [2, 128], sizes = [2, 128], strides = [1, 1]} : vector<4x256xf32> to vector<2x128xf32>
    %79 = vector.extract_strided_slice %74 {offsets = [0, 128], sizes = [2, 128], strides = [1, 1]} : vector<2x256xf32> to vector<2x128xf32>
    %80 = arith.addf %78, %79 : vector<2x128xf32>
    %81 = tpu.concatenate %77, %80 in 0 : vector<2x128xf32>, vector<2x128xf32> -> vector<4x128xf32>
    %82 = vector.extract_strided_slice %81 {offsets = [0, 0], sizes = [4, 32], strides = [1, 1]} : vector<4x128xf32> to vector<4x32xf32>
    %83 = arith.negf %82 : vector<4x32xf32>
    %84 = math.exp %83 : vector<4x32xf32>
    %cst_39 = arith.constant 1.000000e+00 : f32
    %85 = vector.broadcast %cst_39 : f32 to vector<4x32xf32>
    %86 = arith.addf %85, %84 : vector<4x32xf32>
    %87 = arith.divf %85, %86 : vector<4x32xf32>
    %88 = vector.extract_strided_slice %81 {offsets = [0, 32], sizes = [4, 32], strides = [1, 1]} : vector<4x128xf32> to vector<4x32xf32>
    %89 = arith.negf %88 : vector<4x32xf32>
    %90 = math.exp %89 : vector<4x32xf32>
    %cst_40 = arith.constant 1.000000e+00 : f32
    %91 = vector.broadcast %cst_40 : f32 to vector<4x32xf32>
    %92 = arith.addf %91, %90 : vector<4x32xf32>
    %93 = arith.divf %91, %92 : vector<4x32xf32>
    %94 = vector.extract_strided_slice %81 {offsets = [0, 64], sizes = [4, 32], strides = [1, 1]} : vector<4x128xf32> to vector<4x32xf32>
    %95 = math.tanh %94 : vector<4x32xf32>
    %96 = vector.extract_strided_slice %81 {offsets = [0, 96], sizes = [4, 32], strides = [1, 1]} : vector<4x128xf32> to vector<4x32xf32>
    %97 = arith.negf %96 : vector<4x32xf32>
    %98 = math.exp %97 : vector<4x32xf32>
    %cst_41 = arith.constant 1.000000e+00 : f32
    %99 = vector.broadcast %cst_41 : f32 to vector<4x32xf32>
    %100 = arith.addf %99, %98 : vector<4x32xf32>
    %101 = arith.divf %99, %100 : vector<4x32xf32>
    %102 = arith.mulf %93, %56 : vector<4x32xf32>
    %103 = arith.mulf %87, %95 : vector<4x32xf32>
    %104 = arith.addf %102, %103 : vector<4x32xf32>
    %105 = math.tanh %104 : vector<4x32xf32>
    %106 = arith.mulf %101, %105 : vector<4x32xf32>
    %107 = vector.extract_strided_slice %106 {offsets = [0, 0], sizes = [2, 32], strides = [1, 1]} : vector<4x32xf32> to vector<2x32xf32>
    %108 = vector.shape_cast %107 : vector<2x32xf32> to vector<1x2x32xf32>
    %109 = arith.index_cast %c1_i32 : i32 to index
    %c0_42 = arith.constant 0 : index
    %c0_43 = arith.constant 0 : index
    %110 = vector.load %arg7[%109, %c0_42, %c0_43] : memref<8x2x64xf32, #tpu.memory_space<vmem>>, vector<1x2x32xf32>
    tpu.vector_store %arg7[%109, %c0_42, %c0_43], %108 {strides = array<i32>} : memref<8x2x64xf32, #tpu.memory_space<vmem>>, vector<1x2x32xf32>,
    %111 = vector.extract_strided_slice %106 {offsets = [2, 0], sizes = [2, 32], strides = [1, 1]} : vector<4x32xf32> to vector<2x32xf32>
    %112 = vector.shape_cast %111 : vector<2x32xf32> to vector<1x2x32xf32>
    %113 = arith.index_cast %67 : i32 to index
    %c0_44 = arith.constant 0 : index
    %c32_45 = arith.constant 32 : index
    %114 = vector.load %arg7[%113, %c0_44, %c32_45] : memref<8x2x64xf32, #tpu.memory_space<vmem>>, vector<1x2x32xf32>
    tpu.vector_store %arg7[%113, %c0_44, %c32_45], %112 {strides = array<i32>} : memref<8x2x64xf32, #tpu.memory_space<vmem>>, vector<1x2x32xf32>,
    %c2_i32 = arith.constant 2 : i32
    %c7_i32_46 = arith.constant 7 : i32
    %115 = arith.subi %c7_i32_46, %c2_i32 : i32
    %cst_47 = arith.constant dense<0.000000e+00> : vector<4x256xf32>
    %116 = tpu.matmul %106, %8, %cst_47 {dimension_numbers = #tpu.dot_dimension_numbers<[1], [0], [0], [1], [0, 0, 1, 1], [], []>} : vector<4x32xf32>, vector<32x256xf32>, vector<4x256xf32> -> vector<4x256xf32>
    %117 = arith.index_cast %c2_i32 : i32 to index
    %c0_48 = arith.constant 0 : index
    %c0_49 = arith.constant 0 : index
    %118 = vector.load %arg10[%117, %c0_48, %c0_49] : memref<8x2x256xf32, #tpu.memory_space<vmem>>, vector<1x2x256xf32>
    %119 = vector.shape_cast %118 : vector<1x2x256xf32> to vector<2x256xf32>
    %120 = arith.index_cast %115 : i32 to index
    %c0_50 = arith.constant 0 : index
    %c0_51 = arith.constant 0 : index
    %121 = vector.load %arg10[%120, %c0_50, %c0_51] : memref<8x2x256xf32, #tpu.memory_space<vmem>>, vector<1x2x256xf32>
    %122 = vector.shape_cast %121 : vector<1x2x256xf32> to vector<2x256xf32>
    %123 = vector.extract_strided_slice %116 {offsets = [0, 0], sizes = [2, 128], strides = [1, 1]} : vector<4x256xf32> to vector<2x128xf32>
    %124 = vector.extract_strided_slice %119 {offsets = [0, 0], sizes = [2, 128], strides = [1, 1]} : vector<2x256xf32> to vector<2x128xf32>
    %125 = arith.addf %123, %124 : vector<2x128xf32>
    %126 = vector.extract_strided_slice %116 {offsets = [2, 128], sizes = [2, 128], strides = [1, 1]} : vector<4x256xf32> to vector<2x128xf32>
    %127 = vector.extract_strided_slice %122 {offsets = [0, 128], sizes = [2, 128], strides = [1, 1]} : vector<2x256xf32> to vector<2x128xf32>
    %128 = arith.addf %126, %127 : vector<2x128xf32>
    %129 = tpu.concatenate %125, %128 in 0 : vector<2x128xf32>, vector<2x128xf32> -> vector<4x128xf32>
    %130 = vector.extract_strided_slice %129 {offsets = [0, 0], sizes = [4, 32], strides = [1, 1]} : vector<4x128xf32> to vector<4x32xf32>
    %131 = arith.negf %130 : vector<4x32xf32>
    %132 = math.exp %131 : vector<4x32xf32>
    %cst_52 = arith.constant 1.000000e+00 : f32
    %133 = vector.broadcast %cst_52 : f32 to vector<4x32xf32>
    %134 = arith.addf %133, %132 : vector<4x32xf32>
    %135 = arith.divf %133, %134 : vector<4x32xf32>
    %136 = vector.extract_strided_slice %129 {offsets = [0, 32], sizes = [4, 32], strides = [1, 1]} : vector<4x128xf32> to vector<4x32xf32>
    %137 = arith.negf %136 : vector<4x32xf32>
    %138 = math.exp %137 : vector<4x32xf32>
    %cst_53 = arith.constant 1.000000e+00 : f32
    %139 = vector.broadcast %cst_53 : f32 to vector<4x32xf32>
    %140 = arith.addf %139, %138 : vector<4x32xf32>
    %141 = arith.divf %139, %140 : vector<4x32xf32>
    %142 = vector.extract_strided_slice %129 {offsets = [0, 64], sizes = [4, 32], strides = [1, 1]} : vector<4x128xf32> to vector<4x32xf32>
    %143 = math.tanh %142 : vector<4x32xf32>
    %144 = vector.extract_strided_slice %129 {offsets = [0, 96], sizes = [4, 32], strides = [1, 1]} : vector<4x128xf32> to vector<4x32xf32>
    %145 = arith.negf %144 : vector<4x32xf32>
    %146 = math.exp %145 : vector<4x32xf32>
    %cst_54 = arith.constant 1.000000e+00 : f32
    %147 = vector.broadcast %cst_54 : f32 to vector<4x32xf32>
    %148 = arith.addf %147, %146 : vector<4x32xf32>
    %149 = arith.divf %147, %148 : vector<4x32xf32>
    %150 = arith.mulf %141, %104 : vector<4x32xf32>
    %151 = arith.mulf %135, %143 : vector<4x32xf32>
    %152 = arith.addf %150, %151 : vector<4x32xf32>
    %153 = math.tanh %152 : vector<4x32xf32>
    %154 = arith.mulf %149, %153 : vector<4x32xf32>
    %155 = vector.extract_strided_slice %154 {offsets = [0, 0], sizes = [2, 32], strides = [1, 1]} : vector<4x32xf32> to vector<2x32xf32>
    %156 = vector.shape_cast %155 : vector<2x32xf32> to vector<1x2x32xf32>
    %157 = arith.index_cast %c2_i32 : i32 to index
    %c0_55 = arith.constant 0 : index
    %c0_56 = arith.constant 0 : index
    %158 = vector.load %arg7[%157, %c0_55, %c0_56] : memref<8x2x64xf32, #tpu.memory_space<vmem>>, vector<1x2x32xf32>
    tpu.vector_store %arg7[%157, %c0_55, %c0_56], %156 {strides = array<i32>} : memref<8x2x64xf32, #tpu.memory_space<vmem>>, vector<1x2x32xf32>,
    %159 = vector.extract_strided_slice %154 {offsets = [2, 0], sizes = [2, 32], strides = [1, 1]} : vector<4x32xf32> to vector<2x32xf32>
    %160 = vector.shape_cast %159 : vector<2x32xf32> to vector<1x2x32xf32>
    %161 = arith.index_cast %115 : i32 to index
    %c0_57 = arith.constant 0 : index
    %c32_58 = arith.constant 32 : index
    %162 = vector.load %arg7[%161, %c0_57, %c32_58] : memref<8x2x64xf32, #tpu.memory_space<vmem>>, vector<1x2x32xf32>
    tpu.vector_store %arg7[%161, %c0_57, %c32_58], %160 {strides = array<i32>} : memref<8x2x64xf32, #tpu.memory_space<vmem>>, vector<1x2x32xf32>,
    %c3_i32 = arith.constant 3 : i32
    %c7_i32_59 = arith.constant 7 : i32
    %163 = arith.subi %c7_i32_59, %c3_i32 : i32
    %cst_60 = arith.constant dense<0.000000e+00> : vector<4x256xf32>
    %164 = tpu.matmul %154, %8, %cst_60 {dimension_numbers = #tpu.dot_dimension_numbers<[1], [0], [0], [1], [0, 0, 1, 1], [], []>} : vector<4x32xf32>, vector<32x256xf32>, vector<4x256xf32> -> vector<4x256xf32>
    %165 = arith.index_cast %c3_i32 : i32 to index
    %c0_61 = arith.constant 0 : index
    %c0_62 = arith.constant 0 : index
    %166 = vector.load %arg10[%165, %c0_61, %c0_62] : memref<8x2x256xf32, #tpu.memory_space<vmem>>, vector<1x2x256xf32>
    %167 = vector.shape_cast %166 : vector<1x2x256xf32> to vector<2x256xf32>
    %168 = arith.index_cast %163 : i32 to index
    %c0_63 = arith.constant 0 : index
    %c0_64 = arith.constant 0 : index
    %169 = vector.load %arg10[%168, %c0_63, %c0_64] : memref<8x2x256xf32, #tpu.memory_space<vmem>>, vector<1x2x256xf32>
    %170 = vector.shape_cast %169 : vector<1x2x256xf32> to vector<2x256xf32>
    %171 = vector.extract_strided_slice %164 {offsets = [0, 0], sizes = [2, 128], strides = [1, 1]} : vector<4x256xf32> to vector<2x128xf32>
    %172 = vector.extract_strided_slice %167 {offsets = [0, 0], sizes = [2, 128], strides = [1, 1]} : vector<2x256xf32> to vector<2x128xf32>
    %173 = arith.addf %171, %172 : vector<2x128xf32>
    %174 = vector.extract_strided_slice %164 {offsets = [2, 128], sizes = [2, 128], strides = [1, 1]} : vector<4x256xf32> to vector<2x128xf32>
    %175 = vector.extract_strided_slice %170 {offsets = [0, 128], sizes = [2, 128], strides = [1, 1]} : vector<2x256xf32> to vector<2x128xf32>
    %176 = arith.addf %174, %175 : vector<2x128xf32>
    %177 = tpu.concatenate %173, %176 in 0 : vector<2x128xf32>, vector<2x128xf32> -> vector<4x128xf32>
    %178 = vector.extract_strided_slice %177 {offsets = [0, 0], sizes = [4, 32], strides = [1, 1]} : vector<4x128xf32> to vector<4x32xf32>
    %179 = arith.negf %178 : vector<4x32xf32>
    %180 = math.exp %179 : vector<4x32xf32>
    %cst_65 = arith.constant 1.000000e+00 : f32
    %181 = vector.broadcast %cst_65 : f32 to vector<4x32xf32>
    %182 = arith.addf %181, %180 : vector<4x32xf32>
    %183 = arith.divf %181, %182 : vector<4x32xf32>
    %184 = vector.extract_strided_slice %177 {offsets = [0, 32], sizes = [4, 32], strides = [1, 1]} : vector<4x128xf32> to vector<4x32xf32>
    %185 = arith.negf %184 : vector<4x32xf32>
    %186 = math.exp %185 : vector<4x32xf32>
    %cst_66 = arith.constant 1.000000e+00 : f32
    %187 = vector.broadcast %cst_66 : f32 to vector<4x32xf32>
    %188 = arith.addf %187, %186 : vector<4x32xf32>
    %189 = arith.divf %187, %188 : vector<4x32xf32>
    %190 = vector.extract_strided_slice %177 {offsets = [0, 64], sizes = [4, 32], strides = [1, 1]} : vector<4x128xf32> to vector<4x32xf32>
    %191 = math.tanh %190 : vector<4x32xf32>
    %192 = vector.extract_strided_slice %177 {offsets = [0, 96], sizes = [4, 32], strides = [1, 1]} : vector<4x128xf32> to vector<4x32xf32>
    %193 = arith.negf %192 : vector<4x32xf32>
    %194 = math.exp %193 : vector<4x32xf32>
    %cst_67 = arith.constant 1.000000e+00 : f32
    %195 = vector.broadcast %cst_67 : f32 to vector<4x32xf32>
    %196 = arith.addf %195, %194 : vector<4x32xf32>
    %197 = arith.divf %195, %196 : vector<4x32xf32>
    %198 = arith.mulf %189, %152 : vector<4x32xf32>
    %199 = arith.mulf %183, %191 : vector<4x32xf32>
    %200 = arith.addf %198, %199 : vector<4x32xf32>
    %201 = math.tanh %200 : vector<4x32xf32>
    %202 = arith.mulf %197, %201 : vector<4x32xf32>
    %203 = vector.extract_strided_slice %202 {offsets = [0, 0], sizes = [2, 32], strides = [1, 1]} : vector<4x32xf32> to vector<2x32xf32>
    %204 = vector.shape_cast %203 : vector<2x32xf32> to vector<1x2x32xf32>
    %205 = arith.index_cast %c3_i32 : i32 to index
    %c0_68 = arith.constant 0 : index
    %c0_69 = arith.constant 0 : index
    %206 = vector.load %arg7[%205, %c0_68, %c0_69] : memref<8x2x64xf32, #tpu.memory_space<vmem>>, vector<1x2x32xf32>
    tpu.vector_store %arg7[%205, %c0_68, %c0_69], %204 {strides = array<i32>} : memref<8x2x64xf32, #tpu.memory_space<vmem>>, vector<1x2x32xf32>,
    %207 = vector.extract_strided_slice %202 {offsets = [2, 0], sizes = [2, 32], strides = [1, 1]} : vector<4x32xf32> to vector<2x32xf32>
    %208 = vector.shape_cast %207 : vector<2x32xf32> to vector<1x2x32xf32>
    %209 = arith.index_cast %163 : i32 to index
    %c0_70 = arith.constant 0 : index
    %c32_71 = arith.constant 32 : index
    %210 = vector.load %arg7[%209, %c0_70, %c32_71] : memref<8x2x64xf32, #tpu.memory_space<vmem>>, vector<1x2x32xf32>
    tpu.vector_store %arg7[%209, %c0_70, %c32_71], %208 {strides = array<i32>} : memref<8x2x64xf32, #tpu.memory_space<vmem>>, vector<1x2x32xf32>,
    %c4_i32 = arith.constant 4 : i32
    %c7_i32_72 = arith.constant 7 : i32
    %211 = arith.subi %c7_i32_72, %c4_i32 : i32
    %cst_73 = arith.constant dense<0.000000e+00> : vector<4x256xf32>
    %212 = tpu.matmul %202, %8, %cst_73 {dimension_numbers = #tpu.dot_dimension_numbers<[1], [0], [0], [1], [0, 0, 1, 1], [], []>} : vector<4x32xf32>, vector<32x256xf32>, vector<4x256xf32> -> vector<4x256xf32>
    %213 = arith.index_cast %c4_i32 : i32 to index
    %c0_74 = arith.constant 0 : index
    %c0_75 = arith.constant 0 : index
    %214 = vector.load %arg10[%213, %c0_74, %c0_75] : memref<8x2x256xf32, #tpu.memory_space<vmem>>, vector<1x2x256xf32>
    %215 = vector.shape_cast %214 : vector<1x2x256xf32> to vector<2x256xf32>
    %216 = arith.index_cast %211 : i32 to index
    %c0_76 = arith.constant 0 : index
    %c0_77 = arith.constant 0 : index
    %217 = vector.load %arg10[%216, %c0_76, %c0_77] : memref<8x2x256xf32, #tpu.memory_space<vmem>>, vector<1x2x256xf32>
    %218 = vector.shape_cast %217 : vector<1x2x256xf32> to vector<2x256xf32>
    %219 = vector.extract_strided_slice %212 {offsets = [0, 0], sizes = [2, 128], strides = [1, 1]} : vector<4x256xf32> to vector<2x128xf32>
    %220 = vector.extract_strided_slice %215 {offsets = [0, 0], sizes = [2, 128], strides = [1, 1]} : vector<2x256xf32> to vector<2x128xf32>
    %221 = arith.addf %219, %220 : vector<2x128xf32>
    %222 = vector.extract_strided_slice %212 {offsets = [2, 128], sizes = [2, 128], strides = [1, 1]} : vector<4x256xf32> to vector<2x128xf32>
    %223 = vector.extract_strided_slice %218 {offsets = [0, 128], sizes = [2, 128], strides = [1, 1]} : vector<2x256xf32> to vector<2x128xf32>
    %224 = arith.addf %222, %223 : vector<2x128xf32>
    %225 = tpu.concatenate %221, %224 in 0 : vector<2x128xf32>, vector<2x128xf32> -> vector<4x128xf32>
    %226 = vector.extract_strided_slice %225 {offsets = [0, 0], sizes = [4, 32], strides = [1, 1]} : vector<4x128xf32> to vector<4x32xf32>
    %227 = arith.negf %226 : vector<4x32xf32>
    %228 = math.exp %227 : vector<4x32xf32>
    %cst_78 = arith.constant 1.000000e+00 : f32
    %229 = vector.broadcast %cst_78 : f32 to vector<4x32xf32>
    %230 = arith.addf %229, %228 : vector<4x32xf32>
    %231 = arith.divf %229, %230 : vector<4x32xf32>
    %232 = vector.extract_strided_slice %225 {offsets = [0, 32], sizes = [4, 32], strides = [1, 1]} : vector<4x128xf32> to vector<4x32xf32>
    %233 = arith.negf %232 : vector<4x32xf32>
    %234 = math.exp %233 : vector<4x32xf32>
    %cst_79 = arith.constant 1.000000e+00 : f32
    %235 = vector.broadcast %cst_79 : f32 to vector<4x32xf32>
    %236 = arith.addf %235, %234 : vector<4x32xf32>
    %237 = arith.divf %235, %236 : vector<4x32xf32>
    %238 = vector.extract_strided_slice %225 {offsets = [0, 64], sizes = [4, 32], strides = [1, 1]} : vector<4x128xf32> to vector<4x32xf32>
    %239 = math.tanh %238 : vector<4x32xf32>
    %240 = vector.extract_strided_slice %225 {offsets = [0, 96], sizes = [4, 32], strides = [1, 1]} : vector<4x128xf32> to vector<4x32xf32>
    %241 = arith.negf %240 : vector<4x32xf32>
    %242 = math.exp %241 : vector<4x32xf32>
    %cst_80 = arith.constant 1.000000e+00 : f32
    %243 = vector.broadcast %cst_80 : f32 to vector<4x32xf32>
    %244 = arith.addf %243, %242 : vector<4x32xf32>
    %245 = arith.divf %243, %244 : vector<4x32xf32>
    %246 = arith.mulf %237, %200 : vector<4x32xf32>
    %247 = arith.mulf %231, %239 : vector<4x32xf32>
    %248 = arith.addf %246, %247 : vector<4x32xf32>
    %249 = math.tanh %248 : vector<4x32xf32>
    %250 = arith.mulf %245, %249 : vector<4x32xf32>
    %251 = vector.extract_strided_slice %250 {offsets = [0, 0], sizes = [2, 32], strides = [1, 1]} : vector<4x32xf32> to vector<2x32xf32>
    %252 = vector.shape_cast %251 : vector<2x32xf32> to vector<1x2x32xf32>
    %253 = arith.index_cast %c4_i32 : i32 to index
    %c0_81 = arith.constant 0 : index
    %c0_82 = arith.constant 0 : index
    %254 = vector.load %arg7[%253, %c0_81, %c0_82] : memref<8x2x64xf32, #tpu.memory_space<vmem>>, vector<1x2x32xf32>
    tpu.vector_store %arg7[%253, %c0_81, %c0_82], %252 {strides = array<i32>} : memref<8x2x64xf32, #tpu.memory_space<vmem>>, vector<1x2x32xf32>,
    %255 = vector.extract_strided_slice %250 {offsets = [2, 0], sizes = [2, 32], strides = [1, 1]} : vector<4x32xf32> to vector<2x32xf32>
    %256 = vector.shape_cast %255 : vector<2x32xf32> to vector<1x2x32xf32>
    %257 = arith.index_cast %211 : i32 to index
    %c0_83 = arith.constant 0 : index
    %c32_84 = arith.constant 32 : index
    %258 = vector.load %arg7[%257, %c0_83, %c32_84] : memref<8x2x64xf32, #tpu.memory_space<vmem>>, vector<1x2x32xf32>
    tpu.vector_store %arg7[%257, %c0_83, %c32_84], %256 {strides = array<i32>} : memref<8x2x64xf32, #tpu.memory_space<vmem>>, vector<1x2x32xf32>,
    %c5_i32 = arith.constant 5 : i32
    %c7_i32_85 = arith.constant 7 : i32
    %259 = arith.subi %c7_i32_85, %c5_i32 : i32
    %cst_86 = arith.constant dense<0.000000e+00> : vector<4x256xf32>
    %260 = tpu.matmul %250, %8, %cst_86 {dimension_numbers = #tpu.dot_dimension_numbers<[1], [0], [0], [1], [0, 0, 1, 1], [], []>} : vector<4x32xf32>, vector<32x256xf32>, vector<4x256xf32> -> vector<4x256xf32>
    %261 = arith.index_cast %c5_i32 : i32 to index
    %c0_87 = arith.constant 0 : index
    %c0_88 = arith.constant 0 : index
    %262 = vector.load %arg10[%261, %c0_87, %c0_88] : memref<8x2x256xf32, #tpu.memory_space<vmem>>, vector<1x2x256xf32>
    %263 = vector.shape_cast %262 : vector<1x2x256xf32> to vector<2x256xf32>
    %264 = arith.index_cast %259 : i32 to index
    %c0_89 = arith.constant 0 : index
    %c0_90 = arith.constant 0 : index
    %265 = vector.load %arg10[%264, %c0_89, %c0_90] : memref<8x2x256xf32, #tpu.memory_space<vmem>>, vector<1x2x256xf32>
    %266 = vector.shape_cast %265 : vector<1x2x256xf32> to vector<2x256xf32>
    %267 = vector.extract_strided_slice %260 {offsets = [0, 0], sizes = [2, 128], strides = [1, 1]} : vector<4x256xf32> to vector<2x128xf32>
    %268 = vector.extract_strided_slice %263 {offsets = [0, 0], sizes = [2, 128], strides = [1, 1]} : vector<2x256xf32> to vector<2x128xf32>
    %269 = arith.addf %267, %268 : vector<2x128xf32>
    %270 = vector.extract_strided_slice %260 {offsets = [2, 128], sizes = [2, 128], strides = [1, 1]} : vector<4x256xf32> to vector<2x128xf32>
    %271 = vector.extract_strided_slice %266 {offsets = [0, 128], sizes = [2, 128], strides = [1, 1]} : vector<2x256xf32> to vector<2x128xf32>
    %272 = arith.addf %270, %271 : vector<2x128xf32>
    %273 = tpu.concatenate %269, %272 in 0 : vector<2x128xf32>, vector<2x128xf32> -> vector<4x128xf32>
    %274 = vector.extract_strided_slice %273 {offsets = [0, 0], sizes = [4, 32], strides = [1, 1]} : vector<4x128xf32> to vector<4x32xf32>
    %275 = arith.negf %274 : vector<4x32xf32>
    %276 = math.exp %275 : vector<4x32xf32>
    %cst_91 = arith.constant 1.000000e+00 : f32
    %277 = vector.broadcast %cst_91 : f32 to vector<4x32xf32>
    %278 = arith.addf %277, %276 : vector<4x32xf32>
    %279 = arith.divf %277, %278 : vector<4x32xf32>
    %280 = vector.extract_strided_slice %273 {offsets = [0, 32], sizes = [4, 32], strides = [1, 1]} : vector<4x128xf32> to vector<4x32xf32>
    %281 = arith.negf %280 : vector<4x32xf32>
    %282 = math.exp %281 : vector<4x32xf32>
    %cst_92 = arith.constant 1.000000e+00 : f32
    %283 = vector.broadcast %cst_92 : f32 to vector<4x32xf32>
    %284 = arith.addf %283, %282 : vector<4x32xf32>
    %285 = arith.divf %283, %284 : vector<4x32xf32>
    %286 = vector.extract_strided_slice %273 {offsets = [0, 64], sizes = [4, 32], strides = [1, 1]} : vector<4x128xf32> to vector<4x32xf32>
    %287 = math.tanh %286 : vector<4x32xf32>
    %288 = vector.extract_strided_slice %273 {offsets = [0, 96], sizes = [4, 32], strides = [1, 1]} : vector<4x128xf32> to vector<4x32xf32>
    %289 = arith.negf %288 : vector<4x32xf32>
    %290 = math.exp %289 : vector<4x32xf32>
    %cst_93 = arith.constant 1.000000e+00 : f32
    %291 = vector.broadcast %cst_93 : f32 to vector<4x32xf32>
    %292 = arith.addf %291, %290 : vector<4x32xf32>
    %293 = arith.divf %291, %292 : vector<4x32xf32>
    %294 = arith.mulf %285, %248 : vector<4x32xf32>
    %295 = arith.mulf %279, %287 : vector<4x32xf32>
    %296 = arith.addf %294, %295 : vector<4x32xf32>
    %297 = math.tanh %296 : vector<4x32xf32>
    %298 = arith.mulf %293, %297 : vector<4x32xf32>
    %299 = vector.extract_strided_slice %298 {offsets = [0, 0], sizes = [2, 32], strides = [1, 1]} : vector<4x32xf32> to vector<2x32xf32>
    %300 = vector.shape_cast %299 : vector<2x32xf32> to vector<1x2x32xf32>
    %301 = arith.index_cast %c5_i32 : i32 to index
    %c0_94 = arith.constant 0 : index
    %c0_95 = arith.constant 0 : index
    %302 = vector.load %arg7[%301, %c0_94, %c0_95] : memref<8x2x64xf32, #tpu.memory_space<vmem>>, vector<1x2x32xf32>
    tpu.vector_store %arg7[%301, %c0_94, %c0_95], %300 {strides = array<i32>} : memref<8x2x64xf32, #tpu.memory_space<vmem>>, vector<1x2x32xf32>,
    %303 = vector.extract_strided_slice %298 {offsets = [2, 0], sizes = [2, 32], strides = [1, 1]} : vector<4x32xf32> to vector<2x32xf32>
    %304 = vector.shape_cast %303 : vector<2x32xf32> to vector<1x2x32xf32>
    %305 = arith.index_cast %259 : i32 to index
    %c0_96 = arith.constant 0 : index
    %c32_97 = arith.constant 32 : index
    %306 = vector.load %arg7[%305, %c0_96, %c32_97] : memref<8x2x64xf32, #tpu.memory_space<vmem>>, vector<1x2x32xf32>
    tpu.vector_store %arg7[%305, %c0_96, %c32_97], %304 {strides = array<i32>} : memref<8x2x64xf32, #tpu.memory_space<vmem>>, vector<1x2x32xf32>,
    %c6_i32 = arith.constant 6 : i32
    %c7_i32_98 = arith.constant 7 : i32
    %307 = arith.subi %c7_i32_98, %c6_i32 : i32
    %cst_99 = arith.constant dense<0.000000e+00> : vector<4x256xf32>
    %308 = tpu.matmul %298, %8, %cst_99 {dimension_numbers = #tpu.dot_dimension_numbers<[1], [0], [0], [1], [0, 0, 1, 1], [], []>} : vector<4x32xf32>, vector<32x256xf32>, vector<4x256xf32> -> vector<4x256xf32>
    %309 = arith.index_cast %c6_i32 : i32 to index
    %c0_100 = arith.constant 0 : index
    %c0_101 = arith.constant 0 : index
    %310 = vector.load %arg10[%309, %c0_100, %c0_101] : memref<8x2x256xf32, #tpu.memory_space<vmem>>, vector<1x2x256xf32>
    %311 = vector.shape_cast %310 : vector<1x2x256xf32> to vector<2x256xf32>
    %312 = arith.index_cast %307 : i32 to index
    %c0_102 = arith.constant 0 : index
    %c0_103 = arith.constant 0 : index
    %313 = vector.load %arg10[%312, %c0_102, %c0_103] : memref<8x2x256xf32, #tpu.memory_space<vmem>>, vector<1x2x256xf32>
    %314 = vector.shape_cast %313 : vector<1x2x256xf32> to vector<2x256xf32>
    %315 = vector.extract_strided_slice %308 {offsets = [0, 0], sizes = [2, 128], strides = [1, 1]} : vector<4x256xf32> to vector<2x128xf32>
    %316 = vector.extract_strided_slice %311 {offsets = [0, 0], sizes = [2, 128], strides = [1, 1]} : vector<2x256xf32> to vector<2x128xf32>
    %317 = arith.addf %315, %316 : vector<2x128xf32>
    %318 = vector.extract_strided_slice %308 {offsets = [2, 128], sizes = [2, 128], strides = [1, 1]} : vector<4x256xf32> to vector<2x128xf32>
    %319 = vector.extract_strided_slice %314 {offsets = [0, 128], sizes = [2, 128], strides = [1, 1]} : vector<2x256xf32> to vector<2x128xf32>
    %320 = arith.addf %318, %319 : vector<2x128xf32>
    %321 = tpu.concatenate %317, %320 in 0 : vector<2x128xf32>, vector<2x128xf32> -> vector<4x128xf32>
    %322 = vector.extract_strided_slice %321 {offsets = [0, 0], sizes = [4, 32], strides = [1, 1]} : vector<4x128xf32> to vector<4x32xf32>
    %323 = arith.negf %322 : vector<4x32xf32>
    %324 = math.exp %323 : vector<4x32xf32>
    %cst_104 = arith.constant 1.000000e+00 : f32
    %325 = vector.broadcast %cst_104 : f32 to vector<4x32xf32>
    %326 = arith.addf %325, %324 : vector<4x32xf32>
    %327 = arith.divf %325, %326 : vector<4x32xf32>
    %328 = vector.extract_strided_slice %321 {offsets = [0, 32], sizes = [4, 32], strides = [1, 1]} : vector<4x128xf32> to vector<4x32xf32>
    %329 = arith.negf %328 : vector<4x32xf32>
    %330 = math.exp %329 : vector<4x32xf32>
    %cst_105 = arith.constant 1.000000e+00 : f32
    %331 = vector.broadcast %cst_105 : f32 to vector<4x32xf32>
    %332 = arith.addf %331, %330 : vector<4x32xf32>
    %333 = arith.divf %331, %332 : vector<4x32xf32>
    %334 = vector.extract_strided_slice %321 {offsets = [0, 64], sizes = [4, 32], strides = [1, 1]} : vector<4x128xf32> to vector<4x32xf32>
    %335 = math.tanh %334 : vector<4x32xf32>
    %336 = vector.extract_strided_slice %321 {offsets = [0, 96], sizes = [4, 32], strides = [1, 1]} : vector<4x128xf32> to vector<4x32xf32>
    %337 = arith.negf %336 : vector<4x32xf32>
    %338 = math.exp %337 : vector<4x32xf32>
    %cst_106 = arith.constant 1.000000e+00 : f32
    %339 = vector.broadcast %cst_106 : f32 to vector<4x32xf32>
    %340 = arith.addf %339, %338 : vector<4x32xf32>
    %341 = arith.divf %339, %340 : vector<4x32xf32>
    %342 = arith.mulf %333, %296 : vector<4x32xf32>
    %343 = arith.mulf %327, %335 : vector<4x32xf32>
    %344 = arith.addf %342, %343 : vector<4x32xf32>
    %345 = math.tanh %344 : vector<4x32xf32>
    %346 = arith.mulf %341, %345 : vector<4x32xf32>
    %347 = vector.extract_strided_slice %346 {offsets = [0, 0], sizes = [2, 32], strides = [1, 1]} : vector<4x32xf32> to vector<2x32xf32>
    %348 = vector.shape_cast %347 : vector<2x32xf32> to vector<1x2x32xf32>
    %349 = arith.index_cast %c6_i32 : i32 to index
    %c0_107 = arith.constant 0 : index
    %c0_108 = arith.constant 0 : index
    %350 = vector.load %arg7[%349, %c0_107, %c0_108] : memref<8x2x64xf32, #tpu.memory_space<vmem>>, vector<1x2x32xf32>
    tpu.vector_store %arg7[%349, %c0_107, %c0_108], %348 {strides = array<i32>} : memref<8x2x64xf32, #tpu.memory_space<vmem>>, vector<1x2x32xf32>,
    %351 = vector.extract_strided_slice %346 {offsets = [2, 0], sizes = [2, 32], strides = [1, 1]} : vector<4x32xf32> to vector<2x32xf32>
    %352 = vector.shape_cast %351 : vector<2x32xf32> to vector<1x2x32xf32>
    %353 = arith.index_cast %307 : i32 to index
    %c0_109 = arith.constant 0 : index
    %c32_110 = arith.constant 32 : index
    %354 = vector.load %arg7[%353, %c0_109, %c32_110] : memref<8x2x64xf32, #tpu.memory_space<vmem>>, vector<1x2x32xf32>
    tpu.vector_store %arg7[%353, %c0_109, %c32_110], %352 {strides = array<i32>} : memref<8x2x64xf32, #tpu.memory_space<vmem>>, vector<1x2x32xf32>,
    %c7_i32_111 = arith.constant 7 : i32
    %c7_i32_112 = arith.constant 7 : i32
    %355 = arith.subi %c7_i32_112, %c7_i32_111 : i32
    %cst_113 = arith.constant dense<0.000000e+00> : vector<4x256xf32>
    %356 = tpu.matmul %346, %8, %cst_113 {dimension_numbers = #tpu.dot_dimension_numbers<[1], [0], [0], [1], [0, 0, 1, 1], [], []>} : vector<4x32xf32>, vector<32x256xf32>, vector<4x256xf32> -> vector<4x256xf32>
    %357 = arith.index_cast %c7_i32_111 : i32 to index
    %c0_114 = arith.constant 0 : index
    %c0_115 = arith.constant 0 : index
    %358 = vector.load %arg10[%357, %c0_114, %c0_115] : memref<8x2x256xf32, #tpu.memory_space<vmem>>, vector<1x2x256xf32>
    %359 = vector.shape_cast %358 : vector<1x2x256xf32> to vector<2x256xf32>
    %360 = arith.index_cast %355 : i32 to index
    %c0_116 = arith.constant 0 : index
    %c0_117 = arith.constant 0 : index
    %361 = vector.load %arg10[%360, %c0_116, %c0_117] : memref<8x2x256xf32, #tpu.memory_space<vmem>>, vector<1x2x256xf32>
    %362 = vector.shape_cast %361 : vector<1x2x256xf32> to vector<2x256xf32>
    %363 = vector.extract_strided_slice %356 {offsets = [0, 0], sizes = [2, 128], strides = [1, 1]} : vector<4x256xf32> to vector<2x128xf32>
    %364 = vector.extract_strided_slice %359 {offsets = [0, 0], sizes = [2, 128], strides = [1, 1]} : vector<2x256xf32> to vector<2x128xf32>
    %365 = arith.addf %363, %364 : vector<2x128xf32>
    %366 = vector.extract_strided_slice %356 {offsets = [2, 128], sizes = [2, 128], strides = [1, 1]} : vector<4x256xf32> to vector<2x128xf32>
    %367 = vector.extract_strided_slice %362 {offsets = [0, 128], sizes = [2, 128], strides = [1, 1]} : vector<2x256xf32> to vector<2x128xf32>
    %368 = arith.addf %366, %367 : vector<2x128xf32>
    %369 = tpu.concatenate %365, %368 in 0 : vector<2x128xf32>, vector<2x128xf32> -> vector<4x128xf32>
    %370 = vector.extract_strided_slice %369 {offsets = [0, 0], sizes = [4, 32], strides = [1, 1]} : vector<4x128xf32> to vector<4x32xf32>
    %371 = arith.negf %370 : vector<4x32xf32>
    %372 = math.exp %371 : vector<4x32xf32>
    %cst_118 = arith.constant 1.000000e+00 : f32
    %373 = vector.broadcast %cst_118 : f32 to vector<4x32xf32>
    %374 = arith.addf %373, %372 : vector<4x32xf32>
    %375 = arith.divf %373, %374 : vector<4x32xf32>
    %376 = vector.extract_strided_slice %369 {offsets = [0, 32], sizes = [4, 32], strides = [1, 1]} : vector<4x128xf32> to vector<4x32xf32>
    %377 = arith.negf %376 : vector<4x32xf32>
    %378 = math.exp %377 : vector<4x32xf32>
    %cst_119 = arith.constant 1.000000e+00 : f32
    %379 = vector.broadcast %cst_119 : f32 to vector<4x32xf32>
    %380 = arith.addf %379, %378 : vector<4x32xf32>
    %381 = arith.divf %379, %380 : vector<4x32xf32>
    %382 = vector.extract_strided_slice %369 {offsets = [0, 64], sizes = [4, 32], strides = [1, 1]} : vector<4x128xf32> to vector<4x32xf32>
    %383 = math.tanh %382 : vector<4x32xf32>
    %384 = vector.extract_strided_slice %369 {offsets = [0, 96], sizes = [4, 32], strides = [1, 1]} : vector<4x128xf32> to vector<4x32xf32>
    %385 = arith.negf %384 : vector<4x32xf32>
    %386 = math.exp %385 : vector<4x32xf32>
    %cst_120 = arith.constant 1.000000e+00 : f32
    %387 = vector.broadcast %cst_120 : f32 to vector<4x32xf32>
    %388 = arith.addf %387, %386 : vector<4x32xf32>
    %389 = arith.divf %387, %388 : vector<4x32xf32>
    %390 = arith.mulf %381, %344 : vector<4x32xf32>
    %391 = arith.mulf %375, %383 : vector<4x32xf32>
    %392 = arith.addf %390, %391 : vector<4x32xf32>
    %393 = math.tanh %392 : vector<4x32xf32>
    %394 = arith.mulf %389, %393 : vector<4x32xf32>
    %395 = vector.extract_strided_slice %394 {offsets = [0, 0], sizes = [2, 32], strides = [1, 1]} : vector<4x32xf32> to vector<2x32xf32>
    %396 = vector.shape_cast %395 : vector<2x32xf32> to vector<1x2x32xf32>
    %397 = arith.index_cast %c7_i32_111 : i32 to index
    %c0_121 = arith.constant 0 : index
    %c0_122 = arith.constant 0 : index
    %398 = vector.load %arg7[%397, %c0_121, %c0_122] : memref<8x2x64xf32, #tpu.memory_space<vmem>>, vector<1x2x32xf32>
    tpu.vector_store %arg7[%397, %c0_121, %c0_122], %396 {strides = array<i32>} : memref<8x2x64xf32, #tpu.memory_space<vmem>>, vector<1x2x32xf32>,
    %399 = vector.extract_strided_slice %394 {offsets = [2, 0], sizes = [2, 32], strides = [1, 1]} : vector<4x32xf32> to vector<2x32xf32>
    %400 = vector.shape_cast %399 : vector<2x32xf32> to vector<1x2x32xf32>
    %401 = arith.index_cast %355 : i32 to index
    %c0_123 = arith.constant 0 : index
    %c32_124 = arith.constant 32 : index
    %402 = vector.load %arg7[%401, %c0_123, %c32_124] : memref<8x2x64xf32, #tpu.memory_space<vmem>>, vector<1x2x32xf32>
    tpu.vector_store %arg7[%401, %c0_123, %c32_124], %400 {strides = array<i32>} : memref<8x2x64xf32, #tpu.memory_space<vmem>>, vector<1x2x32xf32>,
    %c8_i32 = arith.constant 8 : i32
    %403 = vector.extract_strided_slice %394 {offsets = [0, 0], sizes = [2, 32], strides = [1, 1]} : vector<4x32xf32> to vector<2x32xf32>
    %c0_125 = arith.constant 0 : index
    %c0_126 = arith.constant 0 : index
    %c0_127 = arith.constant 0 : index
    %404 = vector.load %arg8[%c0_125, %c0_126, %c0_127] : memref<2x2x32xf32, #tpu.memory_space<vmem>>, vector<1x2x32xf32>
    %405 = vector.shape_cast %404 : vector<1x2x32xf32> to vector<2x32xf32>
    %406 = vector.shape_cast %403 : vector<2x32xf32> to vector<1x2x32xf32>
    tpu.vector_store %arg8[%c0_125, %c0_126, %c0_127], %406 {strides = array<i32>} : memref<2x2x32xf32, #tpu.memory_space<vmem>>, vector<1x2x32xf32>,
    %407 = vector.extract_strided_slice %394 {offsets = [2, 0], sizes = [2, 32], strides = [1, 1]} : vector<4x32xf32> to vector<2x32xf32>
    %c1_128 = arith.constant 1 : index
    %c0_129 = arith.constant 0 : index
    %c0_130 = arith.constant 0 : index
    %408 = vector.load %arg8[%c1_128, %c0_129, %c0_130] : memref<2x2x32xf32, #tpu.memory_space<vmem>>, vector<1x2x32xf32>
    %409 = vector.shape_cast %408 : vector<1x2x32xf32> to vector<2x32xf32>
    %410 = vector.shape_cast %407 : vector<2x32xf32> to vector<1x2x32xf32>
    tpu.vector_store %arg8[%c1_128, %c0_129, %c0_130], %410 {strides = array<i32>} : memref<2x2x32xf32, #tpu.memory_space<vmem>>, vector<1x2x32xf32>,
    %411 = vector.extract_strided_slice %392 {offsets = [0, 0], sizes = [2, 32], strides = [1, 1]} : vector<4x32xf32> to vector<2x32xf32>
    %c0_131 = arith.constant 0 : index
    %c0_132 = arith.constant 0 : index
    %c0_133 = arith.constant 0 : index
    %412 = vector.load %arg9[%c0_131, %c0_132, %c0_133] : memref<2x2x32xf32, #tpu.memory_space<vmem>>, vector<1x2x32xf32>
    %413 = vector.shape_cast %412 : vector<1x2x32xf32> to vector<2x32xf32>
    %414 = vector.shape_cast %411 : vector<2x32xf32> to vector<1x2x32xf32>
    tpu.vector_store %arg9[%c0_131, %c0_132, %c0_133], %414 {strides = array<i32>} : memref<2x2x32xf32, #tpu.memory_space<vmem>>, vector<1x2x32xf32>,
    %415 = vector.extract_strided_slice %392 {offsets = [2, 0], sizes = [2, 32], strides = [1, 1]} : vector<4x32xf32> to vector<2x32xf32>
    %c1_134 = arith.constant 1 : index
    %c0_135 = arith.constant 0 : index
    %c0_136 = arith.constant 0 : index
    %416 = vector.load %arg9[%c1_134, %c0_135, %c0_136] : memref<2x2x32xf32, #tpu.memory_space<vmem>>, vector<1x2x32xf32>
    %417 = vector.shape_cast %416 : vector<1x2x32xf32> to vector<2x32xf32>
    %418 = vector.shape_cast %415 : vector<2x32xf32> to vector<1x2x32xf32>
    tpu.vector_store %arg9[%c1_134, %c0_135, %c0_136], %418 {strides = array<i32>} : memref<2x2x32xf32, #tpu.memory_space<vmem>>, vector<1x2x32xf32>,
    return
  }
  func.func @transform_0(%arg0: i32) -> (i32, i32, i32) {
    %c0_i32 = arith.constant 0 : i32
    %c0_i32_0 = arith.constant 0 : i32
    %c0_i32_1 = arith.constant 0 : i32
    %c0_i32_2 = arith.constant 0 : i32
    return %c0_i32, %c0_i32_0, %c0_i32_1 : i32, i32, i32
  }
  func.func @transform_1(%arg0: i32) -> (i32, i32) {
    %c0_i32 = arith.constant 0 : i32
    %c0_i32_0 = arith.constant 0 : i32
    %c0_i32_1 = arith.constant 0 : i32
    return %c0_i32, %c0_i32_0 : i32, i32
  }
  func.func @transform_2(%arg0: i32) -> (i32, i32) {
    %c0_i32 = arith.constant 0 : i32
    %c0_i32_0 = arith.constant 0 : i32
    %c0_i32_1 = arith.constant 0 : i32
    return %c0_i32, %c0_i32_0 : i32, i32
  }
  func.func @transform_3(%arg0: i32) -> (i32, i32) {
    %c0_i32 = arith.constant 0 : i32
    %c0_i32_0 = arith.constant 0 : i32
    %c0_i32_1 = arith.constant 0 : i32
    return %c0_i32, %c0_i32_0 : i32, i32
  }
  func.func @transform_4(%arg0: i32) -> (i32, i32, i32) {
    %c0_i32 = arith.constant 0 : i32
    %c0_i32_0 = arith.constant 0 : i32
    %c0_i32_1 = arith.constant 0 : i32
    %c0_i32_2 = arith.constant 0 : i32
    return %c0_i32, %c0_i32_0, %c0_i32_1 : i32, i32, i32
  }
  func.func @transform_5(%arg0: i32) -> (i32, i32, i32) {
    %c0_i32 = arith.constant 0 : i32
    %c0_i32_0 = arith.constant 0 : i32
    %c0_i32_1 = arith.constant 0 : i32
    %c0_i32_2 = arith.constant 0 : i32
    return %c0_i32, %c0_i32_0, %c0_i32_1 : i32, i32, i32
  }
  func.func @transform_6(%arg0: i32) -> (i32, i32, i32) {
    %c0_i32 = arith.constant 0 : i32
    %c0_i32_0 = arith.constant 0 : i32
    %c0_i32_1 = arith.constant 0 : i32
    %c0_i32_2 = arith.constant 0 : i32
    return %c0_i32, %c0_i32_0, %c0_i32_1 : i32, i32, i32
  }
  func.func @transform_7(%arg0: i32) -> (i32, i32, i32) {
    %c0_i32 = arith.constant 0 : i32
    %c0_i32_0 = arith.constant 0 : i32
    %c0_i32_1 = arith.constant 0 : i32
    %c0_i32_2 = arith.constant 0 : i32
    return %c0_i32, %c0_i32_0, %c0_i32_1 : i32, i32, i32
  }
  func.func @transform_8(%arg0: i32) -> (i32, i32, i32) {
    %c0_i32 = arith.constant 0 : i32
    %c0_i32_0 = arith.constant 0 : i32
    %c0_i32_1 = arith.constant 0 : i32
    %c0_i32_2 = arith.constant 0 : i32
    return %c0_i32, %c0_i32_0, %c0_i32_1 : i32, i32, i32
  }
}

module attributes {stable_mosaic.version = 11 : i64} {
  func.func @_bilstm_layer_kernel(%arg0: i32, %arg1: memref<8x2x64xf32, #tpu.memory_space<vmem>>, %arg2: memref<64x256xf32, #tpu.memory_space<vmem>>, %arg3: memref<32x256xf32, #tpu.memory_space<vmem>>, %arg4: memref<1x256xf32, #tpu.memory_space<vmem>>, %arg5: memref<2x2x32xf32, #tpu.memory_space<vmem>>, %arg6: memref<2x2x32xf32, #tpu.memory_space<vmem>>, %arg7: memref<8x2x64xf32, #tpu.memory_space<vmem>>, %arg8: memref<2x2x32xf32, #tpu.memory_space<vmem>>, %arg9: memref<2x2x32xf32, #tpu.memory_space<vmem>>, %arg10: memref<8x2x256xf32, #tpu.memory_space<vmem>>) attributes {dimension_semantics = [#tpu.dimension_semantics<arbitrary>], iteration_bounds = array<i64: 1>, scalar_prefetch = 0 : i64, scratch_operands = 1 : i64, tpu.core_type = #tpu.core_type<tc>, window_params = [{pipeline_mode = #tpu.pipeline_mode<synchronous>, transform_indices = @transform_0, window_bounds = array<i64: 8, 2, 64>}, {pipeline_mode = #tpu.pipeline_mode<synchronous>, transform_indices = @transform_1, window_bounds = array<i64: 64, 256>}, {pipeline_mode = #tpu.pipeline_mode<synchronous>, transform_indices = @transform_2, window_bounds = array<i64: 32, 256>}, {pipeline_mode = #tpu.pipeline_mode<synchronous>, transform_indices = @transform_3, window_bounds = array<i64: 1, 256>}, {pipeline_mode = #tpu.pipeline_mode<synchronous>, transform_indices = @transform_4, window_bounds = array<i64: 2, 2, 32>}, {pipeline_mode = #tpu.pipeline_mode<synchronous>, transform_indices = @transform_5, window_bounds = array<i64: 2, 2, 32>}, {pipeline_mode = #tpu.pipeline_mode<synchronous>, transform_indices = @transform_6, window_bounds = array<i64: 8, 2, 64>}, {pipeline_mode = #tpu.pipeline_mode<synchronous>, transform_indices = @transform_7, window_bounds = array<i64: 2, 2, 32>}, {pipeline_mode = #tpu.pipeline_mode<synchronous>, transform_indices = @transform_8, window_bounds = array<i64: 2, 2, 32>}]} {
    %c0 = arith.constant 0 : index
    %c0_0 = arith.constant 0 : index
    %c0_1 = arith.constant 0 : index
    %0 = vector.load %arg1[%c0, %c0_0, %c0_1] : memref<8x2x64xf32, #tpu.memory_space<vmem>>, vector<8x2x64xf32>
    %c0_2 = arith.constant 0 : index
    %c0_3 = arith.constant 0 : index
    %1 = vector.load %arg2[%c0_2, %c0_3] : memref<64x256xf32, #tpu.memory_space<vmem>>, vector<64x256xf32>
    %cst = arith.constant dense<0.000000e+00> : vector<8x2x256xf32>
    %2 = tpu.matmul %0, %1, %cst {dimension_numbers = #tpu.dot_dimension_numbers<[2], [0], [0, 1], [1], [0, 0, 0, 1, 1, 1], [], []>} : vector<8x2x64xf32>, vector<64x256xf32>, vector<8x2x256xf32> -> vector<8x2x256xf32>
    %c0_4 = arith.constant 0 : index
    %c0_5 = arith.constant 0 : index
    %3 = vector.load %arg4[%c0_4, %c0_5] : memref<1x256xf32, #tpu.memory_space<vmem>>, vector<1x256xf32>
    %4 = vector.shape_cast %3 : vector<1x256xf32> to vector<1x1x256xf32>
    %5 = vector.broadcast %4 : vector<1x1x256xf32> to vector<8x2x256xf32>
    %6 = arith.addf %2, %5 : vector<8x2x256xf32>
    %c0_6 = arith.constant 0 : index
    %c0_7 = arith.constant 0 : index
    %c0_8 = arith.constant 0 : index
    %7 = vector.load %arg10[%c0_6, %c0_7, %c0_8] : memref<8x2x256xf32, #tpu.memory_space<vmem>>, vector<8x2x256xf32>
    tpu.vector_store %arg10[%c0_6, %c0_7, %c0_8], %6 {strides = array<i32>} : memref<8x2x256xf32, #tpu.memory_space<vmem>>, vector<8x2x256xf32>,
    %c0_9 = arith.constant 0 : index
    %c0_10 = arith.constant 0 : index
    %8 = vector.load %arg3[%c0_9, %c0_10] : memref<32x256xf32, #tpu.memory_space<vmem>>, vector<32x256xf32>
    %c0_11 = arith.constant 0 : index
    %c0_12 = arith.constant 0 : index
    %c0_13 = arith.constant 0 : index
    %9 = vector.load %arg5[%c0_11, %c0_12, %c0_13] : memref<2x2x32xf32, #tpu.memory_space<vmem>>, vector<1x2x32xf32>
    %10 = vector.shape_cast %9 : vector<1x2x32xf32> to vector<2x32xf32>
    %c1 = arith.constant 1 : index
    %c0_14 = arith.constant 0 : index
    %c0_15 = arith.constant 0 : index
    %11 = vector.load %arg5[%c1, %c0_14, %c0_15] : memref<2x2x32xf32, #tpu.memory_space<vmem>>, vector<1x2x32xf32>
    %12 = vector.shape_cast %11 : vector<1x2x32xf32> to vector<2x32xf32>
    %13 = tpu.concatenate %10, %12 in 0 : vector<2x32xf32>, vector<2x32xf32> -> vector<4x32xf32>
    %c0_16 = arith.constant 0 : index
    %c0_17 = arith.constant 0 : index
    %c0_18 = arith.constant 0 : index
    %14 = vector.load %arg6[%c0_16, %c0_17, %c0_18] : memref<2x2x32xf32, #tpu.memory_space<vmem>>, vector<1x2x32xf32>
    %15 = vector.shape_cast %14 : vector<1x2x32xf32> to vector<2x32xf32>
    %c1_19 = arith.constant 1 : index
    %c0_20 = arith.constant 0 : index
    %c0_21 = arith.constant 0 : index
    %16 = vector.load %arg6[%c1_19, %c0_20, %c0_21] : memref<2x2x32xf32, #tpu.memory_space<vmem>>, vector<1x2x32xf32>
    %17 = vector.shape_cast %16 : vector<1x2x32xf32> to vector<2x32xf32>
    %18 = tpu.concatenate %15, %17 in 0 : vector<2x32xf32>, vector<2x32xf32> -> vector<4x32xf32>
    %c0_i32 = arith.constant 0 : i32
    %c7_i32 = arith.constant 7 : i32
    %19 = arith.subi %c7_i32, %c0_i32 : i32
    %cst_22 = arith.constant dense<0.000000e+00> : vector<4x256xf32>
    %20 = tpu.matmul %13, %8, %cst_22 {dimension_numbers = #tpu.dot_dimension_numbers<[1], [0], [0], [1], [0, 0, 1, 1], [], []>} : vector<4x32xf32>, vector<32x256xf32>, vector<4x256xf32> -> vector<4x256xf32>
    %21 = arith.index_cast %c0_i32 : i32 to index
    %c0_23 = arith.constant 0 : index
    %c0_24 = arith.constant 0 : index
    %22 = vector.load %arg10[%21, %c0_23, %c0_24] : memref<8x2x256xf32, #tpu.memory_space<vmem>>, vector<1x2x256xf32>
    %23 = vector.shape_cast %22 : vector<1x2x256xf32> to vector<2x256xf32>
    %24 = arith.index_cast %19 : i32 to index
    %c0_25 = arith.constant 0 : index
    %c0_26 = arith.constant 0 : index
    %25 = vector.load %arg10[%24, %c0_25, %c0_26] : memref<8x2x256xf32, #tpu.memory_space<vmem>>, vector<1x2x256xf32>
    %26 = vector.shape_cast %25 : vector<1x2x256xf32> to vector<2x256xf32>
    %27 = vector.extract_strided_slice %20 {offsets = [0, 0], sizes = [2, 128], strides = [1, 1]} : vector<4x256xf32> to vector<2x128xf32>
    %28 = vector.extract_strided_slice %23 {offsets = [0, 0], sizes = [2, 128], strides = [1, 1]} : vector<2x256xf32> to vector<2x128xf32>
    %29 = arith.addf %27, %28 : vector<2x128xf32>
    %30 = vector.extract_strided_slice %20 {offsets = [2, 128], sizes = [2, 128], strides = [1, 1]} : vector<4x256xf32> to vector<2x128xf32>
    %31 = vector.extract_strided_slice %26 {offsets = [0, 128], sizes = [2, 128], strides = [1, 1]} : vector<2x256xf32> to vector<2x128xf32>
    %32 = arith.addf %30, %31 : vector<2x128xf32>
    %33 = tpu.concatenate %29, %32 in 0 : vector<2x128xf32>, vector<2x128xf32> -> vector<4x128xf32>
    %34 = vector.extract_strided_slice %33 {offsets = [0, 0], sizes = [4, 32], strides = [1, 1]} : vector<4x128xf32> to vector<4x32xf32>
    %35 = arith.negf %34 : vector<4x32xf32>
    %36 = math.exp %35 : vector<4x32xf32>
    %cst_27 = arith.constant 1.000000e+00 : f32
    %37 = vector.broadcast %cst_27 : f32 to vector<4x32xf32>
    %38 = arith.addf %37, %36 : vector<4x32xf32>
    %39 = arith.divf %37, %38 : vector<4x32xf32>
    %40 = vector.extract_strided_slice %33 {offsets = [0, 32], sizes = [4, 32], strides = [1, 1]} : vector<4x128xf32> to vector<4x32xf32>
    %41 = arith.negf %40 : vector<4x32xf32>
    %42 = math.exp %41 : vector<4x32xf32>
    %cst_28 = arith.constant 1.000000e+00 : f32
    %43 = vector.broadcast %cst_28 : f32 to vector<4x32xf32>
    %44 = arith.addf %43, %42 : vector<4x32xf32>
    %45 = arith.divf %43, %44 : vector<4x32xf32>
    %46 = vector.extract_strided_slice %33 {offsets = [0, 64], sizes = [4, 32], strides = [1, 1]} : vector<4x128xf32> to vector<4x32xf32>
    %47 = math.tanh %46 : vector<4x32xf32>
    %48 = vector.extract_strided_slice %33 {offsets = [0, 96], sizes = [4, 32], strides = [1, 1]} : vector<4x128xf32> to vector<4x32xf32>
    %49 = arith.negf %48 : vector<4x32xf32>
    %50 = math.exp %49 : vector<4x32xf32>
    %cst_29 = arith.constant 1.000000e+00 : f32
    %51 = vector.broadcast %cst_29 : f32 to vector<4x32xf32>
    %52 = arith.addf %51, %50 : vector<4x32xf32>
    %53 = arith.divf %51, %52 : vector<4x32xf32>
    %54 = arith.mulf %45, %18 : vector<4x32xf32>
    %55 = arith.mulf %39, %47 : vector<4x32xf32>
    %56 = arith.addf %54, %55 : vector<4x32xf32>
    %57 = math.tanh %56 : vector<4x32xf32>
    %58 = arith.mulf %53, %57 : vector<4x32xf32>
    %59 = vector.extract_strided_slice %58 {offsets = [0, 0], sizes = [2, 32], strides = [1, 1]} : vector<4x32xf32> to vector<2x32xf32>
    %60 = vector.shape_cast %59 : vector<2x32xf32> to vector<1x2x32xf32>
    %61 = arith.index_cast %c0_i32 : i32 to index
    %c0_30 = arith.constant 0 : index
    %c0_31 = arith.constant 0 : index
    %62 = vector.load %arg7[%61, %c0_30, %c0_31] : memref<8x2x64xf32, #tpu.memory_space<vmem>>, vector<1x2x32xf32>
    tpu.vector_store %arg7[%61, %c0_30, %c0_31], %60 {strides = array<i32>} : memref<8x2x64xf32, #tpu.memory_space<vmem>>, vector<1x2x32xf32>,
    %63 = vector.extract_strided_slice %58 {offsets = [2, 0], sizes = [2, 32], strides = [1, 1]} : vector<4x32xf32> to vector<2x32xf32>
    %64 = vector.shape_cast %63 : vector<2x32xf32> to vector<1x2x32xf32>
    %65 = arith.index_cast %19 : i32 to index
    %c0_32 = arith.constant 0 : index
    %c32 = arith.constant 32 : index
    %66 = vector.load %arg7[%65, %c0_32, %c32] : memref<8x2x64xf32, #tpu.memory_space<vmem>>, vector<1x2x32xf32>
    tpu.vector_store %arg7[%65, %c0_32, %c32], %64 {strides = array<i32>} : memref<8x2x64xf32, #tpu.memory_space<vmem>>, vector<1x2x32xf32>,
    %c1_i32 = arith.constant 1 : i32
    %c7_i32_33 = arith.constant 7 : i32
    %67 = arith.subi %c7_i32_33, %c1_i32 : i32
    %cst_34 = arith.constant dense<0.000000e+00> : vector<4x256xf32>
    %68 = tpu.matmul %58, %8, %cst_34 {dimension_numbers = #tpu.dot_dimension_numbers<[1], [0], [0], [1], [0, 0, 1, 1], [], []>} : vector<4x32xf32>, vector<32x256xf32>, vector<4x256xf32> -> vector<4x256xf32>
    %69 = arith.index_cast %c1_i32 : i32 to index
    %c0_35 = arith.constant 0 : index
    %c0_36 = arith.constant 0 : index
    %70 = vector.load %arg10[%69, %c0_35, %c0_36] : memref<8x2x256xf32, #tpu.memory_space<vmem>>, vector<1x2x256xf32>
    %71 = vector.shape_cast %70 : vector<1x2x256xf32> to vector<2x256xf32>
    %72 = arith.index_cast %67 : i32 to index
    %c0_37 = arith.constant 0 : index
    %c0_38 = arith.constant 0 : index
    %73 = vector.load %arg10[%72, %c0_37, %c0_38] : memref<8x2x256xf32, #tpu.memory_space<vmem>>, vector<1x2x256xf32>
    %74 = vector.shape_cast %73 : vector<1x2x256xf32> to vector<2x256xf32>
    %75 = vector.extract_strided_slice %68 {offsets = [0, 0], sizes = [2, 128], strides = [1, 1]} : vector<4x256xf32> to vector<2x128xf32>
    %76 = vector.extract_strided_slice %71 {offsets = [0, 0], sizes = [2, 128], strides = [1, 1]} : vector<2x256xf32> to vector<2x128xf32>
    %77 = arith.addf %75, %76 : vector<2x128xf32>
    %78 = vector.extract_strided_slice %68 {offsets = [2, 128], sizes = [2, 128], strides = [1, 1]} : vector<4x256xf32> to vector<2x128xf32>
    %79 = vector.extract_strided_slice %74 {offsets = [0, 128], sizes = [2, 128], strides = [1, 1]} : vector<2x256xf32> to vector<2x128xf32>
    %80 = arith.addf %78, %79 : vector<2x128xf32>
    %81 = tpu.concatenate %77, %80 in 0 : vector<2x128xf32>, vector<2x128xf32> -> vector<4x128xf32>
    %82 = vector.extract_strided_slice %81 {offsets = [0, 0], sizes = [4, 32], strides = [1, 1]} : vector<4x128xf32> to vector<4x32xf32>
    %83 = arith.negf %82 : vector<4x32xf32>
    %84 = math.exp %83 : vector<4x32xf32>
    %cst_39 = arith.constant 1.000000e+00 : f32
    %85 = vector.broadcast %cst_39 : f32 to vector<4x32xf32>
    %86 = arith.addf %85, %84 : vector<4x32xf32>
    %87 = arith.divf %85, %86 : vector<4x32xf32>
    %88 = vector.extract_strided_slice %81 {offsets = [0, 32], sizes = [4, 32], strides = [1, 1]} : vector<4x128xf32> to vector<4x32xf32>
    %89 = arith.negf %88 : vector<4x32xf32>
    %90 = math.exp %89 : vector<4x32xf32>
    %cst_40 = arith.constant 1.000000e+00 : f32
    %91 = vector.broadcast %cst_40 : f32 to vector<4x32xf32>
    %92 = arith.addf %91, %90 : vector<4x32xf32>
    %93 = arith.divf %91, %92 : vector<4x32xf32>
    %94 = vector.extract_strided_slice %81 {offsets = [0, 64], sizes = [4, 32], strides = [1, 1]} : vector<4x128xf32> to vector<4x32xf32>
    %95 = math.tanh %94 : vector<4x32xf32>
    %96 = vector.extract_strided_slice %81 {offsets = [0, 96], sizes = [4, 32], strides = [1, 1]} : vector<4x128xf32> to vector<4x32xf32>
    %97 = arith.negf %96 : vector<4x32xf32>
    %98 = math.exp %97 : vector<4x32xf32>
    %cst_41 = arith.constant 1.000000e+00 : f32
    %99 = vector.broadcast %cst_41 : f32 to vector<4x32xf32>
    %100 = arith.addf %99, %98 : vector<4x32xf32>
    %101 = arith.divf %99, %100 : vector<4x32xf32>
    %102 = arith.mulf %93, %56 : vector<4x32xf32>
    %103 = arith.mulf %87, %95 : vector<4x32xf32>
    %104 = arith.addf %102, %103 : vector<4x32xf32>
    %105 = math.tanh %104 : vector<4x32xf32>
    %106 = arith.mulf %101, %105 : vector<4x32xf32>
    %107 = vector.extract_strided_slice %106 {offsets = [0, 0], sizes = [2, 32], strides = [1, 1]} : vector<4x32xf32> to vector<2x32xf32>
    %108 = vector.shape_cast %107 : vector<2x32xf32> to vector<1x2x32xf32>
    %109 = arith.index_cast %c1_i32 : i32 to index
    %c0_42 = arith.constant 0 : index
    %c0_43 = arith.constant 0 : index
    %110 = vector.load %arg7[%109, %c0_42, %c0_43] : memref<8x2x64xf32, #tpu.memory_space<vmem>>, vector<1x2x32xf32>
    tpu.vector_store %arg7[%109, %c0_42, %c0_43], %108 {strides = array<i32>} : memref<8x2x64xf32, #tpu.memory_space<vmem>>, vector<1x2x32xf32>,
    %111 = vector.extract_strided_slice %106 {offsets = [2, 0], sizes = [2, 32], strides = [1, 1]} : vector<4x32xf32> to vector<2x32xf32>
    %112 = vector.shape_cast %111 : vector<2x32xf32> to vector<1x2x32xf32>
    %113 = arith.index_cast %67 : i32 to index
    %c0_44 = arith.constant 0 : index
    %c32_45 = arith.constant 32 : index
    %114 = vector.load %arg7[%113, %c0_44, %c32_45] : memref<8x2x64xf32, #tpu.memory_space<vmem>>, vector<1x2x32xf32>
    tpu.vector_store %arg7[%113, %c0_44, %c32_45], %112 {strides = array<i32>} : memref<8x2x64xf32, #tpu.memory_space<vmem>>, vector<1x2x32xf32>,
    %c2_i32 = arith.constant 2 : i32
    %c7_i32_46 = arith.constant 7 : i32
    %115 = arith.subi %c7_i32_46, %c2_i32 : i32
    %cst_47 = arith.constant dense<0.000000e+00> : vector<4x256xf32>
    %116 = tpu.matmul %106, %8, %cst_47 {dimension_numbers = #tpu.dot_dimension_numbers<[1], [0], [0], [1], [0, 0, 1, 1], [], []>} : vector<4x32xf32>, vector<32x256xf32>, vector<4x256xf32> -> vector<4x256xf32>
    %117 = arith.index_cast %c2_i32 : i32 to index
    %c0_48 = arith.constant 0 : index
    %c0_49 = arith.constant 0 : index
    %118 = vector.load %arg10[%117, %c0_48, %c0_49] : memref<8x2x256xf32, #tpu.memory_space<vmem>>, vector<1x2x256xf32>
    %119 = vector.shape_cast %118 : vector<1x2x256xf32> to vector<2x256xf32>
    %120 = arith.index_cast %115 : i32 to index
    %c0_50 = arith.constant 0 : index
    %c0_51 = arith.constant 0 : index
    %121 = vector.load %arg10[%120, %c0_50, %c0_51] : memref<8x2x256xf32, #tpu.memory_space<vmem>>, vector<1x2x256xf32>
    %122 = vector.shape_cast %121 : vector<1x2x256xf32> to vector<2x256xf32>
    %123 = vector.extract_strided_slice %116 {offsets = [0, 0], sizes = [2, 128], strides = [1, 1]} : vector<4x256xf32> to vector<2x128xf32>
    %124 = vector.extract_strided_slice %119 {offsets = [0, 0], sizes = [2, 128], strides = [1, 1]} : vector<2x256xf32> to vector<2x128xf32>
    %125 = arith.addf %123, %124 : vector<2x128xf32>
    %126 = vector.extract_strided_slice %116 {offsets = [2, 128], sizes = [2, 128], strides = [1, 1]} : vector<4x256xf32> to vector<2x128xf32>
    %127 = vector.extract_strided_slice %122 {offsets = [0, 128], sizes = [2, 128], strides = [1, 1]} : vector<2x256xf32> to vector<2x128xf32>
    %128 = arith.addf %126, %127 : vector<2x128xf32>
    %129 = tpu.concatenate %125, %128 in 0 : vector<2x128xf32>, vector<2x128xf32> -> vector<4x128xf32>
    %130 = vector.extract_strided_slice %129 {offsets = [0, 0], sizes = [4, 32], strides = [1, 1]} : vector<4x128xf32> to vector<4x32xf32>
    %131 = arith.negf %130 : vector<4x32xf32>
    %132 = math.exp %131 : vector<4x32xf32>
    %cst_52 = arith.constant 1.000000e+00 : f32
    %133 = vector.broadcast %cst_52 : f32 to vector<4x32xf32>
    %134 = arith.addf %133, %132 : vector<4x32xf32>
    %135 = arith.divf %133, %134 : vector<4x32xf32>
    %136 = vector.extract_strided_slice %129 {offsets = [0, 32], sizes = [4, 32], strides = [1, 1]} : vector<4x128xf32> to vector<4x32xf32>
    %137 = arith.negf %136 : vector<4x32xf32>
    %138 = math.exp %137 : vector<4x32xf32>
    %cst_53 = arith.constant 1.000000e+00 : f32
    %139 = vector.broadcast %cst_53 : f32 to vector<4x32xf32>
    %140 = arith.addf %139, %138 : vector<4x32xf32>
    %141 = arith.divf %139, %140 : vector<4x32xf32>
    %142 = vector.extract_strided_slice %129 {offsets = [0, 64], sizes = [4, 32], strides = [1, 1]} : vector<4x128xf32> to vector<4x32xf32>
    %143 = math.tanh %142 : vector<4x32xf32>
    %144 = vector.extract_strided_slice %129 {offsets = [0, 96], sizes = [4, 32], strides = [1, 1]} : vector<4x128xf32> to vector<4x32xf32>
    %145 = arith.negf %144 : vector<4x32xf32>
    %146 = math.exp %145 : vector<4x32xf32>
    %cst_54 = arith.constant 1.000000e+00 : f32
    %147 = vector.broadcast %cst_54 : f32 to vector<4x32xf32>
    %148 = arith.addf %147, %146 : vector<4x32xf32>
    %149 = arith.divf %147, %148 : vector<4x32xf32>
    %150 = arith.mulf %141, %104 : vector<4x32xf32>
    %151 = arith.mulf %135, %143 : vector<4x32xf32>
    %152 = arith.addf %150, %151 : vector<4x32xf32>
    %153 = math.tanh %152 : vector<4x32xf32>
    %154 = arith.mulf %149, %153 : vector<4x32xf32>
    %155 = vector.extract_strided_slice %154 {offsets = [0, 0], sizes = [2, 32], strides = [1, 1]} : vector<4x32xf32> to vector<2x32xf32>
    %156 = vector.shape_cast %155 : vector<2x32xf32> to vector<1x2x32xf32>
    %157 = arith.index_cast %c2_i32 : i32 to index
    %c0_55 = arith.constant 0 : index
    %c0_56 = arith.constant 0 : index
    %158 = vector.load %arg7[%157, %c0_55, %c0_56] : memref<8x2x64xf32, #tpu.memory_space<vmem>>, vector<1x2x32xf32>
    tpu.vector_store %arg7[%157, %c0_55, %c0_56], %156 {strides = array<i32>} : memref<8x2x64xf32, #tpu.memory_space<vmem>>, vector<1x2x32xf32>,
    %159 = vector.extract_strided_slice %154 {offsets = [2, 0], sizes = [2, 32], strides = [1, 1]} : vector<4x32xf32> to vector<2x32xf32>
    %160 = vector.shape_cast %159 : vector<2x32xf32> to vector<1x2x32xf32>
    %161 = arith.index_cast %115 : i32 to index
    %c0_57 = arith.constant 0 : index
    %c32_58 = arith.constant 32 : index
    %162 = vector.load %arg7[%161, %c0_57, %c32_58] : memref<8x2x64xf32, #tpu.memory_space<vmem>>, vector<1x2x32xf32>
    tpu.vector_store %arg7[%161, %c0_57, %c32_58], %160 {strides = array<i32>} : memref<8x2x64xf32, #tpu.memory_space<vmem>>, vector<1x2x32xf32>,
    %c3_i32 = arith.constant 3 : i32
    %c7_i32_59 = arith.constant 7 : i32
    %163 = arith.subi %c7_i32_59, %c3_i32 : i32
    %cst_60 = arith.constant dense<0.000000e+00> : vector<4x256xf32>
    %164 = tpu.matmul %154, %8, %cst_60 {dimension_numbers = #tpu.dot_dimension_numbers<[1], [0], [0], [1], [0, 0, 1, 1], [], []>} : vector<4x32xf32>, vector<32x256xf32>, vector<4x256xf32> -> vector<4x256xf32>
    %165 = arith.index_cast %c3_i32 : i32 to index
    %c0_61 = arith.constant 0 : index
    %c0_62 = arith.constant 0 : index
    %166 = vector.load %arg10[%165, %c0_61, %c0_62] : memref<8x2x256xf32, #tpu.memory_space<vmem>>, vector<1x2x256xf32>
    %167 = vector.shape_cast %166 : vector<1x2x256xf32> to vector<2x256xf32>
    %168 = arith.index_cast %163 : i32 to index
    %c0_63 = arith.constant 0 : index
    %c0_64 = arith.constant 0 : index
    %169 = vector.load %arg10[%168, %c0_63, %c0_64] : memref<8x2x256xf32, #tpu.memory_space<vmem>>, vector<1x2x256xf32>
    %170 = vector.shape_cast %169 : vector<1x2x256xf32> to vector<2x256xf32>
    %171 = vector.extract_strided_slice %164 {offsets = [0, 0], sizes = [2, 128], strides = [1, 1]} : vector<4x256xf32> to vector<2x128xf32>
    %172 = vector.extract_strided_slice %167 {offsets = [0, 0], sizes = [2, 128], strides = [1, 1]} : vector<2x256xf32> to vector<2x128xf32>
    %173 = arith.addf %171, %172 : vector<2x128xf32>
    %174 = vector.extract_strided_slice %164 {offsets = [2, 128], sizes = [2, 128], strides = [1, 1]} : vector<4x256xf32> to vector<2x128xf32>
    %175 = vector.extract_strided_slice %170 {offsets = [0, 128], sizes = [2, 128], strides = [1, 1]} : vector<2x256xf32> to vector<2x128xf32>
    %176 = arith.addf %174, %175 : vector<2x128xf32>
    %177 = tpu.concatenate %173, %176 in 0 : vector<2x128xf32>, vector<2x128xf32> -> vector<4x128xf32>
    %178 = vector.extract_strided_slice %177 {offsets = [0, 0], sizes = [4, 32], strides = [1, 1]} : vector<4x128xf32> to vector<4x32xf32>
    %179 = arith.negf %178 : vector<4x32xf32>
    %180 = math.exp %179 : vector<4x32xf32>
    %cst_65 = arith.constant 1.000000e+00 : f32
    %181 = vector.broadcast %cst_65 : f32 to vector<4x32xf32>
    %182 = arith.addf %181, %180 : vector<4x32xf32>
    %183 = arith.divf %181, %182 : vector<4x32xf32>
    %184 = vector.extract_strided_slice %177 {offsets = [0, 32], sizes = [4, 32], strides = [1, 1]} : vector<4x128xf32> to vector<4x32xf32>
    %185 = arith.negf %184 : vector<4x32xf32>
    %186 = math.exp %185 : vector<4x32xf32>
    %cst_66 = arith.constant 1.000000e+00 : f32
    %187 = vector.broadcast %cst_66 : f32 to vector<4x32xf32>
    %188 = arith.addf %187, %186 : vector<4x32xf32>
    %189 = arith.divf %187, %188 : vector<4x32xf32>
    %190 = vector.extract_strided_slice %177 {offsets = [0, 64], sizes = [4, 32], strides = [1, 1]} : vector<4x128xf32> to vector<4x32xf32>
    %191 = math.tanh %190 : vector<4x32xf32>
    %192 = vector.extract_strided_slice %177 {offsets = [0, 96], sizes = [4, 32], strides = [1, 1]} : vector<4x128xf32> to vector<4x32xf32>
    %193 = arith.negf %192 : vector<4x32xf32>
    %194 = math.exp %193 : vector<4x32xf32>
    %cst_67 = arith.constant 1.000000e+00 : f32
    %195 = vector.broadcast %cst_67 : f32 to vector<4x32xf32>
    %196 = arith.addf %195, %194 : vector<4x32xf32>
    %197 = arith.divf %195, %196 : vector<4x32xf32>
    %198 = arith.mulf %189, %152 : vector<4x32xf32>
    %199 = arith.mulf %183, %191 : vector<4x32xf32>
    %200 = arith.addf %198, %199 : vector<4x32xf32>
    %201 = math.tanh %200 : vector<4x32xf32>
    %202 = arith.mulf %197, %201 : vector<4x32xf32>
    %203 = vector.extract_strided_slice %202 {offsets = [0, 0], sizes = [2, 32], strides = [1, 1]} : vector<4x32xf32> to vector<2x32xf32>
    %204 = vector.shape_cast %203 : vector<2x32xf32> to vector<1x2x32xf32>
    %205 = arith.index_cast %c3_i32 : i32 to index
    %c0_68 = arith.constant 0 : index
    %c0_69 = arith.constant 0 : index
    %206 = vector.load %arg7[%205, %c0_68, %c0_69] : memref<8x2x64xf32, #tpu.memory_space<vmem>>, vector<1x2x32xf32>
    tpu.vector_store %arg7[%205, %c0_68, %c0_69], %204 {strides = array<i32>} : memref<8x2x64xf32, #tpu.memory_space<vmem>>, vector<1x2x32xf32>,
    %207 = vector.extract_strided_slice %202 {offsets = [2, 0], sizes = [2, 32], strides = [1, 1]} : vector<4x32xf32> to vector<2x32xf32>
    %208 = vector.shape_cast %207 : vector<2x32xf32> to vector<1x2x32xf32>
    %209 = arith.index_cast %163 : i32 to index
    %c0_70 = arith.constant 0 : index
    %c32_71 = arith.constant 32 : index
    %210 = vector.load %arg7[%209, %c0_70, %c32_71] : memref<8x2x64xf32, #tpu.memory_space<vmem>>, vector<1x2x32xf32>
    tpu.vector_store %arg7[%209, %c0_70, %c32_71], %208 {strides = array<i32>} : memref<8x2x64xf32, #tpu.memory_space<vmem>>, vector<1x2x32xf32>,
    %c4_i32 = arith.constant 4 : i32
    %c7_i32_72 = arith.constant 7 : i32
    %211 = arith.subi %c7_i32_72, %c4_i32 : i32
    %cst_73 = arith.constant dense<0.000000e+00> : vector<4x256xf32>
    %212 = tpu.matmul %202, %8, %cst_73 {dimension_numbers = #tpu.dot_dimension_numbers<[1], [0], [0], [1], [0, 0, 1, 1], [], []>} : vector<4x32xf32>, vector<32x256xf32>, vector<4x256xf32> -> vector<4x256xf32>
    %213 = arith.index_cast %c4_i32 : i32 to index
    %c0_74 = arith.constant 0 : index
    %c0_75 = arith.constant 0 : index
    %214 = vector.load %arg10[%213, %c0_74, %c0_75] : memref<8x2x256xf32, #tpu.memory_space<vmem>>, vector<1x2x256xf32>
    %215 = vector.shape_cast %214 : vector<1x2x256xf32> to vector<2x256xf32>
    %216 = arith.index_cast %211 : i32 to index
    %c0_76 = arith.constant 0 : index
    %c0_77 = arith.constant 0 : index
    %217 = vector.load %arg10[%216, %c0_76, %c0_77] : memref<8x2x256xf32, #tpu.memory_space<vmem>>, vector<1x2x256xf32>
    %218 = vector.shape_cast %217 : vector<1x2x256xf32> to vector<2x256xf32>
    %219 = vector.extract_strided_slice %212 {offsets = [0, 0], sizes = [2, 128], strides = [1, 1]} : vector<4x256xf32> to vector<2x128xf32>
    %220 = vector.extract_strided_slice %215 {offsets = [0, 0], sizes = [2, 128], strides = [1, 1]} : vector<2x256xf32> to vector<2x128xf32>
    %221 = arith.addf %219, %220 : vector<2x128xf32>
    %222 = vector.extract_strided_slice %212 {offsets = [2, 128], sizes = [2, 128], strides = [1, 1]} : vector<4x256xf32> to vector<2x128xf32>
    %223 = vector.extract_strided_slice %218 {offsets = [0, 128], sizes = [2, 128], strides = [1, 1]} : vector<2x256xf32> to vector<2x128xf32>
    %224 = arith.addf %222, %223 : vector<2x128xf32>
    %225 = tpu.concatenate %221, %224 in 0 : vector<2x128xf32>, vector<2x128xf32> -> vector<4x128xf32>
    %226 = vector.extract_strided_slice %225 {offsets = [0, 0], sizes = [4, 32], strides = [1, 1]} : vector<4x128xf32> to vector<4x32xf32>
    %227 = arith.negf %226 : vector<4x32xf32>
    %228 = math.exp %227 : vector<4x32xf32>
    %cst_78 = arith.constant 1.000000e+00 : f32
    %229 = vector.broadcast %cst_78 : f32 to vector<4x32xf32>
    %230 = arith.addf %229, %228 : vector<4x32xf32>
    %231 = arith.divf %229, %230 : vector<4x32xf32>
    %232 = vector.extract_strided_slice %225 {offsets = [0, 32], sizes = [4, 32], strides = [1, 1]} : vector<4x128xf32> to vector<4x32xf32>
    %233 = arith.negf %232 : vector<4x32xf32>
    %234 = math.exp %233 : vector<4x32xf32>
    %cst_79 = arith.constant 1.000000e+00 : f32
    %235 = vector.broadcast %cst_79 : f32 to vector<4x32xf32>
    %236 = arith.addf %235, %234 : vector<4x32xf32>
    %237 = arith.divf %235, %236 : vector<4x32xf32>
    %238 = vector.extract_strided_slice %225 {offsets = [0, 64], sizes = [4, 32], strides = [1, 1]} : vector<4x128xf32> to vector<4x32xf32>
    %239 = math.tanh %238 : vector<4x32xf32>
    %240 = vector.extract_strided_slice %225 {offsets = [0, 96], sizes = [4, 32], strides = [1, 1]} : vector<4x128xf32> to vector<4x32xf32>
    %241 = arith.negf %240 : vector<4x32xf32>
    %242 = math.exp %241 : vector<4x32xf32>
    %cst_80 = arith.constant 1.000000e+00 : f32
    %243 = vector.broadcast %cst_80 : f32 to vector<4x32xf32>
    %244 = arith.addf %243, %242 : vector<4x32xf32>
    %245 = arith.divf %243, %244 : vector<4x32xf32>
    %246 = arith.mulf %237, %200 : vector<4x32xf32>
    %247 = arith.mulf %231, %239 : vector<4x32xf32>
    %248 = arith.addf %246, %247 : vector<4x32xf32>
    %249 = math.tanh %248 : vector<4x32xf32>
    %250 = arith.mulf %245, %249 : vector<4x32xf32>
    %251 = vector.extract_strided_slice %250 {offsets = [0, 0], sizes = [2, 32], strides = [1, 1]} : vector<4x32xf32> to vector<2x32xf32>
    %252 = vector.shape_cast %251 : vector<2x32xf32> to vector<1x2x32xf32>
    %253 = arith.index_cast %c4_i32 : i32 to index
    %c0_81 = arith.constant 0 : index
    %c0_82 = arith.constant 0 : index
    %254 = vector.load %arg7[%253, %c0_81, %c0_82] : memref<8x2x64xf32, #tpu.memory_space<vmem>>, vector<1x2x32xf32>
    tpu.vector_store %arg7[%253, %c0_81, %c0_82], %252 {strides = array<i32>} : memref<8x2x64xf32, #tpu.memory_space<vmem>>, vector<1x2x32xf32>,
    %255 = vector.extract_strided_slice %250 {offsets = [2, 0], sizes = [2, 32], strides = [1, 1]} : vector<4x32xf32> to vector<2x32xf32>
    %256 = vector.shape_cast %255 : vector<2x32xf32> to vector<1x2x32xf32>
    %257 = arith.index_cast %211 : i32 to index
    %c0_83 = arith.constant 0 : index
    %c32_84 = arith.constant 32 : index
    %258 = vector.load %arg7[%257, %c0_83, %c32_84] : memref<8x2x64xf32, #tpu.memory_space<vmem>>, vector<1x2x32xf32>
    tpu.vector_store %arg7[%257, %c0_83, %c32_84], %256 {strides = array<i32>} : memref<8x2x64xf32, #tpu.memory_space<vmem>>, vector<1x2x32xf32>,
    %c5_i32 = arith.constant 5 : i32
    %c7_i32_85 = arith.constant 7 : i32
    %259 = arith.subi %c7_i32_85, %c5_i32 : i32
    %cst_86 = arith.constant dense<0.000000e+00> : vector<4x256xf32>
    %260 = tpu.matmul %250, %8, %cst_86 {dimension_numbers = #tpu.dot_dimension_numbers<[1], [0], [0], [1], [0, 0, 1, 1], [], []>} : vector<4x32xf32>, vector<32x256xf32>, vector<4x256xf32> -> vector<4x256xf32>
    %261 = arith.index_cast %c5_i32 : i32 to index
    %c0_87 = arith.constant 0 : index
    %c0_88 = arith.constant 0 : index
    %262 = vector.load %arg10[%261, %c0_87, %c0_88] : memref<8x2x256xf32, #tpu.memory_space<vmem>>, vector<1x2x256xf32>
    %263 = vector.shape_cast %262 : vector<1x2x256xf32> to vector<2x256xf32>
    %264 = arith.index_cast %259 : i32 to index
    %c0_89 = arith.constant 0 : index
    %c0_90 = arith.constant 0 : index
    %265 = vector.load %arg10[%264, %c0_89, %c0_90] : memref<8x2x256xf32, #tpu.memory_space<vmem>>, vector<1x2x256xf32>
    %266 = vector.shape_cast %265 : vector<1x2x256xf32> to vector<2x256xf32>
    %267 = vector.extract_strided_slice %260 {offsets = [0, 0], sizes = [2, 128], strides = [1, 1]} : vector<4x256xf32> to vector<2x128xf32>
    %268 = vector.extract_strided_slice %263 {offsets = [0, 0], sizes = [2, 128], strides = [1, 1]} : vector<2x256xf32> to vector<2x128xf32>
    %269 = arith.addf %267, %268 : vector<2x128xf32>
    %270 = vector.extract_strided_slice %260 {offsets = [2, 128], sizes = [2, 128], strides = [1, 1]} : vector<4x256xf32> to vector<2x128xf32>
    %271 = vector.extract_strided_slice %266 {offsets = [0, 128], sizes = [2, 128], strides = [1, 1]} : vector<2x256xf32> to vector<2x128xf32>
    %272 = arith.addf %270, %271 : vector<2x128xf32>
    %273 = tpu.concatenate %269, %272 in 0 : vector<2x128xf32>, vector<2x128xf32> -> vector<4x128xf32>
    %274 = vector.extract_strided_slice %273 {offsets = [0, 0], sizes = [4, 32], strides = [1, 1]} : vector<4x128xf32> to vector<4x32xf32>
    %275 = arith.negf %274 : vector<4x32xf32>
    %276 = math.exp %275 : vector<4x32xf32>
    %cst_91 = arith.constant 1.000000e+00 : f32
    %277 = vector.broadcast %cst_91 : f32 to vector<4x32xf32>
    %278 = arith.addf %277, %276 : vector<4x32xf32>
    %279 = arith.divf %277, %278 : vector<4x32xf32>
    %280 = vector.extract_strided_slice %273 {offsets = [0, 32], sizes = [4, 32], strides = [1, 1]} : vector<4x128xf32> to vector<4x32xf32>
    %281 = arith.negf %280 : vector<4x32xf32>
    %282 = math.exp %281 : vector<4x32xf32>
    %cst_92 = arith.constant 1.000000e+00 : f32
    %283 = vector.broadcast %cst_92 : f32 to vector<4x32xf32>
    %284 = arith.addf %283, %282 : vector<4x32xf32>
    %285 = arith.divf %283, %284 : vector<4x32xf32>
    %286 = vector.extract_strided_slice %273 {offsets = [0, 64], sizes = [4, 32], strides = [1, 1]} : vector<4x128xf32> to vector<4x32xf32>
    %287 = math.tanh %286 : vector<4x32xf32>
    %288 = vector.extract_strided_slice %273 {offsets = [0, 96], sizes = [4, 32], strides = [1, 1]} : vector<4x128xf32> to vector<4x32xf32>
    %289 = arith.negf %288 : vector<4x32xf32>
    %290 = math.exp %289 : vector<4x32xf32>
    %cst_93 = arith.constant 1.000000e+00 : f32
    %291 = vector.broadcast %cst_93 : f32 to vector<4x32xf32>
    %292 = arith.addf %291, %290 : vector<4x32xf32>
    %293 = arith.divf %291, %292 : vector<4x32xf32>
    %294 = arith.mulf %285, %248 : vector<4x32xf32>
    %295 = arith.mulf %279, %287 : vector<4x32xf32>
    %296 = arith.addf %294, %295 : vector<4x32xf32>
    %297 = math.tanh %296 : vector<4x32xf32>
    %298 = arith.mulf %293, %297 : vector<4x32xf32>
    %299 = vector.extract_strided_slice %298 {offsets = [0, 0], sizes = [2, 32], strides = [1, 1]} : vector<4x32xf32> to vector<2x32xf32>
    %300 = vector.shape_cast %299 : vector<2x32xf32> to vector<1x2x32xf32>
    %301 = arith.index_cast %c5_i32 : i32 to index
    %c0_94 = arith.constant 0 : index
    %c0_95 = arith.constant 0 : index
    %302 = vector.load %arg7[%301, %c0_94, %c0_95] : memref<8x2x64xf32, #tpu.memory_space<vmem>>, vector<1x2x32xf32>
    tpu.vector_store %arg7[%301, %c0_94, %c0_95], %300 {strides = array<i32>} : memref<8x2x64xf32, #tpu.memory_space<vmem>>, vector<1x2x32xf32>,
    %303 = vector.extract_strided_slice %298 {offsets = [2, 0], sizes = [2, 32], strides = [1, 1]} : vector<4x32xf32> to vector<2x32xf32>
    %304 = vector.shape_cast %303 : vector<2x32xf32> to vector<1x2x32xf32>
    %305 = arith.index_cast %259 : i32 to index
    %c0_96 = arith.constant 0 : index
    %c32_97 = arith.constant 32 : index
    %306 = vector.load %arg7[%305, %c0_96, %c32_97] : memref<8x2x64xf32, #tpu.memory_space<vmem>>, vector<1x2x32xf32>
    tpu.vector_store %arg7[%305, %c0_96, %c32_97], %304 {strides = array<i32>} : memref<8x2x64xf32, #tpu.memory_space<vmem>>, vector<1x2x32xf32>,
    %c6_i32 = arith.constant 6 : i32
    %c7_i32_98 = arith.constant 7 : i32
    %307 = arith.subi %c7_i32_98, %c6_i32 : i32
    %cst_99 = arith.constant dense<0.000000e+00> : vector<4x256xf32>
    %308 = tpu.matmul %298, %8, %cst_99 {dimension_numbers = #tpu.dot_dimension_numbers<[1], [0], [0], [1], [0, 0, 1, 1], [], []>} : vector<4x32xf32>, vector<32x256xf32>, vector<4x256xf32> -> vector<4x256xf32>
    %309 = arith.index_cast %c6_i32 : i32 to index
    %c0_100 = arith.constant 0 : index
    %c0_101 = arith.constant 0 : index
    %310 = vector.load %arg10[%309, %c0_100, %c0_101] : memref<8x2x256xf32, #tpu.memory_space<vmem>>, vector<1x2x256xf32>
    %311 = vector.shape_cast %310 : vector<1x2x256xf32> to vector<2x256xf32>
    %312 = arith.index_cast %307 : i32 to index
    %c0_102 = arith.constant 0 : index
    %c0_103 = arith.constant 0 : index
    %313 = vector.load %arg10[%312, %c0_102, %c0_103] : memref<8x2x256xf32, #tpu.memory_space<vmem>>, vector<1x2x256xf32>
    %314 = vector.shape_cast %313 : vector<1x2x256xf32> to vector<2x256xf32>
    %315 = vector.extract_strided_slice %308 {offsets = [0, 0], sizes = [2, 128], strides = [1, 1]} : vector<4x256xf32> to vector<2x128xf32>
    %316 = vector.extract_strided_slice %311 {offsets = [0, 0], sizes = [2, 128], strides = [1, 1]} : vector<2x256xf32> to vector<2x128xf32>
    %317 = arith.addf %315, %316 : vector<2x128xf32>
    %318 = vector.extract_strided_slice %308 {offsets = [2, 128], sizes = [2, 128], strides = [1, 1]} : vector<4x256xf32> to vector<2x128xf32>
    %319 = vector.extract_strided_slice %314 {offsets = [0, 128], sizes = [2, 128], strides = [1, 1]} : vector<2x256xf32> to vector<2x128xf32>
    %320 = arith.addf %318, %319 : vector<2x128xf32>
    %321 = tpu.concatenate %317, %320 in 0 : vector<2x128xf32>, vector<2x128xf32> -> vector<4x128xf32>
    %322 = vector.extract_strided_slice %321 {offsets = [0, 0], sizes = [4, 32], strides = [1, 1]} : vector<4x128xf32> to vector<4x32xf32>
    %323 = arith.negf %322 : vector<4x32xf32>
    %324 = math.exp %323 : vector<4x32xf32>
    %cst_104 = arith.constant 1.000000e+00 : f32
    %325 = vector.broadcast %cst_104 : f32 to vector<4x32xf32>
    %326 = arith.addf %325, %324 : vector<4x32xf32>
    %327 = arith.divf %325, %326 : vector<4x32xf32>
    %328 = vector.extract_strided_slice %321 {offsets = [0, 32], sizes = [4, 32], strides = [1, 1]} : vector<4x128xf32> to vector<4x32xf32>
    %329 = arith.negf %328 : vector<4x32xf32>
    %330 = math.exp %329 : vector<4x32xf32>
    %cst_105 = arith.constant 1.000000e+00 : f32
    %331 = vector.broadcast %cst_105 : f32 to vector<4x32xf32>
    %332 = arith.addf %331, %330 : vector<4x32xf32>
    %333 = arith.divf %331, %332 : vector<4x32xf32>
    %334 = vector.extract_strided_slice %321 {offsets = [0, 64], sizes = [4, 32], strides = [1, 1]} : vector<4x128xf32> to vector<4x32xf32>
    %335 = math.tanh %334 : vector<4x32xf32>
    %336 = vector.extract_strided_slice %321 {offsets = [0, 96], sizes = [4, 32], strides = [1, 1]} : vector<4x128xf32> to vector<4x32xf32>
    %337 = arith.negf %336 : vector<4x32xf32>
    %338 = math.exp %337 : vector<4x32xf32>
    %cst_106 = arith.constant 1.000000e+00 : f32
    %339 = vector.broadcast %cst_106 : f32 to vector<4x32xf32>
    %340 = arith.addf %339, %338 : vector<4x32xf32>
    %341 = arith.divf %339, %340 : vector<4x32xf32>
    %342 = arith.mulf %333, %296 : vector<4x32xf32>
    %343 = arith.mulf %327, %335 : vector<4x32xf32>
    %344 = arith.addf %342, %343 : vector<4x32xf32>
    %345 = math.tanh %344 : vector<4x32xf32>
    %346 = arith.mulf %341, %345 : vector<4x32xf32>
    %347 = vector.extract_strided_slice %346 {offsets = [0, 0], sizes = [2, 32], strides = [1, 1]} : vector<4x32xf32> to vector<2x32xf32>
    %348 = vector.shape_cast %347 : vector<2x32xf32> to vector<1x2x32xf32>
    %349 = arith.index_cast %c6_i32 : i32 to index
    %c0_107 = arith.constant 0 : index
    %c0_108 = arith.constant 0 : index
    %350 = vector.load %arg7[%349, %c0_107, %c0_108] : memref<8x2x64xf32, #tpu.memory_space<vmem>>, vector<1x2x32xf32>
    tpu.vector_store %arg7[%349, %c0_107, %c0_108], %348 {strides = array<i32>} : memref<8x2x64xf32, #tpu.memory_space<vmem>>, vector<1x2x32xf32>,
    %351 = vector.extract_strided_slice %346 {offsets = [2, 0], sizes = [2, 32], strides = [1, 1]} : vector<4x32xf32> to vector<2x32xf32>
    %352 = vector.shape_cast %351 : vector<2x32xf32> to vector<1x2x32xf32>
    %353 = arith.index_cast %307 : i32 to index
    %c0_109 = arith.constant 0 : index
    %c32_110 = arith.constant 32 : index
    %354 = vector.load %arg7[%353, %c0_109, %c32_110] : memref<8x2x64xf32, #tpu.memory_space<vmem>>, vector<1x2x32xf32>
    tpu.vector_store %arg7[%353, %c0_109, %c32_110], %352 {strides = array<i32>} : memref<8x2x64xf32, #tpu.memory_space<vmem>>, vector<1x2x32xf32>,
    %c7_i32_111 = arith.constant 7 : i32
    %c7_i32_112 = arith.constant 7 : i32
    %355 = arith.subi %c7_i32_112, %c7_i32_111 : i32
    %cst_113 = arith.constant dense<0.000000e+00> : vector<4x256xf32>
    %356 = tpu.matmul %346, %8, %cst_113 {dimension_numbers = #tpu.dot_dimension_numbers<[1], [0], [0], [1], [0, 0, 1, 1], [], []>} : vector<4x32xf32>, vector<32x256xf32>, vector<4x256xf32> -> vector<4x256xf32>
    %357 = arith.index_cast %c7_i32_111 : i32 to index
    %c0_114 = arith.constant 0 : index
    %c0_115 = arith.constant 0 : index
    %358 = vector.load %arg10[%357, %c0_114, %c0_115] : memref<8x2x256xf32, #tpu.memory_space<vmem>>, vector<1x2x256xf32>
    %359 = vector.shape_cast %358 : vector<1x2x256xf32> to vector<2x256xf32>
    %360 = arith.index_cast %355 : i32 to index
    %c0_116 = arith.constant 0 : index
    %c0_117 = arith.constant 0 : index
    %361 = vector.load %arg10[%360, %c0_116, %c0_117] : memref<8x2x256xf32, #tpu.memory_space<vmem>>, vector<1x2x256xf32>
    %362 = vector.shape_cast %361 : vector<1x2x256xf32> to vector<2x256xf32>
    %363 = vector.extract_strided_slice %356 {offsets = [0, 0], sizes = [2, 128], strides = [1, 1]} : vector<4x256xf32> to vector<2x128xf32>
    %364 = vector.extract_strided_slice %359 {offsets = [0, 0], sizes = [2, 128], strides = [1, 1]} : vector<2x256xf32> to vector<2x128xf32>
    %365 = arith.addf %363, %364 : vector<2x128xf32>
    %366 = vector.extract_strided_slice %356 {offsets = [2, 128], sizes = [2, 128], strides = [1, 1]} : vector<4x256xf32> to vector<2x128xf32>
    %367 = vector.extract_strided_slice %362 {offsets = [0, 128], sizes = [2, 128], strides = [1, 1]} : vector<2x256xf32> to vector<2x128xf32>
    %368 = arith.addf %366, %367 : vector<2x128xf32>
    %369 = tpu.concatenate %365, %368 in 0 : vector<2x128xf32>, vector<2x128xf32> -> vector<4x128xf32>
    %370 = vector.extract_strided_slice %369 {offsets = [0, 0], sizes = [4, 32], strides = [1, 1]} : vector<4x128xf32> to vector<4x32xf32>
    %371 = arith.negf %370 : vector<4x32xf32>
    %372 = math.exp %371 : vector<4x32xf32>
    %cst_118 = arith.constant 1.000000e+00 : f32
    %373 = vector.broadcast %cst_118 : f32 to vector<4x32xf32>
    %374 = arith.addf %373, %372 : vector<4x32xf32>
    %375 = arith.divf %373, %374 : vector<4x32xf32>
    %376 = vector.extract_strided_slice %369 {offsets = [0, 32], sizes = [4, 32], strides = [1, 1]} : vector<4x128xf32> to vector<4x32xf32>
    %377 = arith.negf %376 : vector<4x32xf32>
    %378 = math.exp %377 : vector<4x32xf32>
    %cst_119 = arith.constant 1.000000e+00 : f32
    %379 = vector.broadcast %cst_119 : f32 to vector<4x32xf32>
    %380 = arith.addf %379, %378 : vector<4x32xf32>
    %381 = arith.divf %379, %380 : vector<4x32xf32>
    %382 = vector.extract_strided_slice %369 {offsets = [0, 64], sizes = [4, 32], strides = [1, 1]} : vector<4x128xf32> to vector<4x32xf32>
    %383 = math.tanh %382 : vector<4x32xf32>
    %384 = vector.extract_strided_slice %369 {offsets = [0, 96], sizes = [4, 32], strides = [1, 1]} : vector<4x128xf32> to vector<4x32xf32>
    %385 = arith.negf %384 : vector<4x32xf32>
    %386 = math.exp %385 : vector<4x32xf32>
    %cst_120 = arith.constant 1.000000e+00 : f32
    %387 = vector.broadcast %cst_120 : f32 to vector<4x32xf32>
    %388 = arith.addf %387, %386 : vector<4x32xf32>
    %389 = arith.divf %387, %388 : vector<4x32xf32>
    %390 = arith.mulf %381, %344 : vector<4x32xf32>
    %391 = arith.mulf %375, %383 : vector<4x32xf32>
    %392 = arith.addf %390, %391 : vector<4x32xf32>
    %393 = math.tanh %392 : vector<4x32xf32>
    %394 = arith.mulf %389, %393 : vector<4x32xf32>
    %395 = vector.extract_strided_slice %394 {offsets = [0, 0], sizes = [2, 32], strides = [1, 1]} : vector<4x32xf32> to vector<2x32xf32>
    %396 = vector.shape_cast %395 : vector<2x32xf32> to vector<1x2x32xf32>
    %397 = arith.index_cast %c7_i32_111 : i32 to index
    %c0_121 = arith.constant 0 : index
    %c0_122 = arith.constant 0 : index
    %398 = vector.load %arg7[%397, %c0_121, %c0_122] : memref<8x2x64xf32, #tpu.memory_space<vmem>>, vector<1x2x32xf32>
    tpu.vector_store %arg7[%397, %c0_121, %c0_122], %396 {strides = array<i32>} : memref<8x2x64xf32, #tpu.memory_space<vmem>>, vector<1x2x32xf32>,
    %399 = vector.extract_strided_slice %394 {offsets = [2, 0], sizes = [2, 32], strides = [1, 1]} : vector<4x32xf32> to vector<2x32xf32>
    %400 = vector.shape_cast %399 : vector<2x32xf32> to vector<1x2x32xf32>
    %401 = arith.index_cast %355 : i32 to index
    %c0_123 = arith.constant 0 : index
    %c32_124 = arith.constant 32 : index
    %402 = vector.load %arg7[%401, %c0_123, %c32_124] : memref<8x2x64xf32, #tpu.memory_space<vmem>>, vector<1x2x32xf32>
    tpu.vector_store %arg7[%401, %c0_123, %c32_124], %400 {strides = array<i32>} : memref<8x2x64xf32, #tpu.memory_space<vmem>>, vector<1x2x32xf32>,
    %c8_i32 = arith.constant 8 : i32
    %403 = vector.extract_strided_slice %394 {offsets = [0, 0], sizes = [2, 32], strides = [1, 1]} : vector<4x32xf32> to vector<2x32xf32>
    %c0_125 = arith.constant 0 : index
    %c0_126 = arith.constant 0 : index
    %c0_127 = arith.constant 0 : index
    %404 = vector.load %arg8[%c0_125, %c0_126, %c0_127] : memref<2x2x32xf32, #tpu.memory_space<vmem>>, vector<1x2x32xf32>
    %405 = vector.shape_cast %404 : vector<1x2x32xf32> to vector<2x32xf32>
    %406 = vector.shape_cast %403 : vector<2x32xf32> to vector<1x2x32xf32>
    tpu.vector_store %arg8[%c0_125, %c0_126, %c0_127], %406 {strides = array<i32>} : memref<2x2x32xf32, #tpu.memory_space<vmem>>, vector<1x2x32xf32>,
    %407 = vector.extract_strided_slice %394 {offsets = [2, 0], sizes = [2, 32], strides = [1, 1]} : vector<4x32xf32> to vector<2x32xf32>
    %c1_128 = arith.constant 1 : index
    %c0_129 = arith.constant 0 : index
    %c0_130 = arith.constant 0 : index
    %408 = vector.load %arg8[%c1_128, %c0_129, %c0_130] : memref<2x2x32xf32, #tpu.memory_space<vmem>>, vector<1x2x32xf32>
    %409 = vector.shape_cast %408 : vector<1x2x32xf32> to vector<2x32xf32>
    %410 = vector.shape_cast %407 : vector<2x32xf32> to vector<1x2x32xf32>
    tpu.vector_store %arg8[%c1_128, %c0_129, %c0_130], %410 {strides = array<i32>} : memref<2x2x32xf32, #tpu.memory_space<vmem>>, vector<1x2x32xf32>,
    %411 = vector.extract_strided_slice %392 {offsets = [0, 0], sizes = [2, 32], strides = [1, 1]} : vector<4x32xf32> to vector<2x32xf32>
    %c0_131 = arith.constant 0 : index
    %c0_132 = arith.constant 0 : index
    %c0_133 = arith.constant 0 : index
    %412 = vector.load %arg9[%c0_131, %c0_132, %c0_133] : memref<2x2x32xf32, #tpu.memory_space<vmem>>, vector<1x2x32xf32>
    %413 = vector.shape_cast %412 : vector<1x2x32xf32> to vector<2x32xf32>
    %414 = vector.shape_cast %411 : vector<2x32xf32> to vector<1x2x32xf32>
    tpu.vector_store %arg9[%c0_131, %c0_132, %c0_133], %414 {strides = array<i32>} : memref<2x2x32xf32, #tpu.memory_space<vmem>>, vector<1x2x32xf32>,
    %415 = vector.extract_strided_slice %392 {offsets = [2, 0], sizes = [2, 32], strides = [1, 1]} : vector<4x32xf32> to vector<2x32xf32>
    %c1_134 = arith.constant 1 : index
    %c0_135 = arith.constant 0 : index
    %c0_136 = arith.constant 0 : index
    %416 = vector.load %arg9[%c1_134, %c0_135, %c0_136] : memref<2x2x32xf32, #tpu.memory_space<vmem>>, vector<1x2x32xf32>
    %417 = vector.shape_cast %416 : vector<1x2x32xf32> to vector<2x32xf32>
    %418 = vector.shape_cast %415 : vector<2x32xf32> to vector<1x2x32xf32>
    tpu.vector_store %arg9[%c1_134, %c0_135, %c0_136], %418 {strides = array<i32>} : memref<2x2x32xf32, #tpu.memory_space<vmem>>, vector<1x2x32xf32>,
    return
  }
  func.func @transform_0(%arg0: i32) -> (i32, i32, i32) {
    %c0_i32 = arith.constant 0 : i32
    %c0_i32_0 = arith.constant 0 : i32
    %c0_i32_1 = arith.constant 0 : i32
    %c0_i32_2 = arith.constant 0 : i32
    return %c0_i32, %c0_i32_0, %c0_i32_1 : i32, i32, i32
  }
  func.func @transform_1(%arg0: i32) -> (i32, i32) {
    %c0_i32 = arith.constant 0 : i32
    %c0_i32_0 = arith.constant 0 : i32
    %c0_i32_1 = arith.constant 0 : i32
    return %c0_i32, %c0_i32_0 : i32, i32
  }
  func.func @transform_2(%arg0: i32) -> (i32, i32) {
    %c0_i32 = arith.constant 0 : i32
    %c0_i32_0 = arith.constant 0 : i32
    %c0_i32_1 = arith.constant 0 : i32
    return %c0_i32, %c0_i32_0 : i32, i32
  }
  func.func @transform_3(%arg0: i32) -> (i32, i32) {
    %c0_i32 = arith.constant 0 : i32
    %c0_i32_0 = arith.constant 0 : i32
    %c0_i32_1 = arith.constant 0 : i32
    return %c0_i32, %c0_i32_0 : i32, i32
  }
  func.func @transform_4(%arg0: i32) -> (i32, i32, i32) {
    %c0_i32 = arith.constant 0 : i32
    %c0_i32_0 = arith.constant 0 : i32
    %c0_i32_1 = arith.constant 0 : i32
    %c0_i32_2 = arith.constant 0 : i32
    return %c0_i32, %c0_i32_0, %c0_i32_1 : i32, i32, i32
  }
  func.func @transform_5(%arg0: i32) -> (i32, i32, i32) {
    %c0_i32 = arith.constant 0 : i32
    %c0_i32_0 = arith.constant 0 : i32
    %c0_i32_1 = arith.constant 0 : i32
    %c0_i32_2 = arith.constant 0 : i32
    return %c0_i32, %c0_i32_0, %c0_i32_1 : i32, i32, i32
  }
  func.func @transform_6(%arg0: i32) -> (i32, i32, i32) {
    %c0_i32 = arith.constant 0 : i32
    %c0_i32_0 = arith.constant 0 : i32
    %c0_i32_1 = arith.constant 0 : i32
    %c0_i32_2 = arith.constant 0 : i32
    return %c0_i32, %c0_i32_0, %c0_i32_1 : i32, i32, i32
  }
  func.func @transform_7(%arg0: i32) -> (i32, i32, i32) {
    %c0_i32 = arith.constant 0 : i32
    %c0_i32_0 = arith.constant 0 : i32
    %c0_i32_1 = arith.constant 0 : i32
    %c0_i32_2 = arith.constant 0 : i32
    return %c0_i32, %c0_i32_0, %c0_i32_1 : i32, i32, i32
  }
  func.func @transform_8(%arg0: i32) -> (i32, i32, i32) {
    %c0_i32 = arith.constant 0 : i32
    %c0_i32_0 = arith.constant 0 : i32
    %c0_i32_1 = arith.constant 0 : i32
    %c0_i32_2 = arith.constant 0 : i32
    return %c0_i32, %c0_i32_0, %c0_i32_1 : i32, i32, i32
  }
}

module attributes {stable_mosaic.version = 11 : i64} {
  func.func @_fc_sigmoid_mean_kernel(%arg0: i32, %arg1: memref<8x2x64xf32, #tpu.memory_space<vmem>>, %arg2: memref<1x64xf32, #tpu.memory_space<vmem>>, %arg3: memref<1x1xf32, #tpu.memory_space<smem>>, %arg4: memref<2x1xf32, #tpu.memory_space<vmem>>, %arg5: memref<2x1xf32, #tpu.memory_space<vmem>>) attributes {dimension_semantics = [#tpu.dimension_semantics<arbitrary>], iteration_bounds = array<i64: 1>, scalar_prefetch = 0 : i64, scratch_operands = 1 : i64, tpu.core_type = #tpu.core_type<tc>, window_params = [{transform_indices = @transform_0, window_bounds = array<i64: 8, 2, 64>}, {pipeline_mode = #tpu.pipeline_mode<synchronous>, transform_indices = @transform_1, window_bounds = array<i64: 1, 64>}, {transform_indices = @transform_2, window_bounds = array<i64: 1, 1>}, {pipeline_mode = #tpu.pipeline_mode<synchronous>, transform_indices = @transform_3, window_bounds = array<i64: 2, 1>}]} {
    %c0_i32 = arith.constant 0 : i32
    %0 = arith.cmpi eq, %arg0, %c0_i32 : i32
    %1 = arith.extui %0 : i1 to i32
    %c0_i32_0 = arith.constant 0 : i32
    %2 = arith.cmpi ne, %1, %c0_i32_0 : i32
    scf.if %2 {
      %cst_15 = arith.constant 0.000000e+00 : f32
      %25 = vector.broadcast %cst_15 : f32 to vector<2x1xf32>
      %c0_16 = arith.constant 0 : index
      %c0_17 = arith.constant 0 : index
      %26 = vector.load %arg5[%c0_16, %c0_17] : memref<2x1xf32, #tpu.memory_space<vmem>>, vector<2x1xf32>
      tpu.vector_store %arg5[%c0_16, %c0_17], %25 {strides = array<i32>} : memref<2x1xf32, #tpu.memory_space<vmem>>, vector<2x1xf32>,
    } else {
    }
    %c0 = arith.constant 0 : index
    %c0_1 = arith.constant 0 : index
    %c0_2 = arith.constant 0 : index
    %3 = vector.load %arg1[%c0, %c0_1, %c0_2] : memref<8x2x64xf32, #tpu.memory_space<vmem>>, vector<8x2x64xf32>
    %c0_3 = arith.constant 0 : index
    %c0_4 = arith.constant 0 : index
    %4 = vector.load %arg2[%c0_3, %c0_4] : memref<1x64xf32, #tpu.memory_space<vmem>>, vector<1x64xf32>
    %5 = vector.shape_cast %4 : vector<1x64xf32> to vector<1x1x64xf32>
    %6 = vector.broadcast %5 : vector<1x1x64xf32> to vector<8x2x64xf32>
    %7 = arith.mulf %3, %6 : vector<8x2x64xf32>
    %cst = arith.constant dense<0.000000e+00> : vector<8x2xf32>
    %8 = vector.multi_reduction <add>, %7, %cst [2] : vector<8x2x64xf32> to vector<8x2xf32>
    %9 = vector.shape_cast %8 : vector<8x2xf32> to vector<8x2x1xf32>
    %c0_5 = arith.constant 0 : index
    %c0_6 = arith.constant 0 : index
    %10 = memref.load %arg3[%c0_5, %c0_6] : memref<1x1xf32, #tpu.memory_space<smem>>
    %11 = vector.broadcast %10 : f32 to vector<8x2x1xf32>
    %12 = arith.addf %9, %11 : vector<8x2x1xf32>
    %c0_7 = arith.constant 0 : index
    %c0_8 = arith.constant 0 : index
    %13 = vector.load %arg5[%c0_7, %c0_8] : memref<2x1xf32, #tpu.memory_space<vmem>>, vector<2x1xf32>
    %14 = arith.negf %12 : vector<8x2x1xf32>
    %15 = math.exp %14 : vector<8x2x1xf32>
    %cst_9 = arith.constant 1.000000e+00 : f32
    %16 = vector.broadcast %cst_9 : f32 to vector<8x2x1xf32>
    %17 = arith.addf %16, %15 : vector<8x2x1xf32>
    %18 = arith.divf %16, %17 : vector<8x2x1xf32>
    %cst_10 = arith.constant dense<0.000000e+00> : vector<2x1xf32>
    %19 = vector.multi_reduction <add>, %18, %cst_10 [0] : vector<8x2x1xf32> to vector<2x1xf32>
    %20 = arith.addf %13, %19 : vector<2x1xf32>
    %c0_11 = arith.constant 0 : index
    %c0_12 = arith.constant 0 : index
    %21 = vector.load %arg5[%c0_11, %c0_12] : memref<2x1xf32, #tpu.memory_space<vmem>>, vector<2x1xf32>
    tpu.vector_store %arg5[%c0_11, %c0_12], %20 {strides = array<i32>} : memref<2x1xf32, #tpu.memory_space<vmem>>, vector<2x1xf32>,
    %c0_i32_13 = arith.constant 0 : i32
    %22 = arith.cmpi eq, %arg0, %c0_i32_13 : i32
    %23 = arith.extui %22 : i1 to i32
    %c0_i32_14 = arith.constant 0 : i32
    %24 = arith.cmpi ne, %23, %c0_i32_14 : i32
    scf.if %24 {
      %c0_15 = arith.constant 0 : index
      %c0_16 = arith.constant 0 : index
      %25 = vector.load %arg5[%c0_15, %c0_16] : memref<2x1xf32, #tpu.memory_space<vmem>>, vector<2x1xf32>
      %cst_17 = arith.constant 1.250000e-01 : f32
      %26 = vector.broadcast %cst_17 : f32 to vector<2x1xf32>
      %27 = arith.mulf %25, %26 : vector<2x1xf32>
      %c0_18 = arith.constant 0 : index
      %c0_19 = arith.constant 0 : index
      %28 = vector.load %arg4[%c0_18, %c0_19] : memref<2x1xf32, #tpu.memory_space<vmem>>, vector<2x1xf32>
      tpu.vector_store %arg4[%c0_18, %c0_19], %27 {strides = array<i32>} : memref<2x1xf32, #tpu.memory_space<vmem>>, vector<2x1xf32>,
    } else {
    }
    return
  }
  func.func @transform_0(%arg0: i32) -> (i32, i32, i32) {
    %c0_i32 = arith.constant 0 : i32
    %c0_i32_0 = arith.constant 0 : i32
    %c0_i32_1 = arith.constant 0 : i32
    return %arg0, %c0_i32, %c0_i32_0 : i32, i32, i32
  }
  func.func @transform_1(%arg0: i32) -> (i32, i32) {
    %c0_i32 = arith.constant 0 : i32
    %c0_i32_0 = arith.constant 0 : i32
    %c0_i32_1 = arith.constant 0 : i32
    return %c0_i32, %c0_i32_0 : i32, i32
  }
  func.func @transform_2(%arg0: i32) -> (i32, i32) {
    %c0_i32 = arith.constant 0 : i32
    %c0_i32_0 = arith.constant 0 : i32
    %c0_i32_1 = arith.constant 0 : i32
    return %c0_i32, %c0_i32_0 : i32, i32
  }
  func.func @transform_3(%arg0: i32) -> (i32, i32) {
    %c0_i32 = arith.constant 0 : i32
    %c0_i32_0 = arith.constant 0 : i32
    %c0_i32_1 = arith.constant 0 : i32
    return %c0_i32, %c0_i32_0 : i32, i32
  }
}

</mosaic_0001>

<bundles_post_ra>
// kernel: discriminator_forward.5
= control target key start
LH: loop header
LB: loop body
LE: loop exit
PB: predicated region body
PF: predicated region fallthrough
CT: control target
= control target key end

     0   :  { %vm44_vm0 = vcmask 517120   ;;  %vm19_vm1 = vcmask 1024   ;;  %v199_v25 = vmov 0.0   ;;  %vm128_vm2 = vcmask 1041408   ;;  %s272_s0 = inlined_call_operand.vmem [shape: f32[8,2,64], index: 0, kind: input, shape index: {}]   ;;  %s273_s1 = inlined_call_operand.vmem [shape: f32[1,64], index: 1, kind: input, shape index: {}]   ;;  %s274_s2 = inlined_call_operand.<no memory space> [shape: f32[1,1], index: 2, kind: input, shape index: {}]   ;;  %s275_s3 = inlined_call_operand.vmem [shape: f32[2,1], index: 3, kind: output, shape index: {}]  }
   0x1   :  { %v21_v0 = vld [vmem:[%s272_s0] sm:$0x3]  ;;  %v23_v2 = vld [vmem:[%s272_s0 + $0x4] sm:$0x3]  ;;  %v22_v5 = vld [vmem:[%s272_s0 + $0x2] sm:$0x3]  ;;  %v70_v26 = vstv %s274_s2 }
   0x2   :  { %v157_v1 = vld [vmem:[%s273_s1] ss:$0 sm:$0xff]  ;;  %v24_v6 = vld [vmem:[%s272_s0 + $0x6] sm:$0x3]  ;;  %v25_v9 = vld [vmem:[%s272_s0 + $0x8] sm:$0x3] }
   0x3   :  { %v36_v3 = vmul.f32 %v157_v1, %v21_v0  ;;  %v38_v4 = vmul.f32 %v157_v1, %v23_v2  ;;  %v37_v7 = vmul.f32 %v157_v1, %v22_v5  ;;  %v39_v8 = vmul.f32 %v157_v1, %v24_v6  ;;  %v26_v10 = vld [vmem:[%s272_s0 + $0xa] sm:$0x3]  ;;  %v27_v17 = vld [vmem:[%s272_s0 + $0xc] sm:$0x3]  ;;  %v28_v18 = vld [vmem:[%s272_s0 + $0xe] sm:$0x3] }
   0x4   :  { %v40_v15 = vmul.f32 %v157_v1, %v25_v9  ;;  %v41_v16 = vmul.f32 %v157_v1, %v26_v10  ;;  %v42_v21 = vmul.f32 %v157_v1, %v27_v17  ;;  %v43_v22 = vmul.f32 %v157_v1, %v28_v18  ;;  %20 = vst.msk [vmem:[#allocation2] sm:$0x3] %vm19_vm1, %v199_v25 }
   0x5   :  { %v45_v11 = vsel %vm44_vm0, %v36_v3, 0.0  ;;  %v51_v12 = vsel %vm44_vm0, %v38_v4, 0.0  ;;  %v48_v13 = vsel %vm44_vm0, %v37_v7, 0.0  ;;  %v54_v14 = vsel %vm44_vm0, %v39_v8, 0.0 }
   0x6   :  { %46 = vadd.xlane.f32.xlu0 %v45_v11  ;;  %52 = vadd.xlane.f32.xlu1 %v51_v12  ;;  %v57_v19 = vsel %vm44_vm0, %v40_v15, 0.0  ;;  %v60_v20 = vsel %vm44_vm0, %v41_v16, 0.0  ;;  %v63_v23 = vsel %vm44_vm0, %v42_v21, 0.0  ;;  %v66_v24 = vsel %vm44_vm0, %v43_v22, 0.0 }
   0xa   :  { %49 = vadd.xlane.f32.xlu0 %v48_v13  ;;  %55 = vadd.xlane.f32.xlu1 %v54_v14 }
   0xb   :  { %v79_v25 = vld [vmem:[#allocation2] sm:$0x3] }
   0xe   :  { %58 = vadd.xlane.f32.xlu0 %v57_v19  ;;  %61 = vadd.xlane.f32.xlu1 %v60_v20 }
  0x12   :  { %64 = vadd.xlane.f32.xlu0 %v63_v23  ;;  %67 = vadd.xlane.f32.xlu1 %v66_v24 }
  0x93   :  { %v47_v27 = vpop.xlane.xlu0 %46  ;;  %v53_v28 = vpop.xlane.xlu1 %52 }
  0x94   :  { %v71_v29 = vadd.f32 %v70_v26, %v47_v27  ;;  %v73_v30 = vadd.f32 %v70_v26, %v53_v28 }
  0x96   :  { %v158_v31 = vmul.f32 -1.442695, %v71_v29  ;;  %v160_v32 = vmul.f32 -1.442695, %v73_v30 }
  0x97   :  { %v50_v33 = vpop.xlane.xlu0 %49  ;;  %v56_v34 = vpop.xlane.xlu1 %55 }
  0x98   :  { %167 = vpow2.f32 %v158_v31  ;;  %v72_v35 = vadd.f32 %v70_v26, %v50_v33  ;;  %v74_v36 = vadd.f32 %v70_v26, %v56_v34 }
  0x99   :  { %169 = vpow2.f32 %v160_v32 }
  0x9a   :  { %v159_v37 = vmul.f32 -1.442695, %v72_v35  ;;  %v161_v38 = vmul.f32 -1.442695, %v74_v36 }
  0x9b   :  { %v59_v39 = vpop.xlane.xlu0 %58  ;;  %v62_v40 = vpop.xlane.xlu1 %61 }
  0x9c   :  { %171 = vpow2.f32 %v159_v37  ;;  %v75_v41 = vadd.f32 %v70_v26, %v59_v39  ;;  %v76_v42 = vadd.f32 %v70_v26, %v62_v40 }
  0x9d   :  { %173 = vpow2.f32 %v161_v38 }
  0x9e   :  { %v162_v43 = vmul.f32 -1.442695, %v75_v41  ;;  %v163_v44 = vmul.f32 -1.442695, %v76_v42 }
  0x9f   :  { %v65_v45 = vpop.xlane.xlu0 %64  ;;  %v68_v46 = vpop.xlane.xlu1 %67 }
  0xa0   :  { %175 = vpow2.f32 %v162_v43  ;;  %v77_v47 = vadd.f32 %v70_v26, %v65_v45  ;;  %v78_v48 = vadd.f32 %v70_v26, %v68_v46 }
  0xa1   :  { %177 = vpow2.f32 %v163_v44 }
  0xa2   :  { %v168_v49 = vpop.eup %167  ;;  %v164_v50 = vmul.f32 -1.442695, %v77_v47  ;;  %v165_v53 = vmul.f32 -1.442695, %v78_v48 }
  0xa3   :  { %v170_v51 = vpop.eup %169  ;;  %v104_v52 = vadd.f32 1.0, %v168_v49 }
  0xa4   :  { %v106_v54 = vadd.f32 1.0, %v170_v51  ;;  %179 = vpow2.f32 %v164_v50 }
  0xa5   :  { %181 = vrcp.f32 %v104_v52 }
  0xa6   :  { %v172_v55 = vpop.eup %171  ;;  %183 = vpow2.f32 %v165_v53 }
  0xa7   :  { %v174_v56 = vpop.eup %173  ;;  %v105_v57 = vadd.f32 1.0, %v172_v55  ;;  %185 = vrcp.f32 %v106_v54 }
  0xa8   :  { %v107_v58 = vadd.f32 1.0, %v174_v56 }
  0xa9   :  { %187 = vrcp.f32 %v105_v57 }
  0xaa   :  { %v176_v59 = vpop.eup %175  ;;  %189 = vrcp.f32 %v107_v58 }
  0xab   :  { %v178_v60 = vpop.eup %177  ;;  %v108_v61 = vadd.f32 1.0, %v176_v59 }
  0xac   :  { %v109_v62 = vadd.f32 1.0, %v178_v60 }
  0xad   :  { %191 = vrcp.f32 %v108_v61 }
  0xae   :  { %v180_v63 = vpop.eup %179  ;;  %193 = vrcp.f32 %v109_v62 }
  0xaf   :  { %v110_v0 = vadd.f32 1.0, %v180_v63  ;;  %v182_v1 = vpop.eup %181 }
  0xb0   :  { %v184_v2 = vpop.eup %183  ;;  %v129_v7 = vsel %vm128_vm2, %v182_v1, 0.0 }
  0xb1   :  { %195 = vrcp.f32 %v110_v0  ;;  %v186_v3 = vpop.eup %185  ;;  %v111_v4 = vadd.f32 1.0, %v184_v2 }
  0xb2   :  { %v132_v10 = vsel %vm128_vm2, %v186_v3, 0.0 }
  0xb3   :  { %v188_v5 = vpop.eup %187  ;;  %197 = vrcp.f32 %v111_v4 }
  0xb4   :  { %v190_v6 = vpop.eup %189  ;;  %v130_v8 = vsel %vm128_vm2, %v188_v5, 0.0 }
  0xb5   :  { %v131_v9 = vadd.f32 %v130_v8, %v129_v7  ;;  %v134_v11 = vsel %vm128_vm2, %v190_v6, 0.0 }
  0xb7   :  { %v192_v12 = vpop.eup %191  ;;  %v133_v13 = vadd.f32 %v132_v10, %v131_v9 }
  0xb8   :  { %v194_v14 = vpop.eup %193  ;;  %v136_v15 = vsel %vm128_vm2, %v192_v12, 0.0 }
  0xb9   :  { %v135_v16 = vadd.f32 %v134_v11, %v133_v13  ;;  %v138_v17 = vsel %vm128_vm2, %v194_v14, 0.0 }
  0xbb   :  { %v196_v18 = vpop.eup %195  ;;  %v137_v19 = vadd.f32 %v136_v15, %v135_v16 }
  0xbc   :  { %v140_v20 = vsel %vm128_vm2, %v196_v18, 0.0 }
  0xbd   :  { %v139_v21 = vadd.f32 %v138_v17, %v137_v19  ;;  %v198_v22 = vpop.eup %197 }
  0xbe   :  { %v142_v24 = vsel %vm128_vm2, %v198_v22, 0.0 }
  0xbf   :  { %v141_v23 = vadd.f32 %v140_v20, %v139_v21 }
  0xc1   :  { %v143_v26 = vadd.f32 %v142_v24, %v141_v23 }
  0xc3   :  { %v144_v27 = vadd.f32 %v143_v26, %v79_v25 }
  0xc5   :  { %146 = vst.msk [vmem:[#allocation2] sm:$0x3] %vm19_vm1, %v144_v27 }
  0xcc   :  { %v150_v28 = vld [vmem:[#allocation2] sm:$0x3] }
  0xcd   :  { %v151_v29 = vmul.f32 0.125, %v150_v28 }
  0xcf   :  { %152 = vst.msk [vmem:[%s275_s3] sm:$0x3] %vm19_vm1, %v151_v29 }

// kernel: discriminator_forward.4
= control target key start
LH: loop header
LB: loop body
LE: loop exit
PB: predicated region body
PF: predicated region fallthrough
CT: control target
= control target key end

     0   :  { %v52_v0 = vlaneseq  ;;  %v1501_v4 = vmov 0.0   ;;  %v1502_v5 = vmov 1983009808   ;;  %vm274_vm0 = vcmask 1041408   ;;  %s1503_s30 = smov 64   ;;  %s1906_s1 = inlined_call_operand.vmem [shape: f32[64,256], index: 1, kind: input, shape index: {}]   ;;  %s1907_s0 = inlined_call_operand.vmem [shape: f32[8,2,64], index: 0, kind: input, shape index: {}]   ;;  %s1908_s2 = inlined_call_operand.vmem [shape: f32[32,256], index: 2, kind: input, shape index: {}]   ;;  %s1909_s4 = inlined_call_operand.vmem [shape: f32[2,2,32], index: 4, kind: input, shape index: {}]   ;;  %s1910_s3 = inlined_call_operand.vmem [shape: f32[1,256], index: 3, kind: input, shape index: {}]   ;;  %s1911_s5 = inlined_call_operand.vmem [shape: f32[2,2,32], index: 5, kind: input, shape index: {}]   ;;  %s1912_s6 = inlined_call_operand.vmem [shape: f32[8,2,64], index: 6, kind: output, shape index: {0}]   ;;  %s1913_s7 = inlined_call_operand.vmem [shape: f32[2,2,32], index: 7, kind: output, shape index: {1}]   ;;  %s1914_s8 = inlined_call_operand.vmem [shape: f32[2,2,32], index: 8, kind: output, shape index: {2}]  }
   0x1   :  { %v35_v1 = vld [vmem:[%s1906_s1 + $0x8] sm:$0xff]  ;;  %v37_v2 = vld [vmem:[%s1906_s1 + $0x18] sm:$0xff]  ;;  %v34_v3 = vld [vmem:[%s1906_s1] sm:$0xff]  ;;  %191 = vmatprep.mubr.f32.mxu0 %v1501_v4  ;;  %v62_v6 = vunpack.c.l.s4 %v1502_v5  ;;  %351 = vmatprep.mubr.f32.mxu1 %v1501_v4  ;;  %vm122_vm1 = vcmask 523264   ;;  %vm283_vm2 = vcmask 261120   ;;  %vm407_vm3 = vcmask 254976  }
   0x2   :  { %v1344_v7 = vpack.c.bf16 %v37_v2, %v35_v1  ;;  %v36_v8 = vld [vmem:[%s1906_s1 + $0x10] sm:$0xff]  ;;  %v39_v9 = vld [vmem:[%s1906_s1 + $0x28] sm:$0xff]  ;;  %v41_v10 = vld [vmem:[%s1906_s1 + $0x38] sm:$0xff]  ;;  %v1583_v17 = vshrl.u32 %v52_v0, 7  ;;  %vm413_vm4 = vcmask 519426   ;;  %vm1283_vm5 = vcmask 257026  }
   0x3   :  { %v1346_v11 = vpack.c.bf16 %v36_v8, %v34_v3  ;;  %v1348_v12 = vpack.c.bf16 %v41_v10, %v39_v9  ;;  %v38_v13 = vld [vmem:[%s1906_s1 + $0x20] sm:$0xff]  ;;  %v40_v14 = vld [vmem:[%s1906_s1 + $0x30] sm:$0xff]  ;;  %v43_v15 = vld [vmem:[%s1906_s1 + $0x48] sm:$0xff]  ;;  %v63_v18 = vunpack.c.0.s8 %v62_v6 }
   0x4   :  { %1345 = vmatprep.subr.bf16.mxu0 %v1344_v7  ;;  %v45_v16 = vld [vmem:[%s1906_s1 + $0x58] sm:$0xff]  ;;  %v1350_v19 = vpack.c.bf16 %v40_v14, %v38_v13  ;;  %v42_v20 = vld [vmem:[%s1906_s1 + $0x40] sm:$0xff]  ;;  %v44_v21 = vld [vmem:[%s1906_s1 + $0x50] sm:$0xff]  ;;  %v54_v1 = vsub.s32 0, %v1583_v17  ;;  %v58_v2 = vsub.s32 1, %v1583_v17 }
   0x5   :  { %1347 = vmatpush1.bf16.msra.mxu0 %v1346_v11  ;;  %v47_v22 = vld [vmem:[%s1906_s1 + $0x68] sm:$0xff]  ;;  %v1352_v23 = vpack.c.bf16 %v45_v16, %v43_v15  ;;  %v49_v24 = vld [vmem:[%s1906_s1 + $0x78] sm:$0xff]  ;;  %v26_v25 = vld [vmem:[%s1907_s0] sm:$0x3]  ;;  %v1619_v32 = vsub.s32 %v63_v18, %v1583_v17  ;;  %v1354_v38 = vpack.c.bf16 %v44_v21, %v42_v20 }
   0x6   :  { %1349 = vmatprep.subr.bf16.mxu0 %v1348_v12  ;;  %v27_v26 = vld [vmem:[%s1907_s0 + $0x2] sm:$0x3]  ;;  %v28_v27 = vld [vmem:[%s1907_s0 + $0x4] sm:$0x3]  ;;  %v29_v28 = vld [vmem:[%s1907_s0 + $0x6] sm:$0x3]  ;;  %v1356_v42 = vpack.c.bf16 %v49_v24, %v47_v22 }
   0x7   :  { %v30_v29 = vld [vmem:[%s1907_s0 + $0x8] sm:$0x3]  ;;  %v46_v30 = vld [vmem:[%s1906_s1 + $0x60] sm:$0xff]  ;;  %v48_v31 = vld [vmem:[%s1906_s1 + $0x70] sm:$0xff]  ;;  %v76_v33 = vcombine.low %v26_v25, %v27_v26  ;;  %v77_v34 = vcombine.low %v28_v27, %v29_v28  ;;  %s1504_s1 = smov 32  }
   0x8   :  { %v31_v35 = vld [vmem:[%s1907_s0 + $0xa] sm:$0x3]  ;;  %v32_v36 = vld [vmem:[%s1907_s0 + $0xc] sm:$0x3]  ;;  %v33_v37 = vld [vmem:[%s1907_s0 + $0xe] sm:$0x3]  ;;  %v1358_v56 = vpack.c.bf16 %v48_v31, %v46_v30 }
   0x9   :  { %1351 = vmatpush1.bf16.msra.mxu0 %v1350_v19  ;;  %v261_v39 = vld [vmem:[%s1908_s2 + $0x8] sm:$0xff]  ;;  %v263_v40 = vld [vmem:[%s1908_s2 + $0x18] sm:$0xff]  ;;  %v260_v41 = vld [vmem:[%s1908_s2] sm:$0xff]  ;;  %v84_v51 = vrot.slane %v76_v33, %v1619_v32  ;;  %v91_v52 = vrot.slane %v77_v34, %v1619_v32  ;;  %v93_v53 = vcombine.low %v30_v29, %v31_v35  ;;  %v94_v54 = vcombine.low %v32_v36, %v33_v37 }
   0xa   :  { %1353 = vmatprep.subr.bf16.mxu0 %v1352_v23  ;;  %v1639_v43 = vpack.c.bf16 %v263_v40, %v261_v39  ;;  %v262_v44 = vld [vmem:[%s1908_s2 + $0x10] sm:$0xff]  ;;  %v265_v45 = vld [vmem:[%s1908_s2 + $0x28] sm:$0xff]  ;;  %v267_v46 = vld [vmem:[%s1908_s2 + $0x38] sm:$0xff] }
   0xb   :  { %v1650_v47 = vpack.c.bf16 %v262_v44, %v260_v41  ;;  %v1652_v48 = vpack.c.bf16 %v267_v46, %v265_v45  ;;  %v264_v49 = vld [vmem:[%s1908_s2 + $0x20] sm:$0xff]  ;;  %v266_v50 = vld [vmem:[%s1908_s2 + $0x30] sm:$0xff]  ;;  %v92_v60 = vcombine.low %v84_v51, %v91_v52  ;;  %v101_v61 = vrot.slane %v93_v53, %v1619_v32 }
   0xc   :  { %1361 = vmatprep.subr.bf16.mxu1 %v1639_v43  ;;  %v1310_v55 = vld [vmem:[%s1909_s4 + $0x2] sm:$0x3]  ;;  %v1667_v57 = vpack.c.bf16 %v266_v50, %v264_v49  ;;  %v268_v59 = vld [vmem:[%s1909_s4] sm:$0x3]  ;;  %v108_v62 = vrot.slane %v94_v54, %v1619_v32 }
   0xd   :  { %1355 = vmatpush1.bf16.msra.mxu0 %v1354_v38  ;;  %1363 = vmatpush1.bf16.msra.mxu1 %v1650_v47  ;;  %v272_v58 = vrot.slane %v1310_v55, 6  ;;  %v50_v3 = vld [vmem:[%s1910_s3] sm:$0x3]  ;;  %v1311_v44 = vld [vmem:[%s1911_s5 + $0x2] sm:$0x3]  ;;  %s1505_s3 = smov 96  }
   0xe   :  { %1357 = vmatprep.subr.bf16.mxu0 %v1356_v42  ;;  %1365 = vmatprep.subr.bf16.mxu1 %v1652_v48  ;;  %v109_v0 = vcombine.low %v101_v61, %v108_v62  ;;  %v55_v5 = vrot.slane %v50_v3, %v54_v1  ;;  %v59_v6 = vrot.slane %v50_v3, %v58_v2  ;;  %v280_v45 = vrot.slane %v1311_v44, 6  ;;  %v276_v46 = vld [vmem:[%s1911_s5] sm:$0x3] }
   0xf   :  { %v275_v63 = vsel %vm274_vm0, %v268_v59, %v272_v58 }
  0x10   :  { %v60_v7 = vcombine.low %v55_v5, %v59_v6  ;;  %v282_v50 = vsel %vm274_vm0, %v276_v46, %v280_v45 }
  0x11   :  { %1359 = vmatpush1.bf16.msra.mxu0 %v1358_v56  ;;  %1367 = vmatpush1.bf16.msra.mxu1 %v1667_v57 }
  0x12   :  { %1369 = vmatprep.subr.bf16.mxu1 %v1639_v43  ;;  %1377 = vmatprep.subr.bf16.mxu0 %v1639_v43  ;;  %v67_v8 = vrot.slane %v60_v7, %v1619_v32 }
  0x14   :  { %1304 = vmatmul.mubr.msk.f32.vlgmr.msra.gmra.mrb[0].mxu0 %vm122_vm1, %v92_v60  ;;  %1312 = vmatmul.mubr.msk.f32.vlgmr.msra.gmra.mrb[0].mxu1 %vm283_vm2, %v275_v63  ;;  %v110_v9 = vcombine.low %v67_v8, %v67_v8 }
  0x15   :  { %197 = vmatprep.mubr.f32.mxu0 %v1501_v4  ;;  %1371 = vmatpush1.bf16.msra.mxu1 %v1650_v47 }
  0x16   :  { %1373 = vmatprep.subr.bf16.mxu1 %v1652_v48  ;;  %481 = vmatprep.mubr.f32.mxu1 %v1501_v4  ;;  %v117_v10 = vrot.slane %v110_v9, %v1619_v32 }
  0x17   :  { %1379 = vmatpush1.bf16.msra.mxu0 %v1650_v47 }
  0x18   :  { %1305 = vmatmul.mubr.msk.f32.gmra.mrb[2].mxu0 %vm122_vm1, %v109_v0  ;;  %1381 = vmatprep.subr.bf16.mxu0 %v1652_v48  ;;  %v118_v11 = vcombine.low %v117_v10, %v117_v10  ;;  %v119_v12 = vcombine.high %v117_v10, %v117_v10 }
  0x19   :  { %1375 = vmatpush1.bf16.msra.mxu1 %v1667_v57  ;;  %607 = vmatprep.mubr.f32.mxu0 %v1501_v4 }
  0x1a   :  { %1385 = vmatprep.subr.bf16.mxu1 %v1639_v43 }
  0x1b   :  { %1383 = vmatpush1.bf16.msra.mxu0 %v1667_v57 }
  0x1c   :  { %1393 = vmatprep.subr.bf16.mxu0 %v1639_v43 }
  0xe7   :  { %v193_v13 = vpop.f32.mrb[0].mxu0  ;;  %v353_v14 = vpop.f32.mrb[0].mxu1 }
  0xe8   :  { %v194_v15 = vadd.f32 %v193_v13, %v118_v11  ;;  %v195_v16 = vpop.f32.mrb[1].mxu0  ;;  %v355_v18 = vpop.f32.mrb[1].mxu1 }
  0xe9   :  { %v196_v17 = vadd.f32 %v195_v16, %v119_v12 }
  0xeb   :  { %v208_v19 = vcombine.low %v194_v15, %v196_v17  ;;  %v209_v20 = vcombine.high %v194_v15, %v196_v17  ;;  %v199_v21 = vpop.f32.mrb[2].mxu0 }
  0xec   :  { %v200_v22 = vadd.f32 %v199_v21, %v118_v11  ;;  %v201_v23 = vpop.f32.mrb[3].mxu0 }
  0xed   :  { %v216_v24 = vrot.slane %v208_v19, %v1619_v32  ;;  %v223_v25 = vrot.slane %v209_v20, %v1619_v32  ;;  %1306 = vst.sshfl [vmem:[#allocation2] sm:$0x33 pattern:$0x76325410] %v208_v19  ;;  %v202_v26 = vadd.f32 %v201_v23, %v119_v12 }
  0xee   :  { %1307 = vst.sshfl [vmem:[#allocation2 + $0x8] sm:$0x33 pattern:$0x76325410] %v209_v20 }
  0xef   :  { %v224_v27 = vcombine.high %v216_v24, %v216_v24  ;;  %v225_v28 = vcombine.high %v223_v25, %v223_v25  ;;  %v226_v29 = vcombine.low %v200_v22, %v202_v26  ;;  %v227_v30 = vcombine.high %v200_v22, %v202_v26 }
  0xf1   :  { %253 = vst [vmem:[#allocation2 + $0x4] sm:$0xf] %v224_v27  ;;  %255 = vst [vmem:[#allocation2 + $0xc] sm:$0xf] %v225_v28  ;;  %v234_v31 = vrot.slane %v226_v29, %v1619_v32  ;;  %v241_v33 = vrot.slane %v227_v30, %v1619_v32 }
  0xf2   :  { %1308 = vst.sshfl [vmem:[#allocation2 + $0x10] sm:$0x33 pattern:$0x76325410] %v226_v29 }
  0xf3   :  { %1309 = vst.sshfl [vmem:[#allocation2 + $0x18] sm:$0x33 pattern:$0x76325410] %v227_v30  ;;  %v242_v34 = vcombine.high %v234_v31, %v234_v31  ;;  %v243_v35 = vcombine.high %v241_v33, %v241_v33 }
  0xf4   :  { %v358_v38 = vld [vmem:[#allocation2] sm:$0xf] }
  0xf5   :  { %257 = vst [vmem:[#allocation2 + $0x14] sm:$0xf] %v242_v34  ;;  %259 = vst [vmem:[#allocation2 + $0x1c] sm:$0xf] %v243_v35  ;;  %v361_v40 = vadd.f32 %v358_v38, %v353_v14  ;;  %v615_v29 = vld [vmem:[#allocation2 + $0x8] sm:$0xf] }
  0xf8   :  { %v489_v6 = vld [vmem:[#allocation2 + $0x4] sm:$0xf] }
  0xfa   :  { %v1430_v2 = vld [vmem:[#allocation2 + $0x18] ss:$0 sps:$4 sm:$0xff]  }
  0xfb   :  { %v501_v3 = vrot.slane %v1430_v2, %v1619_v32 }
  0xfc   :  { %v1429_v36 = vld [vmem:[#allocation2 + $0x1c] ss:$0 sps:$4 sm:$0xff]   ;;  %v1431_v26 = vld [vmem:[#allocation2 + $0x14] ss:$0 sps:$4 sm:$0xff]  }
  0xfd   :  { %v370_v37 = vrot.slane %v1429_v36, %v1619_v32  ;;  %v502_v7 = vcombine.high %v501_v3, %v501_v3  ;;  %v627_v27 = vrot.slane %v1431_v26, %v1619_v32 }
  0xff   :  { %v371_v39 = vcombine.high %v370_v37, %v370_v37  ;;  %v628_v30 = vcombine.high %v627_v27, %v627_v27 }
 0x101   :  { %v373_v41 = vadd.f32 %v371_v39, %v355_v18 }
 0x103   :  { %v374_v42 = vsel %vm274_vm0, %v361_v40, %v373_v41 }
 0x104   :  { %1437 = vtanh.f32 %v374_v42  ;;  %v1313_v51 = vmul.f32 -1.442695, %v374_v42 }
 0x106   :  { %1439 = vpow2.f32 %v1313_v51 }
 0x10e   :  { %v1438_v49 = vpop.eup %1437 }
 0x10f   :  { %388 = vrot.lane.b32.xlu0 %v1438_v49, %s1503_s30 }
 0x110   :  { %v1440_v52 = vpop.eup %1439 }
 0x111   :  { %v378_v53 = vadd.f32 1.0, %v1440_v52 }
 0x113   :  { %383 = vrot.lane.b32.xlu0 %v282_v50, %s1504_s1  ;;  %1441 = vrcp.f32 %v378_v53  ;;  %v1432_v53 = vld [vmem:[#allocation2 + $0x10] ss:$0 sps:$4 sm:$0xff]  }
 0x11d   :  { %v1442_v54 = vpop.eup %1441 }
 0x181   :  { %v389_v55 = vpop.permute.xlu0 %388 }
 0x182   :  { %v391_v56 = vmul.f32 %v1442_v54, %v389_v55 }
 0x184   :  { %393 = vrot.lane.b32.xlu1 %v391_v56, %s1504_s1  ;;  %v741_v56 = vld [vmem:[#allocation2 + $0xc] sm:$0xf] }
 0x185   :  { %v384_v58 = vpop.permute.xlu0 %383 }
 0x186   :  { %v386_v59 = vmul.f32 %v1442_v54, %v384_v58 }
 0x1f6   :  { %v394_v60 = vpop.permute.xlu1 %393 }
 0x1f7   :  { %v396_v61 = vadd.f32 %v394_v60, %v386_v59 }
 0x1f9   :  { %1443 = vtanh.f32 %v396_v61 }
 0x203   :  { %v1444_v62 = vpop.eup %1443 }
 0x204   :  { %399 = vrot.lane.b32.xlu1 %v1444_v62, %s1503_s30 }
 0x276   :  { %v400_v63 = vpop.permute.xlu1 %399 }
 0x277   :  { %v1715_v0 = vmul.f32 %v1442_v54, %v400_v63  ;;  %v753_v54 = vrot.slane %v1432_v53, %v1619_v32 }
 0x279   :  { %404 = vrot.lane.b32.xlu0 %v1715_v0, %s1504_s1  ;;  %v754_v58 = vcombine.high %v753_v54, %v753_v54 }
 0x2eb   :  { %v405_v1 = vpop.permute.xlu0 %404 }
 0x2ec   :  { %408 = vst.msk [vmem:[%s1912_s6] sm:$0x3] %vm407_vm3, %v405_v1  ;;  %1315 = vmatmul.mubr.msk.f32.vlgmr.msra.gmra.mrb[2].mxu1 %vm283_vm2, %v405_v1 }
 0x2ed   :  { %1387 = vmatpush1.bf16.msra.mxu1 %v1650_v47  ;;  %733 = vmatprep.mubr.f32.mxu1 %v1501_v4 }
 0x2ee   :  { %1389 = vmatprep.subr.bf16.mxu1 %v1652_v48 }
 0x2f1   :  { %1391 = vmatpush1.bf16.msra.mxu1 %v1667_v57 }
 0x2f2   :  { %1401 = vmatprep.subr.bf16.mxu1 %v1639_v43 }
 0x3bf   :  { %v483_v5 = vpop.f32.mrb[2].mxu1 }
 0x3c0   :  { %v492_v8 = vadd.f32 %v489_v6, %v483_v5  ;;  %v485_v9 = vpop.f32.mrb[3].mxu1 }
 0x3c1   :  { %v504_v10 = vadd.f32 %v502_v7, %v485_v9 }
 0x3c3   :  { %v505_v11 = vsel %vm274_vm0, %v492_v8, %v504_v10 }
 0x3c4   :  { %1445 = vtanh.f32 %v505_v11  ;;  %v1316_v13 = vmul.f32 -1.442695, %v505_v11 }
 0x3c6   :  { %1447 = vpow2.f32 %v1316_v13 }
 0x3ce   :  { %v1446_v12 = vpop.eup %1445 }
 0x3cf   :  { %515 = vrot.lane.b32.xlu1 %v1446_v12, %s1503_s30 }
 0x3d0   :  { %v1448_v14 = vpop.eup %1447 }
 0x3d1   :  { %v509_v15 = vadd.f32 1.0, %v1448_v14  ;;  %v1433_v14 = vld [vmem:[#allocation2 + $0xc] ss:$0 sps:$4 sm:$0xff]  }
 0x3d3   :  { %1449 = vrcp.f32 %v509_v15  ;;  %v877_v15 = vrot.slane %v1433_v14, %v1619_v32 }
 0x3dd   :  { %v1450_v16 = vpop.eup %1449 }
 0x3de   :  { %v513_v19 = vmul.f32 %v1450_v16, %v396_v61 }
 0x441   :  { %v516_v18 = vpop.permute.xlu1 %515 }
 0x442   :  { %v518_v17 = vmul.f32 %v1450_v16, %v516_v18  ;;  %v866_v18 = vld [vmem:[#allocation2 + $0x10] sm:$0xf] }
 0x444   :  { %520 = vrot.lane.b32.xlu0 %v518_v17, %s1504_s1  ;;  %v878_v17 = vcombine.high %v877_v15, %v877_v15 }
 0x4b6   :  { %v521_v20 = vpop.permute.xlu0 %520 }
 0x4b7   :  { %v523_v21 = vadd.f32 %v521_v20, %v513_v19 }
 0x4b9   :  { %1451 = vtanh.f32 %v523_v21 }
 0x4c3   :  { %v1452_v22 = vpop.eup %1451 }
 0x4c4   :  { %526 = vrot.lane.b32.xlu1 %v1452_v22, %s1503_s30 }
 0x536   :  { %v527_v23 = vpop.permute.xlu1 %526 }
 0x537   :  { %v1734_v24 = vmul.f32 %v1450_v16, %v527_v23 }
 0x539   :  { %531 = vrot.lane.b32.xlu0 %v1734_v24, %s1504_s1 }
 0x5ab   :  { %v532_v25 = vpop.permute.xlu0 %531 }
 0x5ac   :  { %1317 = vst.msk [vmem:[%s1912_s6 + $0x2] sm:$0x3] %vm407_vm3, %v532_v25  ;;  %1319 = vmatmul.mubr.msk.f32.vlgmr.msra.gmra.mrb[4].mxu0 %vm283_vm2, %v532_v25 }
 0x5ad   :  { %1395 = vmatpush1.bf16.msra.mxu0 %v1650_v47  ;;  %859 = vmatprep.mubr.f32.mxu0 %v1501_v4 }
 0x5ae   :  { %1397 = vmatprep.subr.bf16.mxu0 %v1652_v48 }
 0x5b1   :  { %1399 = vmatpush1.bf16.msra.mxu0 %v1667_v57 }
 0x5b2   :  { %1409 = vmatprep.subr.bf16.mxu0 %v1639_v43 }
 0x67f   :  { %v609_v28 = vpop.f32.mrb[4].mxu0 }
 0x680   :  { %v618_v31 = vadd.f32 %v615_v29, %v609_v28  ;;  %v611_v33 = vpop.f32.mrb[5].mxu0 }
 0x681   :  { %v630_v34 = vadd.f32 %v628_v30, %v611_v33 }
 0x683   :  { %v631_v35 = vsel %vm274_vm0, %v618_v31, %v630_v34 }
 0x684   :  { %1453 = vtanh.f32 %v631_v35  ;;  %v1320_v37 = vmul.f32 -1.442695, %v631_v35 }
 0x686   :  { %1455 = vpow2.f32 %v1320_v37 }
 0x68e   :  { %v1454_v36 = vpop.eup %1453 }
 0x68f   :  { %641 = vrot.lane.b32.xlu1 %v1454_v36, %s1503_s30 }
 0x690   :  { %v1456_v38 = vpop.eup %1455 }
 0x691   :  { %v635_v39 = vadd.f32 1.0, %v1456_v38 }
 0x693   :  { %1457 = vrcp.f32 %v635_v39  ;;  %v1434_v39 = vld [vmem:[#allocation2 + $0x8] ss:$0 sps:$4 sm:$0xff]  }
 0x69d   :  { %v1458_v40 = vpop.eup %1457 }
 0x69e   :  { %v639_v44 = vmul.f32 %v1458_v40, %v523_v21 }
 0x701   :  { %v642_v41 = vpop.permute.xlu1 %641 }
 0x702   :  { %v644_v42 = vmul.f32 %v1458_v40, %v642_v41 }
 0x704   :  { %646 = vrot.lane.b32.xlu0 %v644_v42, %s1504_s1  ;;  %v988_v42 = vld [vmem:[#allocation2 + $0x14] sm:$0xf] }
 0x776   :  { %v647_v45 = vpop.permute.xlu0 %646 }
 0x777   :  { %v649_v46 = vadd.f32 %v647_v45, %v639_v44 }
 0x779   :  { %1459 = vtanh.f32 %v649_v46 }
 0x783   :  { %v1460_v49 = vpop.eup %1459 }
 0x784   :  { %652 = vrot.lane.b32.xlu1 %v1460_v49, %s1503_s30 }
 0x7f6   :  { %v653_v50 = vpop.permute.xlu1 %652 }
 0x7f7   :  { %v1753_v51 = vmul.f32 %v1458_v40, %v653_v50  ;;  %v999_v40 = vrot.slane %v1434_v39, %v1619_v32 }
 0x7f9   :  { %657 = vrot.lane.b32.xlu0 %v1753_v51, %s1504_s1  ;;  %v1000_v44 = vcombine.high %v999_v40, %v999_v40 }
 0x86b   :  { %v658_v52 = vpop.permute.xlu0 %657 }
 0x86c   :  { %1321 = vst.msk [vmem:[%s1912_s6 + $0x4] sm:$0x3] %vm407_vm3, %v658_v52  ;;  %1323 = vmatmul.mubr.msk.f32.vlgmr.msra.gmra.mrb[4].mxu1 %vm283_vm2, %v658_v52 }
 0x86d   :  { %1403 = vmatpush1.bf16.msra.mxu1 %v1650_v47  ;;  %981 = vmatprep.mubr.f32.mxu1 %v1501_v4 }
 0x86e   :  { %1405 = vmatprep.subr.bf16.mxu1 %v1652_v48 }
 0x871   :  { %1407 = vmatpush1.bf16.msra.mxu1 %v1667_v57 }
 0x872   :  { %1417 = vmatprep.subr.bf16.mxu1 %v1639_v43 }
 0x93f   :  { %v735_v55 = vpop.f32.mrb[4].mxu1 }
 0x940   :  { %v744_v59 = vadd.f32 %v741_v56, %v735_v55  ;;  %v737_v60 = vpop.f32.mrb[5].mxu1 }
 0x941   :  { %v756_v61 = vadd.f32 %v754_v58, %v737_v60 }
 0x943   :  { %v757_v62 = vsel %vm274_vm0, %v744_v59, %v756_v61 }
 0x944   :  { %1461 = vtanh.f32 %v757_v62  ;;  %v1324_v1 = vmul.f32 -1.442695, %v757_v62 }
 0x946   :  { %1463 = vpow2.f32 %v1324_v1 }
 0x94e   :  { %v1462_v63 = vpop.eup %1461 }
 0x94f   :  { %767 = vrot.lane.b32.xlu1 %v1462_v63, %s1503_s30  ;;  %v1435_v63 = vld [vmem:[#allocation2 + $0x4] ss:$0 sps:$4 sm:$0xff]  }
 0x950   :  { %v1464_v2 = vpop.eup %1463  ;;  %v1121_v1 = vrot.slane %v1435_v63, %v1619_v32 }
 0x951   :  { %v761_v3 = vadd.f32 1.0, %v1464_v2 }
 0x953   :  { %1465 = vrcp.f32 %v761_v3  ;;  %v1110_v3 = vld [vmem:[#allocation2 + $0x18] sm:$0xf] }
 0x95d   :  { %v1466_v43 = vpop.eup %1465 }
 0x95e   :  { %v765_v7 = vmul.f32 %v1466_v43, %v649_v46 }
 0x9c1   :  { %v768_v5 = vpop.permute.xlu1 %767 }
 0x9c2   :  { %v770_v6 = vmul.f32 %v1466_v43, %v768_v5 }
 0x9c4   :  { %772 = vrot.lane.b32.xlu0 %v770_v6, %s1504_s1 }
 0xa36   :  { %v773_v8 = vpop.permute.xlu0 %772 }
 0xa37   :  { %v775_v9 = vadd.f32 %v773_v8, %v765_v7 }
 0xa39   :  { %1467 = vtanh.f32 %v775_v9 }
 0xa43   :  { %v1468_v10 = vpop.eup %1467 }
 0xa44   :  { %778 = vrot.lane.b32.xlu1 %v1468_v10, %s1503_s30 }
 0xab6   :  { %v779_v11 = vpop.permute.xlu1 %778 }
 0xab7   :  { %v1772_v12 = vmul.f32 %v1466_v43, %v779_v11  ;;  %v1122_v43 = vcombine.high %v1121_v1, %v1121_v1 }
 0xab9   :  { %783 = vrot.lane.b32.xlu0 %v1772_v12, %s1504_s1 }
 0xb2b   :  { %v784_v13 = vpop.permute.xlu0 %783 }
 0xb2c   :  { %1325 = vst.msk [vmem:[%s1912_s6 + $0x6] sm:$0x3] %vm407_vm3, %v784_v13  ;;  %1327 = vmatmul.mubr.msk.f32.vlgmr.msra.gmra.mrb[6].mxu0 %vm283_vm2, %v784_v13 }
 0xb2d   :  { %1411 = vmatpush1.bf16.msra.mxu0 %v1650_v47  ;;  %1103 = vmatprep.mubr.f32.mxu0 %v1501_v4 }
 0xb2e   :  { %1413 = vmatprep.subr.bf16.mxu0 %v1652_v48 }
 0xb31   :  { %1415 = vmatpush1.bf16.msra.mxu0 %v1667_v57 }
 0xbff   :  { %v861_v16 = vpop.f32.mrb[6].mxu0 }
 0xc00   :  { %v868_v19 = vadd.f32 %v866_v18, %v861_v16  ;;  %v863_v20 = vpop.f32.mrb[7].mxu0 }
 0xc01   :  { %v880_v21 = vadd.f32 %v878_v17, %v863_v20 }
 0xc03   :  { %v881_v22 = vsel %vm274_vm0, %v868_v19, %v880_v21 }
 0xc04   :  { %1469 = vtanh.f32 %v881_v22  ;;  %v1328_v25 = vmul.f32 -1.442695, %v881_v22 }
 0xc06   :  { %1471 = vpow2.f32 %v1328_v25  ;;  %v1436_v25 = vld [vmem:[#allocation2] ss:$0 sps:$4 sm:$0xff]  }
 0xc0e   :  { %v1470_v23 = vpop.eup %1469 }
 0xc0f   :  { %891 = vrot.lane.b32.xlu1 %v1470_v23, %s1503_s30 }
 0xc10   :  { %v1472_v26 = vpop.eup %1471 }
 0xc11   :  { %v885_v27 = vadd.f32 1.0, %v1472_v26  ;;  %v1243_v26 = vrot.slane %v1436_v25, %v1619_v32 }
 0xc13   :  { %1473 = vrcp.f32 %v885_v27 }
 0xc1d   :  { %v1474_v28 = vpop.eup %1473 }
 0xc1e   :  { %v889_v31 = vmul.f32 %v1474_v28, %v775_v9 }
 0xc81   :  { %v892_v29 = vpop.permute.xlu1 %891 }
 0xc82   :  { %v894_v30 = vmul.f32 %v1474_v28, %v892_v29  ;;  %v1244_v29 = vcombine.high %v1243_v26, %v1243_v26 }
 0xc84   :  { %896 = vrot.lane.b32.xlu0 %v894_v30, %s1504_s1 }
 0xcf6   :  { %v897_v33 = vpop.permute.xlu0 %896 }
 0xcf7   :  { %v899_v34 = vadd.f32 %v897_v33, %v889_v31 }
 0xcf9   :  { %1475 = vtanh.f32 %v899_v34 }
 0xd03   :  { %v1476_v35 = vpop.eup %1475 }
 0xd04   :  { %902 = vrot.lane.b32.xlu1 %v1476_v35, %s1503_s30 }
 0xd76   :  { %v903_v36 = vpop.permute.xlu1 %902 }
 0xd77   :  { %v1790_v37 = vmul.f32 %v1474_v28, %v903_v36  ;;  %v1232_v28 = vld [vmem:[#allocation2 + $0x1c] sm:$0xf] }
 0xd79   :  { %907 = vrot.lane.b32.xlu0 %v1790_v37, %s1504_s1 }
 0xdeb   :  { %v1794_v38 = vpop.permute.xlu0 %907 }
 0xdec   :  { %1331 = vmatmul.mubr.msk.f32.vlgmr.msra.gmra.mrb[6].mxu1 %vm283_vm2, %v1794_v38 }
 0xded   :  { %1419 = vmatpush1.bf16.msra.mxu1 %v1650_v47  ;;  %1225 = vmatprep.mubr.f32.mxu1 %v1501_v4 }
 0xdee   :  { %1421 = vmatprep.subr.bf16.mxu1 %v1652_v48 }
 0xdf1   :  { %1423 = vmatpush1.bf16.msra.mxu1 %v1667_v57 }
 0xebf   :  { %v983_v41 = vpop.f32.mrb[6].mxu1 }
 0xec0   :  { %v990_v45 = vadd.f32 %v988_v42, %v983_v41  ;;  %v985_v46 = vpop.f32.mrb[7].mxu1 }
 0xec1   :  { %v1002_v49 = vadd.f32 %v1000_v44, %v985_v46 }
 0xec3   :  { %v1003_v50 = vsel %vm274_vm0, %v990_v45, %v1002_v49 }
 0xec4   :  { %1477 = vtanh.f32 %v1003_v50  ;;  %v1332_v4 = vmul.f32 -1.442695, %v1003_v50 }
 0xec6   :  { %1479 = vpow2.f32 %v1332_v4 }
 0xece   :  { %v1478_v52 = vpop.eup %1477 }
 0xecf   :  { %1013 = vrot.lane.b32.xlu1 %v1478_v52, %s1503_s30 }
 0xed0   :  { %v1480_v47 = vpop.eup %1479 }
 0xed1   :  { %v1007_v48 = vadd.f32 1.0, %v1480_v47 }
 0xed3   :  { %1481 = vrcp.f32 %v1007_v48 }
 0xedd   :  { %v1482_v57 = vpop.eup %1481 }
 0xede   :  { %v1011_v55 = vmul.f32 %v1482_v57, %v899_v34 }
 0xf41   :  { %v1014_v53 = vpop.permute.xlu1 %1013 }
 0xf42   :  { %v1016_v54 = vmul.f32 %v1482_v57, %v1014_v53 }
 0xf44   :  { %1018 = vrot.lane.b32.xlu0 %v1016_v54, %s1504_s1 }
 0xfb6   :  { %v1019_v56 = vpop.permute.xlu0 %1018 }
 0xfb7   :  { %v1021_v58 = vadd.f32 %v1019_v56, %v1011_v55 }
 0xfb9   :  { %1483 = vtanh.f32 %v1021_v58 }
 0xfc3   :  { %v1484_v59 = vpop.eup %1483 }
 0xfc4   :  { %1024 = vrot.lane.b32.xlu1 %v1484_v59, %s1503_s30 }
0x1036   :  { %v1025_v60 = vpop.permute.xlu1 %1024 }
0x1037   :  { %v1807_v61 = vmul.f32 %v1482_v57, %v1025_v60 }
0x1039   :  { %1029 = vrot.lane.b32.xlu0 %v1807_v61, %s1504_s1 }
0x10ab   :  { %v1811_v62 = vpop.permute.xlu0 %1029 }
0x10ac   :  { %1335 = vmatmul.mubr.msk.f32.vlgmr.msra.gmra.mrb[8].mxu0 %vm283_vm2, %v1811_v62 }
0x117f   :  { %v1105_v2 = vpop.f32.mrb[8].mxu0 }
0x1180   :  { %v1112_v5 = vadd.f32 %v1110_v3, %v1105_v2  ;;  %v1107_v6 = vpop.f32.mrb[9].mxu0 }
0x1181   :  { %v1124_v7 = vadd.f32 %v1122_v43, %v1107_v6 }
0x1183   :  { %v1125_v8 = vsel %vm274_vm0, %v1112_v5, %v1124_v7 }
0x1184   :  { %1485 = vtanh.f32 %v1125_v8  ;;  %v1336_v10 = vmul.f32 -1.442695, %v1125_v8 }
0x1186   :  { %1487 = vpow2.f32 %v1336_v10 }
0x118e   :  { %v1486_v9 = vpop.eup %1485 }
0x118f   :  { %1135 = vrot.lane.b32.xlu1 %v1486_v9, %s1503_s30 }
0x1190   :  { %v1488_v11 = vpop.eup %1487 }
0x1191   :  { %v1129_v13 = vadd.f32 1.0, %v1488_v11 }
0x1193   :  { %1489 = vrcp.f32 %v1129_v13 }
0x119d   :  { %v1490_v14 = vpop.eup %1489 }
0x119e   :  { %v1133_v18 = vmul.f32 %v1490_v14, %v1021_v58 }
0x1201   :  { %v1136_v15 = vpop.permute.xlu1 %1135 }
0x1202   :  { %v1138_v16 = vmul.f32 %v1490_v14, %v1136_v15 }
0x1204   :  { %1140 = vrot.lane.b32.xlu0 %v1138_v16, %s1504_s1 }
0x1276   :  { %v1141_v17 = vpop.permute.xlu0 %1140 }
0x1277   :  { %v1143_v19 = vadd.f32 %v1141_v17, %v1133_v18 }
0x1279   :  { %1491 = vtanh.f32 %v1143_v19 }
0x1283   :  { %v1492_v20 = vpop.eup %1491 }
0x1284   :  { %1146 = vrot.lane.b32.xlu1 %v1492_v20, %s1503_s30 }
0x12f6   :  { %v1147_v21 = vpop.permute.xlu1 %1146 }
0x12f7   :  { %v1149_v22 = vmul.f32 %v1490_v14, %v1147_v21 }
0x12f9   :  { %1151 = vrot.lane.b32.xlu0 %v1149_v22, %s1504_s1 }
0x136b   :  { %v1152_v23 = vpop.permute.xlu0 %1151 }
0x136c   :  { %1339 = vmatmul.mubr.msk.f32.vlgmr.msra.gmra.mrb[8].mxu1 %vm283_vm2, %v1152_v23 }
0x143f   :  { %v1227_v27 = vpop.f32.mrb[8].mxu1 }
0x1440   :  { %v1234_v30 = vadd.f32 %v1232_v28, %v1227_v27  ;;  %v1229_v31 = vpop.f32.mrb[9].mxu1 }
0x1441   :  { %v1246_v33 = vadd.f32 %v1244_v29, %v1229_v31 }
0x1443   :  { %v1247_v34 = vsel %vm274_vm0, %v1234_v30, %v1246_v33 }
0x1444   :  { %1493 = vtanh.f32 %v1247_v34  ;;  %v1340_v36 = vmul.f32 -1.442695, %v1247_v34 }
0x1446   :  { %1495 = vpow2.f32 %v1340_v36 }
0x144e   :  { %v1494_v35 = vpop.eup %1493 }
0x144f   :  { %1257 = vrot.lane.b32.xlu1 %v1494_v35, %s1503_s30 }
0x1450   :  { %v1496_v39 = vpop.eup %1495 }
0x1451   :  { %v1251_v40 = vadd.f32 1.0, %v1496_v39 }
0x1453   :  { %1497 = vrcp.f32 %v1251_v40 }
0x145d   :  { %v1498_v41 = vpop.eup %1497 }
0x145e   :  { %v1255_v44 = vmul.f32 %v1498_v41, %v1143_v19 }
0x14c1   :  { %v1258_v42 = vpop.permute.xlu1 %1257 }
0x14c2   :  { %v1260_v32 = vmul.f32 %v1498_v41, %v1258_v42 }
0x14c4   :  { %1262 = vrot.lane.b32.xlu0 %v1260_v32, %s1504_s1 }
0x14c8   :  { %409 = vrot.lane.b32.xlu0 %v1715_v0, %s1503_s30 }
0x14cc   :  { %662 = vrot.lane.b32.xlu0 %v1753_v51, %s1503_s30 }
0x14d0   :  { %911 = vrot.lane.b32.xlu0 %v1790_v37, %s1503_s30 }
0x14d4   :  { %1155 = vrot.lane.b32.xlu0 %v1149_v22, %s1503_s30 }
0x1536   :  { %v1263_v45 = vpop.permute.xlu0 %1262 }
0x1537   :  { %v1265_v46 = vadd.f32 %v1263_v45, %v1255_v44 }
0x1539   :  { %1499 = vtanh.f32 %v1265_v46 }
0x153a   :  { %v410_v49 = vpop.permute.xlu0 %409 }
0x153b   :  { %1314 = vst.msk [vmem:[%s1912_s6 + $0xc] sm:$0xc] %vm413_vm4, %v410_v49 }
0x153e   :  { %v663_v0 = vpop.permute.xlu0 %662 }
0x153f   :  { %1322 = vst.msk [vmem:[%s1912_s6 + $0x8] sm:$0xc] %vm413_vm4, %v663_v0 }
0x1540   :  { %1333 = vst.msk [vmem:[%s1912_s6 + $0xa] sm:$0x3] %vm407_vm3, %v1811_v62 }
0x1542   :  { %v912_v51 = vpop.permute.xlu0 %911 }
0x1543   :  { %v1500_v37 = vpop.eup %1499  ;;  %1330 = vst.msk [vmem:[%s1912_s6 + $0x4] sm:$0xc] %vm413_vm4, %v912_v51 }
0x1544   :  { %1268 = vrot.lane.b32.xlu1 %v1500_v37, %s1503_s30 }
0x1546   :  { %v1156_v50 = vpop.permute.xlu0 %1155 }
0x1547   :  { %1338 = vst.msk [vmem:[%s1912_s6] sm:$0xc] %vm413_vm4, %v1156_v50 }
0x1548   :  { %536 = vrot.lane.b32.xlu1 %v1734_v24, %s1503_s30 }
0x154c   :  { %788 = vrot.lane.b32.xlu1 %v1772_v12, %s1503_s30 }
0x1550   :  { %1033 = vrot.lane.b32.xlu1 %v1807_v61, %s1503_s30 }
0x15b6   :  { %v1269_v52 = vpop.permute.xlu1 %1268 }
0x15b7   :  { %v1271_v4 = vmul.f32 %v1498_v41, %v1269_v52 }
0x15b9   :  { %1277 = vrot.lane.b32.xlu0 %v1271_v4, %s1503_s30  ;;  %1273 = vrot.lane.b32.xlu1 %v1271_v4, %s1504_s1 }
0x15ba   :  { %v537_v47 = vpop.permute.xlu1 %536 }
0x15bb   :  { %1318 = vst.msk [vmem:[%s1912_s6 + $0xa] sm:$0xc] %vm413_vm4, %v537_v47 }
0x15bc   :  { %1337 = vst.msk [vmem:[%s1912_s6 + $0xc] sm:$0x3] %vm407_vm3, %v1152_v23 }
0x15bd   :  { %1286 = vrot.lane.b32.xlu1 %v1265_v46, %s1505_s3 }
0x15be   :  { %v789_v24 = vpop.permute.xlu1 %788 }
0x15bf   :  { %1326 = vst.msk [vmem:[%s1912_s6 + $0x6] sm:$0xc] %vm413_vm4, %v789_v24 }
0x15c0   :  { %1329 = vst.msk [vmem:[%s1912_s6 + $0x8] sm:$0x3] %vm407_vm3, %v1794_v38 }
0x15c2   :  { %v1034_v12 = vpop.permute.xlu1 %1033 }
0x15c3   :  { %1334 = vst.msk [vmem:[%s1912_s6 + $0x2] sm:$0xc] %vm413_vm4, %v1034_v12 }
0x162b   :  { %v1278_v48 = vpop.permute.xlu0 %1277  ;;  %v1274_v57 = vpop.permute.xlu1 %1273 }
0x162c   :  { %1280 = vst.msk [vmem:[%s1912_s6 - $0x2] sm:$0xc] %vm413_vm4, %v1278_v48 }
0x162d   :  { %1341 = vst.msk [vmem:[%s1912_s6 + $0xe] sm:$0x3] %vm407_vm3, %v1274_v57  ;;  %1281 = vst.msk [vmem:[%s1913_s7] sm:$0x3] %vm407_vm3, %v1274_v57 }
0x162e   :  { %1342 = vst.msk [vmem:[%s1913_s7] sm:$0xc] %vm1283_vm5, %v1274_v57 }
0x162f   :  { %v1287_v38 = vpop.permute.xlu1 %1286 }
0x1630   :  { %1289 = vst.msk [vmem:[%s1914_s8] sm:$0x3] %vm407_vm3, %v1287_v38 }
0x1631   :  { %1343 = vst.msk [vmem:[%s1914_s8] sm:$0xc] %vm1283_vm5, %v1287_v38 }

// kernel: discriminator_forward.3
= control target key start
LH: loop header
LB: loop body
LE: loop exit
PB: predicated region body
PF: predicated region fallthrough
CT: control target
= control target key end

     0   :  { %v37_v0 = vlaneseq  ;;  %vm114_vm0 = vcmask 1043456   ;;  %v1480_v2 = vmov 0.0   ;;  %v1481_v5 = vmov 1983009808   ;;  %s1482_s21 = smov 64   ;;  %s1483_s22 = smov 32   ;;  %s1844_s1 = inlined_call_operand.vmem [shape: f32[4,256], index: 1, kind: input, shape index: {}]   ;;  %s1845_s0 = inlined_call_operand.vmem [shape: f32[8,2,4], index: 0, kind: input, shape index: {}]   ;;  %s1846_s2 = inlined_call_operand.vmem [shape: f32[32,256], index: 2, kind: input, shape index: {}]   ;;  %s1847_s4 = inlined_call_operand.vmem [shape: f32[2,2,32], index: 4, kind: input, shape index: {}]   ;;  %s1848_s3 = inlined_call_operand.vmem [shape: f32[1,256], index: 3, kind: input, shape index: {}]   ;;  %s1849_s5 = inlined_call_operand.vmem [shape: f32[2,2,32], index: 5, kind: input, shape index: {}]   ;;  %s1850_s6 = inlined_call_operand.vmem [shape: f32[8,2,64], index: 6, kind: output, shape index: {0}]   ;;  %s1851_s7 = inlined_call_operand.vmem [shape: f32[2,2,32], index: 7, kind: output, shape index: {1}]   ;;  %s1852_s8 = inlined_call_operand.vmem [shape: f32[2,2,32], index: 8, kind: output, shape index: {2}]  }
   0x1   :  { %v34_v1 = vld [vmem:[%s1844_s1] sm:$0xff]  ;;  %183 = vmatprep.mubr.f32.mxu0 %v1480_v2  ;;  %v47_v6 = vunpack.c.l.s4 %v1481_v5  ;;  %343 = vmatprep.mubr.f32.mxu1 %v1480_v2  ;;  %v253_v11 = vld [vmem:[%s1846_s2 + $0x8] sm:$0xff]  ;;  %v255_v20 = vld [vmem:[%s1846_s2 + $0x18] sm:$0xff]  ;;  %vm109_vm1 = vcmask 31744   ;;  %vm266_vm2 = vcmask 1041408   ;;  %vm275_vm3 = vcmask 261120  }
   0x2   :  { %v26_v3 = vld [vmem:[%s1845_s0] sm:$0x3]  ;;  %v27_v4 = vld [vmem:[%s1845_s0 + $0x2] sm:$0x3]  ;;  %v96_v7 = vcombine.high %v34_v1, %v34_v1  ;;  %v28_v8 = vld [vmem:[%s1845_s0 + $0x4] sm:$0x3]  ;;  %v1575_v24 = vpack.c.bf16 %v255_v20, %v253_v11 }
   0x3   :  { %v29_v9 = vld [vmem:[%s1845_s0 + $0x6] sm:$0x3]  ;;  %v1547_v10 = vshrl.u32 %v37_v0, 7  ;;  %v48_v12 = vunpack.c.0.s8 %v47_v6  ;;  %v61_v13 = vcombine.low %v26_v3, %v27_v4  ;;  %v30_v15 = vld [vmem:[%s1845_s0 + $0x8] sm:$0x3]  ;;  %v254_v25 = vld [vmem:[%s1846_s2 + $0x10] sm:$0xff] }
   0x4   :  { %v62_v14 = vcombine.low %v28_v8, %v29_v9  ;;  %v31_v16 = vld [vmem:[%s1845_s0 + $0xa] sm:$0x3]  ;;  %v32_v17 = vld [vmem:[%s1845_s0 + $0xc] sm:$0x3]  ;;  %1296 = vmatprep.subr.msk.mxu0 %vm114_vm0, %v96_v7  ;;  %v33_v18 = vld [vmem:[%s1845_s0 + $0xe] sm:$0x3]  ;;  %1339 = vmatprep.subr.bf16.mxu1 %v1575_v24 }
   0x5   :  { %v78_v19 = vcombine.low %v30_v15, %v31_v16  ;;  %v252_v21 = vld [vmem:[%s1846_s2] sm:$0xff]  ;;  %1297 = vmatpush1.msk.msra.mxu0 %vm114_vm0, %v34_v1  ;;  %v1573_v22 = vsub.s32 %v48_v12, %v1547_v10  ;;  %v79_v23 = vcombine.low %v32_v17, %v33_v18  ;;  %v257_v26 = vld [vmem:[%s1846_s2 + $0x28] sm:$0xff]  ;;  %v259_v27 = vld [vmem:[%s1846_s2 + $0x38] sm:$0xff]  ;;  %v39_v43 = vsub.s32 0, %v1547_v10 }
   0x6   :  { %v1586_v28 = vpack.c.bf16 %v254_v25, %v252_v21  ;;  %v1588_v29 = vpack.c.bf16 %v259_v27, %v257_v26  ;;  %v256_v30 = vld [vmem:[%s1846_s2 + $0x20] sm:$0xff]  ;;  %v258_v31 = vld [vmem:[%s1846_s2 + $0x30] sm:$0xff]  ;;  %1347 = vmatprep.subr.bf16.mxu0 %v1575_v24  ;;  %v43_v44 = vsub.s32 1, %v1547_v10  ;;  %vm399_vm4 = vcmask 254976  }
   0x7   :  { %v69_v32 = vrot.slane %v61_v13, %v1573_v22  ;;  %v76_v33 = vrot.slane %v62_v14, %v1573_v22  ;;  %v86_v34 = vrot.slane %v78_v19, %v1573_v22  ;;  %v93_v35 = vrot.slane %v79_v23, %v1573_v22  ;;  %v1304_v36 = vld [vmem:[%s1847_s4 + $0x2] sm:$0x3]  ;;  %v260_v40 = vld [vmem:[%s1847_s4] sm:$0x3] }
   0x8   :  { %1341 = vmatpush1.bf16.msra.mxu1 %v1586_v28  ;;  %v1605_v37 = vpack.c.bf16 %v258_v31, %v256_v30  ;;  %v264_v38 = vrot.slane %v1304_v36, 6  ;;  %v35_v45 = vld [vmem:[%s1848_s3] sm:$0x3]  ;;  %v1305_v20 = vld [vmem:[%s1849_s5 + $0x2] sm:$0x3]  ;;  %vm405_vm5 = vcmask 519426  }
   0x9   :  { %v77_v39 = vcombine.low %v69_v32, %v76_v33  ;;  %1343 = vmatprep.subr.bf16.mxu1 %v1588_v29  ;;  %v94_v41 = vcombine.low %v86_v34, %v93_v35  ;;  %v40_v46 = vrot.slane %v35_v45, %v39_v43  ;;  %v44_v47 = vrot.slane %v35_v45, %v43_v44  ;;  %v268_v23 = vld [vmem:[%s1849_s5] sm:$0x3]  ;;  %s1484_s3 = smov 96  }
   0xa   :  { %v267_v42 = vsel %vm266_vm2, %v260_v40, %v264_v38  ;;  %v272_v21 = vrot.slane %v1305_v20, 6  ;;  %vm1275_vm6 = vcmask 257026  }
   0xb   :  { %1298 = vmatmul.mubr.msk.f32.vlgmr.msra.gmra.mrb[0].mxu0 %vm109_vm1, %v77_v39  ;;  %v45_v48 = vcombine.low %v40_v46, %v44_v47 }
   0xc   :  { %189 = vmatprep.mubr.f32.mxu0 %v1480_v2  ;;  %1345 = vmatpush1.bf16.msra.mxu1 %v1605_v37  ;;  %v274_v26 = vsel %vm266_vm2, %v268_v23, %v272_v21 }
   0xd   :  { %1349 = vmatpush1.bf16.msra.mxu0 %v1586_v28  ;;  %1355 = vmatprep.subr.bf16.mxu1 %v1575_v24  ;;  %v52_v49 = vrot.slane %v45_v48, %v1573_v22 }
   0xe   :  { %1351 = vmatprep.subr.bf16.mxu0 %v1588_v29 }
   0xf   :  { %1299 = vmatmul.mubr.msk.f32.gmra.mrb[2].mxu0 %vm109_vm1, %v94_v41  ;;  %1306 = vmatmul.mubr.msk.f32.vlgmr.msra.gmra.mrb[0].mxu1 %vm275_vm3, %v267_v42  ;;  %v97_v50 = vcombine.low %v52_v49, %v52_v49 }
  0x10   :  { %473 = vmatprep.mubr.f32.mxu0 %v1480_v2  ;;  %1357 = vmatpush1.bf16.msra.mxu1 %v1586_v28 }
  0x11   :  { %1353 = vmatpush1.bf16.msra.mxu0 %v1605_v37  ;;  %1359 = vmatprep.subr.bf16.mxu1 %v1588_v29  ;;  %v104_v51 = vrot.slane %v97_v50, %v1573_v22 }
  0x12   :  { %599 = vmatprep.mubr.f32.mxu1 %v1480_v2  ;;  %1363 = vmatprep.subr.bf16.mxu0 %v1575_v24 }
  0x13   :  { %v105_v52 = vcombine.low %v104_v51, %v104_v51  ;;  %v106_v53 = vcombine.high %v104_v51, %v104_v51 }
  0x14   :  { %1361 = vmatpush1.bf16.msra.mxu1 %v1605_v37 }
  0x15   :  { %1371 = vmatprep.subr.bf16.mxu1 %v1575_v24 }
  0xde   :  { %v185_v54 = vpop.f32.mrb[0].mxu0 }
  0xdf   :  { %v186_v55 = vadd.f32 %v185_v54, %v105_v52  ;;  %v187_v56 = vpop.f32.mrb[1].mxu0 }
  0xe0   :  { %v188_v57 = vadd.f32 %v187_v56, %v106_v53 }
  0xe2   :  { %v200_v58 = vcombine.low %v186_v55, %v188_v57  ;;  %v201_v59 = vcombine.high %v186_v55, %v188_v57  ;;  %v191_v60 = vpop.f32.mrb[2].mxu0  ;;  %v345_v61 = vpop.f32.mrb[0].mxu1 }
  0xe3   :  { %v192_v62 = vadd.f32 %v191_v60, %v105_v52  ;;  %v193_v63 = vpop.f32.mrb[3].mxu0  ;;  %v347_v0 = vpop.f32.mrb[1].mxu1 }
  0xe4   :  { %v208_v1 = vrot.slane %v200_v58, %v1573_v22  ;;  %v215_v3 = vrot.slane %v201_v59, %v1573_v22  ;;  %1300 = vst.sshfl [vmem:[#allocation2] sm:$0x33 pattern:$0x76325410] %v200_v58  ;;  %v194_v4 = vadd.f32 %v193_v63, %v106_v53 }
  0xe5   :  { %1301 = vst.sshfl [vmem:[#allocation2 + $0x8] sm:$0x33 pattern:$0x76325410] %v201_v59 }
  0xe6   :  { %v216_v5 = vcombine.high %v208_v1, %v208_v1  ;;  %v217_v6 = vcombine.high %v215_v3, %v215_v3  ;;  %v218_v7 = vcombine.low %v192_v62, %v194_v4  ;;  %v219_v8 = vcombine.high %v192_v62, %v194_v4 }
  0xe8   :  { %245 = vst [vmem:[#allocation2 + $0x4] sm:$0xf] %v216_v5  ;;  %247 = vst [vmem:[#allocation2 + $0xc] sm:$0xf] %v217_v6  ;;  %v226_v9 = vrot.slane %v218_v7, %v1573_v22  ;;  %v233_v10 = vrot.slane %v219_v8, %v1573_v22 }
  0xe9   :  { %1302 = vst.sshfl [vmem:[#allocation2 + $0x10] sm:$0x33 pattern:$0x76325410] %v218_v7 }
  0xea   :  { %1303 = vst.sshfl [vmem:[#allocation2 + $0x18] sm:$0x33 pattern:$0x76325410] %v219_v8  ;;  %v234_v11 = vcombine.high %v226_v9, %v226_v9  ;;  %v235_v12 = vcombine.high %v233_v10, %v233_v10 }
  0xeb   :  { %v350_v15 = vld [vmem:[#allocation2] sm:$0xf] }
  0xec   :  { %249 = vst [vmem:[#allocation2 + $0x14] sm:$0xf] %v234_v11  ;;  %251 = vst [vmem:[#allocation2 + $0x1c] sm:$0xf] %v235_v12  ;;  %v353_v17 = vadd.f32 %v350_v15, %v345_v61  ;;  %v607_v7 = vld [vmem:[#allocation2 + $0x8] sm:$0xf] }
  0xef   :  { %v481_v47 = vld [vmem:[#allocation2 + $0x4] sm:$0xf] }
  0xf1   :  { %v1409_v44 = vld [vmem:[#allocation2 + $0x18] ss:$0 sps:$4 sm:$0xff]  }
  0xf2   :  { %v493_v45 = vrot.slane %v1409_v44, %v1573_v22 }
  0xf3   :  { %v1408_v13 = vld [vmem:[#allocation2 + $0x1c] ss:$0 sps:$4 sm:$0xff]   ;;  %v1410_v4 = vld [vmem:[#allocation2 + $0x14] ss:$0 sps:$4 sm:$0xff]  }
  0xf4   :  { %v362_v14 = vrot.slane %v1408_v13, %v1573_v22  ;;  %v494_v48 = vcombine.high %v493_v45, %v493_v45  ;;  %v619_v5 = vrot.slane %v1410_v4, %v1573_v22 }
  0xf6   :  { %v363_v16 = vcombine.high %v362_v14, %v362_v14  ;;  %v620_v8 = vcombine.high %v619_v5, %v619_v5 }
  0xf8   :  { %v365_v18 = vadd.f32 %v363_v16, %v347_v0 }
  0xfa   :  { %v366_v19 = vsel %vm266_vm2, %v353_v17, %v365_v18 }
  0xfb   :  { %1416 = vtanh.f32 %v366_v19  ;;  %v1307_v27 = vmul.f32 -1.442695, %v366_v19 }
  0xfd   :  { %1418 = vpow2.f32 %v1307_v27 }
 0x105   :  { %v1417_v25 = vpop.eup %1416 }
 0x106   :  { %380 = vrot.lane.b32.xlu0 %v1417_v25, %s1482_s21 }
 0x107   :  { %v1419_v30 = vpop.eup %1418 }
 0x108   :  { %v370_v31 = vadd.f32 1.0, %v1419_v30 }
 0x10a   :  { %375 = vrot.lane.b32.xlu0 %v274_v26, %s1483_s22  ;;  %1420 = vrcp.f32 %v370_v31  ;;  %v1411_v31 = vld [vmem:[#allocation2 + $0x10] ss:$0 sps:$4 sm:$0xff]  }
 0x114   :  { %v1421_v32 = vpop.eup %1420 }
 0x178   :  { %v381_v33 = vpop.permute.xlu0 %380 }
 0x179   :  { %v383_v34 = vmul.f32 %v1421_v32, %v381_v33 }
 0x17b   :  { %385 = vrot.lane.b32.xlu1 %v383_v34, %s1483_s22  ;;  %v733_v34 = vld [vmem:[#allocation2 + $0xc] sm:$0xf] }
 0x17c   :  { %v376_v35 = vpop.permute.xlu0 %375 }
 0x17d   :  { %v378_v36 = vmul.f32 %v1421_v32, %v376_v35 }
 0x1ed   :  { %v386_v38 = vpop.permute.xlu1 %385 }
 0x1ee   :  { %v388_v39 = vadd.f32 %v386_v38, %v378_v36 }
 0x1f0   :  { %1422 = vtanh.f32 %v388_v39 }
 0x1fa   :  { %v1423_v40 = vpop.eup %1422 }
 0x1fb   :  { %391 = vrot.lane.b32.xlu1 %v1423_v40, %s1482_s21 }
 0x26d   :  { %v392_v41 = vpop.permute.xlu1 %391 }
 0x26e   :  { %v1653_v42 = vmul.f32 %v1421_v32, %v392_v41  ;;  %v745_v32 = vrot.slane %v1411_v31, %v1573_v22 }
 0x270   :  { %396 = vrot.lane.b32.xlu0 %v1653_v42, %s1483_s22  ;;  %v746_v35 = vcombine.high %v745_v32, %v745_v32 }
 0x2e2   :  { %v397_v43 = vpop.permute.xlu0 %396 }
 0x2e3   :  { %400 = vst.msk [vmem:[%s1850_s6] sm:$0x3] %vm399_vm4, %v397_v43  ;;  %1309 = vmatmul.mubr.msk.f32.vlgmr.msra.gmra.mrb[4].mxu0 %vm275_vm3, %v397_v43 }
 0x2e4   :  { %1365 = vmatpush1.bf16.msra.mxu0 %v1586_v28  ;;  %725 = vmatprep.mubr.f32.mxu0 %v1480_v2 }
 0x2e5   :  { %1367 = vmatprep.subr.bf16.mxu0 %v1588_v29 }
 0x2e8   :  { %1369 = vmatpush1.bf16.msra.mxu0 %v1605_v37 }
 0x2e9   :  { %1379 = vmatprep.subr.bf16.mxu0 %v1575_v24 }
 0x3b6   :  { %v475_v46 = vpop.f32.mrb[4].mxu0 }
 0x3b7   :  { %v484_v49 = vadd.f32 %v481_v47, %v475_v46  ;;  %v477_v50 = vpop.f32.mrb[5].mxu0 }
 0x3b8   :  { %v496_v51 = vadd.f32 %v494_v48, %v477_v50 }
 0x3ba   :  { %v497_v52 = vsel %vm266_vm2, %v484_v49, %v496_v51 }
 0x3bb   :  { %1424 = vtanh.f32 %v497_v52  ;;  %v1310_v54 = vmul.f32 -1.442695, %v497_v52 }
 0x3bd   :  { %1426 = vpow2.f32 %v1310_v54 }
 0x3c5   :  { %v1425_v53 = vpop.eup %1424 }
 0x3c6   :  { %507 = vrot.lane.b32.xlu1 %v1425_v53, %s1482_s21 }
 0x3c7   :  { %v1427_v55 = vpop.eup %1426 }
 0x3c8   :  { %v501_v56 = vadd.f32 1.0, %v1427_v55  ;;  %v1412_v55 = vld [vmem:[#allocation2 + $0xc] ss:$0 sps:$4 sm:$0xff]  }
 0x3ca   :  { %1428 = vrcp.f32 %v501_v56  ;;  %v869_v56 = vrot.slane %v1412_v55, %v1573_v22 }
 0x3d4   :  { %v1429_v57 = vpop.eup %1428 }
 0x3d5   :  { %v505_v60 = vmul.f32 %v1429_v57, %v388_v39 }
 0x438   :  { %v508_v58 = vpop.permute.xlu1 %507 }
 0x439   :  { %v510_v59 = vmul.f32 %v1429_v57, %v508_v58  ;;  %v858_v58 = vld [vmem:[#allocation2 + $0x10] sm:$0xf] }
 0x43b   :  { %512 = vrot.lane.b32.xlu0 %v510_v59, %s1483_s22  ;;  %v870_v59 = vcombine.high %v869_v56, %v869_v56 }
 0x4ad   :  { %v513_v61 = vpop.permute.xlu0 %512 }
 0x4ae   :  { %v515_v62 = vadd.f32 %v513_v61, %v505_v60 }
 0x4b0   :  { %1430 = vtanh.f32 %v515_v62 }
 0x4ba   :  { %v1431_v63 = vpop.eup %1430 }
 0x4bb   :  { %518 = vrot.lane.b32.xlu1 %v1431_v63, %s1482_s21 }
 0x52d   :  { %v519_v0 = vpop.permute.xlu1 %518 }
 0x52e   :  { %v1672_v1 = vmul.f32 %v1429_v57, %v519_v0 }
 0x530   :  { %523 = vrot.lane.b32.xlu0 %v1672_v1, %s1483_s22 }
 0x5a2   :  { %v524_v3 = vpop.permute.xlu0 %523 }
 0x5a3   :  { %1311 = vst.msk [vmem:[%s1850_s6 + $0x2] sm:$0x3] %vm399_vm4, %v524_v3  ;;  %1313 = vmatmul.mubr.msk.f32.vlgmr.msra.gmra.mrb[2].mxu1 %vm275_vm3, %v524_v3 }
 0x5a4   :  { %1373 = vmatpush1.bf16.msra.mxu1 %v1586_v28  ;;  %851 = vmatprep.mubr.f32.mxu1 %v1480_v2 }
 0x5a5   :  { %1375 = vmatprep.subr.bf16.mxu1 %v1588_v29 }
 0x5a8   :  { %1377 = vmatpush1.bf16.msra.mxu1 %v1605_v37 }
 0x5a9   :  { %1387 = vmatprep.subr.bf16.mxu1 %v1575_v24 }
 0x676   :  { %v601_v6 = vpop.f32.mrb[2].mxu1 }
 0x677   :  { %v610_v9 = vadd.f32 %v607_v7, %v601_v6  ;;  %v603_v10 = vpop.f32.mrb[3].mxu1 }
 0x678   :  { %v622_v11 = vadd.f32 %v620_v8, %v603_v10 }
 0x67a   :  { %v623_v12 = vsel %vm266_vm2, %v610_v9, %v622_v11 }
 0x67b   :  { %1432 = vtanh.f32 %v623_v12  ;;  %v1314_v14 = vmul.f32 -1.442695, %v623_v12 }
 0x67d   :  { %1434 = vpow2.f32 %v1314_v14 }
 0x685   :  { %v1433_v13 = vpop.eup %1432 }
 0x686   :  { %633 = vrot.lane.b32.xlu1 %v1433_v13, %s1482_s21 }
 0x687   :  { %v1435_v15 = vpop.eup %1434 }
 0x688   :  { %v627_v16 = vadd.f32 1.0, %v1435_v15 }
 0x68a   :  { %1436 = vrcp.f32 %v627_v16  ;;  %v1413_v16 = vld [vmem:[#allocation2 + $0x8] ss:$0 sps:$4 sm:$0xff]  }
 0x694   :  { %v1437_v17 = vpop.eup %1436 }
 0x695   :  { %v631_v20 = vmul.f32 %v1437_v17, %v515_v62 }
 0x6f8   :  { %v634_v18 = vpop.permute.xlu1 %633 }
 0x6f9   :  { %v636_v19 = vmul.f32 %v1437_v17, %v634_v18 }
 0x6fb   :  { %638 = vrot.lane.b32.xlu0 %v636_v19, %s1483_s22  ;;  %v980_v19 = vld [vmem:[#allocation2 + $0x14] sm:$0xf] }
 0x76d   :  { %v639_v21 = vpop.permute.xlu0 %638 }
 0x76e   :  { %v641_v23 = vadd.f32 %v639_v21, %v631_v20 }
 0x770   :  { %1438 = vtanh.f32 %v641_v23 }
 0x77a   :  { %v1439_v25 = vpop.eup %1438 }
 0x77b   :  { %644 = vrot.lane.b32.xlu1 %v1439_v25, %s1482_s21 }
 0x7ed   :  { %v645_v26 = vpop.permute.xlu1 %644 }
 0x7ee   :  { %v1691_v27 = vmul.f32 %v1437_v17, %v645_v26  ;;  %v991_v17 = vrot.slane %v1413_v16, %v1573_v22 }
 0x7f0   :  { %649 = vrot.lane.b32.xlu0 %v1691_v27, %s1483_s22  ;;  %v992_v20 = vcombine.high %v991_v17, %v991_v17 }
 0x862   :  { %v650_v30 = vpop.permute.xlu0 %649 }
 0x863   :  { %1315 = vst.msk [vmem:[%s1850_s6 + $0x4] sm:$0x3] %vm399_vm4, %v650_v30  ;;  %1317 = vmatmul.mubr.msk.f32.vlgmr.msra.gmra.mrb[6].mxu0 %vm275_vm3, %v650_v30 }
 0x864   :  { %1381 = vmatpush1.bf16.msra.mxu0 %v1586_v28  ;;  %973 = vmatprep.mubr.f32.mxu0 %v1480_v2 }
 0x865   :  { %1383 = vmatprep.subr.bf16.mxu0 %v1588_v29 }
 0x868   :  { %1385 = vmatpush1.bf16.msra.mxu0 %v1605_v37 }
 0x869   :  { %1395 = vmatprep.subr.bf16.mxu0 %v1575_v24 }
 0x936   :  { %v727_v33 = vpop.f32.mrb[6].mxu0 }
 0x937   :  { %v736_v36 = vadd.f32 %v733_v34, %v727_v33  ;;  %v729_v38 = vpop.f32.mrb[7].mxu0 }
 0x938   :  { %v748_v39 = vadd.f32 %v746_v35, %v729_v38 }
 0x93a   :  { %v749_v40 = vsel %vm266_vm2, %v736_v36, %v748_v39 }
 0x93b   :  { %1440 = vtanh.f32 %v749_v40  ;;  %v1318_v43 = vmul.f32 -1.442695, %v749_v40 }
 0x93d   :  { %1442 = vpow2.f32 %v1318_v43 }
 0x945   :  { %v1441_v41 = vpop.eup %1440 }
 0x946   :  { %759 = vrot.lane.b32.xlu1 %v1441_v41, %s1482_s21  ;;  %v1414_v41 = vld [vmem:[#allocation2 + $0x4] ss:$0 sps:$4 sm:$0xff]  }
 0x947   :  { %v1443_v44 = vpop.eup %1442  ;;  %v1113_v43 = vrot.slane %v1414_v41, %v1573_v22 }
 0x948   :  { %v753_v45 = vadd.f32 1.0, %v1443_v44 }
 0x94a   :  { %1444 = vrcp.f32 %v753_v45  ;;  %v1102_v45 = vld [vmem:[#allocation2 + $0x18] sm:$0xf] }
 0x954   :  { %v1445_v24 = vpop.eup %1444 }
 0x955   :  { %v757_v48 = vmul.f32 %v1445_v24, %v641_v23 }
 0x9b8   :  { %v760_v46 = vpop.permute.xlu1 %759 }
 0x9b9   :  { %v762_v47 = vmul.f32 %v1445_v24, %v760_v46 }
 0x9bb   :  { %764 = vrot.lane.b32.xlu0 %v762_v47, %s1483_s22 }
 0xa2d   :  { %v765_v49 = vpop.permute.xlu0 %764 }
 0xa2e   :  { %v767_v50 = vadd.f32 %v765_v49, %v757_v48 }
 0xa30   :  { %1446 = vtanh.f32 %v767_v50 }
 0xa3a   :  { %v1447_v51 = vpop.eup %1446 }
 0xa3b   :  { %770 = vrot.lane.b32.xlu1 %v1447_v51, %s1482_s21 }
 0xaad   :  { %v771_v52 = vpop.permute.xlu1 %770 }
 0xaae   :  { %v1710_v53 = vmul.f32 %v1445_v24, %v771_v52  ;;  %v1114_v24 = vcombine.high %v1113_v43, %v1113_v43 }
 0xab0   :  { %775 = vrot.lane.b32.xlu0 %v1710_v53, %s1483_s22 }
 0xb22   :  { %v776_v54 = vpop.permute.xlu0 %775 }
 0xb23   :  { %1319 = vst.msk [vmem:[%s1850_s6 + $0x6] sm:$0x3] %vm399_vm4, %v776_v54  ;;  %1321 = vmatmul.mubr.msk.f32.vlgmr.msra.gmra.mrb[4].mxu1 %vm275_vm3, %v776_v54 }
 0xb24   :  { %1389 = vmatpush1.bf16.msra.mxu1 %v1586_v28  ;;  %1095 = vmatprep.mubr.f32.mxu1 %v1480_v2 }
 0xb25   :  { %1391 = vmatprep.subr.bf16.mxu1 %v1588_v29 }
 0xb28   :  { %1393 = vmatpush1.bf16.msra.mxu1 %v1605_v37 }
 0xbf6   :  { %v853_v57 = vpop.f32.mrb[4].mxu1 }
 0xbf7   :  { %v860_v60 = vadd.f32 %v858_v58, %v853_v57  ;;  %v855_v61 = vpop.f32.mrb[5].mxu1 }
 0xbf8   :  { %v872_v62 = vadd.f32 %v870_v59, %v855_v61 }
 0xbfa   :  { %v873_v63 = vsel %vm266_vm2, %v860_v60, %v872_v62 }
 0xbfb   :  { %1448 = vtanh.f32 %v873_v63  ;;  %v1322_v3 = vmul.f32 -1.442695, %v873_v63 }
 0xbfd   :  { %1450 = vpow2.f32 %v1322_v3  ;;  %v1415_v3 = vld [vmem:[#allocation2] ss:$0 sps:$4 sm:$0xff]  }
 0xc05   :  { %v1449_v0 = vpop.eup %1448 }
 0xc06   :  { %883 = vrot.lane.b32.xlu1 %v1449_v0, %s1482_s21 }
 0xc07   :  { %v1451_v4 = vpop.eup %1450 }
 0xc08   :  { %v877_v5 = vadd.f32 1.0, %v1451_v4  ;;  %v1235_v4 = vrot.slane %v1415_v3, %v1573_v22 }
 0xc0a   :  { %1452 = vrcp.f32 %v877_v5 }
 0xc14   :  { %v1453_v6 = vpop.eup %1452 }
 0xc15   :  { %v881_v9 = vmul.f32 %v1453_v6, %v767_v50 }
 0xc78   :  { %v884_v7 = vpop.permute.xlu1 %883 }
 0xc79   :  { %v886_v8 = vmul.f32 %v1453_v6, %v884_v7  ;;  %v1236_v7 = vcombine.high %v1235_v4, %v1235_v4 }
 0xc7b   :  { %888 = vrot.lane.b32.xlu0 %v886_v8, %s1483_s22 }
 0xced   :  { %v889_v10 = vpop.permute.xlu0 %888 }
 0xcee   :  { %v891_v11 = vadd.f32 %v889_v10, %v881_v9 }
 0xcf0   :  { %1454 = vtanh.f32 %v891_v11 }
 0xcfa   :  { %v1455_v12 = vpop.eup %1454 }
 0xcfb   :  { %894 = vrot.lane.b32.xlu1 %v1455_v12, %s1482_s21 }
 0xd6d   :  { %v895_v13 = vpop.permute.xlu1 %894 }
 0xd6e   :  { %v1728_v14 = vmul.f32 %v1453_v6, %v895_v13  ;;  %v1224_v6 = vld [vmem:[#allocation2 + $0x1c] sm:$0xf] }
 0xd70   :  { %899 = vrot.lane.b32.xlu0 %v1728_v14, %s1483_s22 }
 0xde2   :  { %v1732_v15 = vpop.permute.xlu0 %899 }
 0xde3   :  { %1325 = vmatmul.mubr.msk.f32.vlgmr.msra.gmra.mrb[8].mxu0 %vm275_vm3, %v1732_v15 }
 0xde4   :  { %1397 = vmatpush1.bf16.msra.mxu0 %v1586_v28  ;;  %1217 = vmatprep.mubr.f32.mxu0 %v1480_v2 }
 0xde5   :  { %1399 = vmatprep.subr.bf16.mxu0 %v1588_v29 }
 0xde8   :  { %1401 = vmatpush1.bf16.msra.mxu0 %v1605_v37 }
 0xeb6   :  { %v975_v18 = vpop.f32.mrb[8].mxu0 }
 0xeb7   :  { %v982_v21 = vadd.f32 %v980_v19, %v975_v18  ;;  %v977_v23 = vpop.f32.mrb[9].mxu0 }
 0xeb8   :  { %v994_v25 = vadd.f32 %v992_v20, %v977_v23 }
 0xeba   :  { %v995_v26 = vsel %vm266_vm2, %v982_v21, %v994_v25 }
 0xebb   :  { %1456 = vtanh.f32 %v995_v26  ;;  %v1326_v2 = vmul.f32 -1.442695, %v995_v26 }
 0xebd   :  { %1458 = vpow2.f32 %v1326_v2 }
 0xec5   :  { %v1457_v30 = vpop.eup %1456 }
 0xec6   :  { %1005 = vrot.lane.b32.xlu1 %v1457_v30, %s1482_s21 }
 0xec7   :  { %v1459_v28 = vpop.eup %1458 }
 0xec8   :  { %v999_v29 = vadd.f32 1.0, %v1459_v28 }
 0xeca   :  { %1460 = vrcp.f32 %v999_v29 }
 0xed4   :  { %v1461_v37 = vpop.eup %1460 }
 0xed5   :  { %v1003_v33 = vmul.f32 %v1461_v37, %v891_v11 }
 0xf38   :  { %v1006_v31 = vpop.permute.xlu1 %1005 }
 0xf39   :  { %v1008_v32 = vmul.f32 %v1461_v37, %v1006_v31 }
 0xf3b   :  { %1010 = vrot.lane.b32.xlu0 %v1008_v32, %s1483_s22 }
 0xfad   :  { %v1011_v34 = vpop.permute.xlu0 %1010 }
 0xfae   :  { %v1013_v35 = vadd.f32 %v1011_v34, %v1003_v33 }
 0xfb0   :  { %1462 = vtanh.f32 %v1013_v35 }
 0xfba   :  { %v1463_v36 = vpop.eup %1462 }
 0xfbb   :  { %1016 = vrot.lane.b32.xlu1 %v1463_v36, %s1482_s21 }
0x102d   :  { %v1017_v38 = vpop.permute.xlu1 %1016 }
0x102e   :  { %v1745_v39 = vmul.f32 %v1461_v37, %v1017_v38 }
0x1030   :  { %1021 = vrot.lane.b32.xlu0 %v1745_v39, %s1483_s22 }
0x10a2   :  { %v1749_v40 = vpop.permute.xlu0 %1021 }
0x10a3   :  { %1329 = vmatmul.mubr.msk.f32.vlgmr.msra.gmra.mrb[6].mxu1 %vm275_vm3, %v1749_v40 }
0x1176   :  { %v1097_v44 = vpop.f32.mrb[6].mxu1 }
0x1177   :  { %v1104_v46 = vadd.f32 %v1102_v45, %v1097_v44  ;;  %v1099_v47 = vpop.f32.mrb[7].mxu1 }
0x1178   :  { %v1116_v48 = vadd.f32 %v1114_v24, %v1099_v47 }
0x117a   :  { %v1117_v49 = vsel %vm266_vm2, %v1104_v46, %v1116_v48 }
0x117b   :  { %1464 = vtanh.f32 %v1117_v49  ;;  %v1330_v51 = vmul.f32 -1.442695, %v1117_v49 }
0x117d   :  { %1466 = vpow2.f32 %v1330_v51 }
0x1185   :  { %v1465_v50 = vpop.eup %1464 }
0x1186   :  { %1127 = vrot.lane.b32.xlu1 %v1465_v50, %s1482_s21 }
0x1187   :  { %v1467_v52 = vpop.eup %1466 }
0x1188   :  { %v1121_v54 = vadd.f32 1.0, %v1467_v52 }
0x118a   :  { %1468 = vrcp.f32 %v1121_v54 }
0x1194   :  { %v1469_v55 = vpop.eup %1468 }
0x1195   :  { %v1125_v58 = vmul.f32 %v1469_v55, %v1013_v35 }
0x11f8   :  { %v1128_v56 = vpop.permute.xlu1 %1127 }
0x11f9   :  { %v1130_v57 = vmul.f32 %v1469_v55, %v1128_v56 }
0x11fb   :  { %1132 = vrot.lane.b32.xlu0 %v1130_v57, %s1483_s22 }
0x126d   :  { %v1133_v59 = vpop.permute.xlu0 %1132 }
0x126e   :  { %v1135_v60 = vadd.f32 %v1133_v59, %v1125_v58 }
0x1270   :  { %1470 = vtanh.f32 %v1135_v60 }
0x127a   :  { %v1471_v61 = vpop.eup %1470 }
0x127b   :  { %1138 = vrot.lane.b32.xlu1 %v1471_v61, %s1482_s21 }
0x12ed   :  { %v1139_v62 = vpop.permute.xlu1 %1138 }
0x12ee   :  { %v1141_v63 = vmul.f32 %v1469_v55, %v1139_v62 }
0x12f0   :  { %1143 = vrot.lane.b32.xlu0 %v1141_v63, %s1483_s22 }
0x1362   :  { %v1144_v0 = vpop.permute.xlu0 %1143 }
0x1363   :  { %1333 = vmatmul.mubr.msk.f32.vlgmr.msra.gmra.mrb[10].mxu0 %vm275_vm3, %v1144_v0 }
0x1436   :  { %v1219_v5 = vpop.f32.mrb[10].mxu0 }
0x1437   :  { %v1226_v8 = vadd.f32 %v1224_v6, %v1219_v5  ;;  %v1221_v9 = vpop.f32.mrb[11].mxu0 }
0x1438   :  { %v1238_v10 = vadd.f32 %v1236_v7, %v1221_v9 }
0x143a   :  { %v1239_v11 = vsel %vm266_vm2, %v1226_v8, %v1238_v10 }
0x143b   :  { %1472 = vtanh.f32 %v1239_v11  ;;  %v1334_v13 = vmul.f32 -1.442695, %v1239_v11 }
0x143d   :  { %1474 = vpow2.f32 %v1334_v13 }
0x1445   :  { %v1473_v12 = vpop.eup %1472 }
0x1446   :  { %1249 = vrot.lane.b32.xlu1 %v1473_v12, %s1482_s21 }
0x1447   :  { %v1475_v16 = vpop.eup %1474 }
0x1448   :  { %v1243_v17 = vadd.f32 1.0, %v1475_v16 }
0x144a   :  { %1476 = vrcp.f32 %v1243_v17 }
0x1454   :  { %v1477_v18 = vpop.eup %1476 }
0x1455   :  { %v1247_v20 = vmul.f32 %v1477_v18, %v1135_v60 }
0x14b8   :  { %v1250_v19 = vpop.permute.xlu1 %1249 }
0x14b9   :  { %v1252_v22 = vmul.f32 %v1477_v18, %v1250_v19 }
0x14bb   :  { %1254 = vrot.lane.b32.xlu0 %v1252_v22, %s1483_s22 }
0x14bf   :  { %401 = vrot.lane.b32.xlu0 %v1653_v42, %s1482_s21 }
0x14c3   :  { %654 = vrot.lane.b32.xlu0 %v1691_v27, %s1482_s21 }
0x14c7   :  { %903 = vrot.lane.b32.xlu0 %v1728_v14, %s1482_s21 }
0x14cb   :  { %1147 = vrot.lane.b32.xlu0 %v1141_v63, %s1482_s21 }
0x152d   :  { %v1255_v21 = vpop.permute.xlu0 %1254 }
0x152e   :  { %v1257_v23 = vadd.f32 %v1255_v21, %v1247_v20 }
0x1530   :  { %1478 = vtanh.f32 %v1257_v23 }
0x1531   :  { %v402_v25 = vpop.permute.xlu0 %401 }
0x1532   :  { %1308 = vst.msk [vmem:[%s1850_s6 + $0xc] sm:$0xc] %vm405_vm5, %v402_v25 }
0x1535   :  { %v655_v42 = vpop.permute.xlu0 %654 }
0x1536   :  { %1316 = vst.msk [vmem:[%s1850_s6 + $0x8] sm:$0xc] %vm405_vm5, %v655_v42 }
0x1537   :  { %1327 = vst.msk [vmem:[%s1850_s6 + $0xa] sm:$0x3] %vm399_vm4, %v1749_v40 }
0x1539   :  { %v904_v27 = vpop.permute.xlu0 %903 }
0x153a   :  { %v1479_v14 = vpop.eup %1478  ;;  %1324 = vst.msk [vmem:[%s1850_s6 + $0x4] sm:$0xc] %vm405_vm5, %v904_v27 }
0x153b   :  { %1260 = vrot.lane.b32.xlu1 %v1479_v14, %s1482_s21 }
0x153d   :  { %v1148_v26 = vpop.permute.xlu0 %1147 }
0x153e   :  { %1332 = vst.msk [vmem:[%s1850_s6] sm:$0xc] %vm405_vm5, %v1148_v26 }
0x153f   :  { %528 = vrot.lane.b32.xlu1 %v1672_v1, %s1482_s21 }
0x1543   :  { %780 = vrot.lane.b32.xlu1 %v1710_v53, %s1482_s21 }
0x1547   :  { %1025 = vrot.lane.b32.xlu1 %v1745_v39, %s1482_s21 }
0x15ad   :  { %v1261_v30 = vpop.permute.xlu1 %1260 }
0x15ae   :  { %v1263_v2 = vmul.f32 %v1477_v18, %v1261_v30 }
0x15b0   :  { %1269 = vrot.lane.b32.xlu0 %v1263_v2, %s1482_s21  ;;  %1265 = vrot.lane.b32.xlu1 %v1263_v2, %s1483_s22 }
0x15b1   :  { %v529_v28 = vpop.permute.xlu1 %528 }
0x15b2   :  { %1312 = vst.msk [vmem:[%s1850_s6 + $0xa] sm:$0xc] %vm405_vm5, %v529_v28 }
0x15b3   :  { %1331 = vst.msk [vmem:[%s1850_s6 + $0xc] sm:$0x3] %vm399_vm4, %v1144_v0 }
0x15b4   :  { %1278 = vrot.lane.b32.xlu1 %v1257_v23, %s1484_s3 }
0x15b5   :  { %v781_v1 = vpop.permute.xlu1 %780 }
0x15b6   :  { %1320 = vst.msk [vmem:[%s1850_s6 + $0x6] sm:$0xc] %vm405_vm5, %v781_v1 }
0x15b7   :  { %1323 = vst.msk [vmem:[%s1850_s6 + $0x8] sm:$0x3] %vm399_vm4, %v1732_v15 }
0x15b9   :  { %v1026_v53 = vpop.permute.xlu1 %1025 }
0x15ba   :  { %1328 = vst.msk [vmem:[%s1850_s6 + $0x2] sm:$0xc] %vm405_vm5, %v1026_v53 }
0x1622   :  { %v1270_v29 = vpop.permute.xlu0 %1269  ;;  %v1266_v37 = vpop.permute.xlu1 %1265 }
0x1623   :  { %1272 = vst.msk [vmem:[%s1850_s6 - $0x2] sm:$0xc] %vm405_vm5, %v1270_v29 }
0x1624   :  { %1335 = vst.msk [vmem:[%s1850_s6 + $0xe] sm:$0x3] %vm399_vm4, %v1266_v37  ;;  %1273 = vst.msk [vmem:[%s1851_s7] sm:$0x3] %vm399_vm4, %v1266_v37 }
0x1625   :  { %1336 = vst.msk [vmem:[%s1851_s7] sm:$0xc] %vm1275_vm6, %v1266_v37 }
0x1626   :  { %v1279_v15 = vpop.permute.xlu1 %1278 }
0x1627   :  { %1281 = vst.msk [vmem:[%s1852_s8] sm:$0x3] %vm399_vm4, %v1279_v15 }
0x1628   :  { %1337 = vst.msk [vmem:[%s1852_s8] sm:$0xc] %vm1275_vm6, %v1279_v15 }

</bundles_post_ra>
